<compile_context>
chip_gen: v7x
topology: tpu7x:2x2x1
jax: 0.10.0
libtpu: 0.0.40
codegen_flags: <defaults>
</compile_context>

<pallas_src>
import numpy as np
import jax
import jax.numpy as jnp
from jax.experimental import pallas as pl
from jax.experimental.pallas import tpu as pltpu


# ----------------------------- Pallas kernels ------------------------------ #

def _bilstm_layer_kernel(x_ref, m_ref, wih_ref, whh_ref, b_ref, out_ref,
                         gx_scr, h_scr, c_scr):
    """One bidirectional LSTM layer.

    Grid axis 0 = direction (0: forward in time, 1: time-reversed). The whole
    sequence is resident in VMEM; time recurrence is an in-kernel fori_loop.
    """
    d = pl.program_id(0)                      # direction
    T, B, Din = x_ref.shape
    H = whh_ref.shape[0]
    last = T - 1

    # Hoisted input projection (+ folded biases) for ALL timesteps at once:
    # one MXU-friendly (T*B, Din) @ (Din, 4H) matmul, off the serial path.
    x_all = x_ref[...].reshape(T * B, Din)
    gx = (jnp.dot(x_all, wih_ref[...], preferred_element_type=jnp.float32)
          + b_ref[...])                       # (T*B, 4H)
    gx_scr[...] = gx.reshape(T, B, 4 * H)

    h_scr[...] = jnp.zeros_like(h_scr)
    c_scr[...] = jnp.zeros_like(c_scr)

    def step(t, carry):
        idx = jnp.where(d == 0, t, last - t)  # reversed walk for bwd dir
        m_t = m_ref[idx]                      # (B, 1)  1.0 valid, 0.0 pad
        # PyTorch gate order i, f, g, o; only h @ W_hh remains per step.
        g = gx_scr[idx] + jnp.dot(h_scr[...], whh_ref[...],
                                  preferred_element_type=jnp.float32)
        i_g = jax.nn.sigmoid(g[:, 0 * H:1 * H])
        f_g = jax.nn.sigmoid(g[:, 1 * H:2 * H])
        g_g = jnp.tanh(g[:, 2 * H:3 * H])
        o_g = jax.nn.sigmoid(g[:, 3 * H:4 * H])
        c_new = (f_g * c_scr[...] + i_g * g_g) * m_t   # packed-seq gating
        h_new = (o_g * jnp.tanh(c_new)) * m_t
        h_scr[...] = h_new
        c_scr[...] = c_new
        out_ref[idx] = h_new.astype(out_ref.dtype)
        return carry

    jax.lax.fori_loop(0, T, step, 0, unroll=True)


def _bilstm_layer(x, m, wih, whh, b):
    """x: (T, B, Din) f32; m: (T, B, 1) f32; wih/whh/b stacked over direction."""
    T, B, Din = x.shape
    H = whh.shape[1]
    return pl.pallas_call(
        _bilstm_layer_kernel,
        out_shape=jax.ShapeDtypeStruct((T, B, 2 * H), jnp.float32),
        grid_spec=pltpu.PrefetchScalarGridSpec(
            num_scalar_prefetch=0,
            grid=(2,),                                      # direction axis
            in_specs=[
                pl.BlockSpec((T, B, Din), lambda d: (0, 0, 0)),
                pl.BlockSpec((T, B, 1), lambda d: (0, 0, 0)),
                pl.BlockSpec((None, Din, 4 * H), lambda d: (d, 0, 0)),
                pl.BlockSpec((None, H, 4 * H), lambda d: (d, 0, 0)),
                pl.BlockSpec((None, 1, 4 * H), lambda d: (d, 0, 0)),
            ],
            # fwd writes the left H columns, bwd the right H columns.
            out_specs=pl.BlockSpec((T, B, H), lambda d: (0, 0, d)),
            scratch_shapes=[
                pltpu.VMEM((T, B, 4 * H), jnp.float32),     # hoisted gates_x
                pltpu.VMEM((B, H), jnp.float32),            # h
                pltpu.VMEM((B, H), jnp.float32),            # c
            ],
        ),
        # Directions are independent -> parallel (2x on v7x's two TCs).
        compiler_params=pltpu.CompilerParams(
            dimension_semantics=("parallel",)),
    )(x, m, wih, whh, b)


def _linear_kernel(x_ref, w_ref, b_ref, o_ref):
    o_ref[...] = (jnp.dot(x_ref[...], w_ref[...],
                          preferred_element_type=jnp.float32)
                  + b_ref[...]).astype(o_ref.dtype)


def _linear(x2d, w, b):
    N = x2d.shape[0]
    M = w.shape[1]
    return pl.pallas_call(
        _linear_kernel,
        out_shape=jax.ShapeDtypeStruct((N, M), jnp.float32),
    )(x2d, w, b)


# ----------------------------- forward wrapper ----------------------------- #

def rna_lstm_forward(params, tokens, mask):
    """tokens: (B, T) int32 in [0, vocab); mask: (B, T, 1) f32 (prefix of 1s)."""
    B, T = tokens.shape
    # Pad batch to a sublane multiple (8) for dense vregs / MXU rows.
    B_pad = max(8, ((B + 7) // 8) * 8)
    if B_pad != B:
        tokens = jnp.pad(tokens, ((0, B_pad - B), (0, 0)))
        mask = jnp.pad(mask, ((0, B_pad - B), (0, 0), (0, 0)))  # pad rows: mask=0

    emb = jnp.take(params["embedding"], tokens, axis=0)         # (Bp, T, H) glue
    emb = emb * mask                                            # input * mask
    x = jnp.transpose(emb, (1, 0, 2)).astype(jnp.float32)       # (T, Bp, H)
    m = jnp.transpose(mask, (1, 0, 2)).astype(jnp.float32)      # (T, Bp, 1)

    for layer in params["lstm"]:
        x = _bilstm_layer(x, m, layer["wih"], layer["whh"], layer["b"])

    Tn, Bp, twoH = x.shape
    H = twoH // 2
    mapped = _linear(x.reshape(Tn * Bp, twoH), params["map_w"], params["map_b"])
    out = jnp.transpose(mapped.reshape(Tn, Bp, H), (1, 0, 2))   # (Bp, T, H)
    return out[:B]


# ------------------------- pure-JAX reference check ------------------------ #

def _ref_lstm_dir(x_tbd, m_tb1, w_ih, w_hh, b):
    H = w_hh.shape[0]
    B = x_tbd.shape[1]

    def step(carry, inp):
        h, c = carry
        x_t, m_t = inp
        gates = x_t @ w_ih + h @ w_hh + b
        i = jax.nn.sigmoid(gates[:, :H])
        f = jax.nn.sigmoid(gates[:, H:2 * H])
        g = jnp.tanh(gates[:, 2 * H:3 * H])
        o = jax.nn.sigmoid(gates[:, 3 * H:])
        c_new = (f * c + i * g) * m_t
        h_new = (o * jnp.tanh(c_new)) * m_t
        return (h_new, c_new), h_new

    h0 = jnp.zeros((B, H), jnp.float32)
    c0 = jnp.zeros((B, H), jnp.float32)
    _, hs = jax.lax.scan(step, (h0, c0), (x_tbd, m_tb1))
    return hs


def ref_forward(params, tokens, mask):
    emb = jnp.take(params["embedding"], tokens, axis=0) * mask
    x = jnp.transpose(emb, (1, 0, 2)).astype(jnp.float32)
    m = jnp.transpose(mask, (1, 0, 2)).astype(jnp.float32)
    for layer in params["lstm"]:
        fwd = _ref_lstm_dir(x, m, layer["wih"][0], layer["whh"][0],
                            layer["b"][0])
        bwd = _ref_lstm_dir(x[::-1], m[::-1], layer["wih"][1], layer["whh"][1],
                            layer["b"][1])[::-1]
        x = jnp.concatenate([fwd, bwd], axis=-1)
    out = jnp.transpose(x, (1, 0, 2))
    return out @ params["map_w"] + params["map_b"]


# ------------------------------- parameters -------------------------------- #

def init_params(key, vocab=4, hidden=128, num_layers=3):
    keys = iter(jax.random.split(key, 64))

    def u(shape, scale):
        return jax.random.uniform(next(keys), shape, jnp.float32, -scale, scale)

    k = 1.0 / np.sqrt(hidden)
    params = {"embedding": jax.random.normal(next(keys), (vocab, hidden),
                                             jnp.float32)}
    layers = []
    for l in range(num_layers):
        in_dim = hidden if l == 0 else 2 * hidden
        wih, whh, bb = [], [], []
        for _ in range(2):                         # fwd, bwd
            wih.append(u((in_dim, 4 * hidden), k))             # (in, 4H) = W_ih^T
            whh.append(u((hidden, 4 * hidden), k))             # (H, 4H)  = W_hh^T
            bb.append(u((1, 4 * hidden), k) + u((1, 4 * hidden), k))  # b_ih+b_hh
        layers.append({"wih": jnp.stack(wih),      # (2, in, 4H)
                       "whh": jnp.stack(whh),      # (2, H, 4H)
                       "b": jnp.stack(bb)})        # (2, 1, 4H)
    params["lstm"] = layers
    k2 = 1.0 / np.sqrt(2 * hidden)
    params["map_w"] = u((2 * hidden, hidden), k2)  # Linear(2H -> H), W^T
    params["map_b"] = u((1, hidden), k2)
    return params


# ---------------------------------- main ------------------------------------ #

if __name__ == "__main__":
    B, T, VOCAB, H, NUM_LAYERS = 2, 8, 4, 128, 3
    key = jax.random.PRNGKey(0)
    pkey, tkey = jax.random.split(key)
    params = init_params(pkey, VOCAB, H, NUM_LAYERS)

    tokens = jax.random.randint(tkey, (B, T), 0, VOCAB, dtype=jnp.int32)
    lengths = np.array([T, 5], dtype=np.int32)          # valid prefix per seq
    mask_np = (np.arange(T)[None, :] < lengths[:, None]).astype(np.float32)[..., None]
    mask = jnp.asarray(mask_np)                         # (B, T, 1), prefix of 1s

    out = rna_lstm_forward(params, tokens, mask)
    # pad_packed_sequence trims the time axis to max(lengths)
    max_len = int(lengths.max())
    out = jax.block_until_ready(out[:, :max_len])

    ref = ref_forward(params, tokens, mask)[:, :max_len]
    np.testing.assert_allclose(np.asarray(out), np.asarray(ref),
                               rtol=1e-4, atol=1e-4)
    assert out.shape == (B, max_len, H)
    print("KERNEL_OK")
</pallas_src>

<mosaic_0001>
module attributes {stable_mosaic.version = 11 : i64} {
  func.func @_bilstm_layer_kernel(%arg0: i32, %arg1: memref<8x8x128xf32, #tpu.memory_space<vmem>>, %arg2: memref<8x8x1xf32, #tpu.memory_space<vmem>>, %arg3: memref<1x128x512xf32, #tpu.memory_space<vmem>>, %arg4: memref<1x128x512xf32, #tpu.memory_space<vmem>>, %arg5: memref<1x1x512xf32, #tpu.memory_space<vmem>>, %arg6: memref<8x8x128xf32, #tpu.memory_space<vmem>>, %arg7: memref<8x8x512xf32, #tpu.memory_space<vmem>>, %arg8: memref<8x128xf32, #tpu.memory_space<vmem>>, %arg9: memref<8x128xf32, #tpu.memory_space<vmem>>) attributes {dimension_semantics = [#tpu.dimension_semantics<parallel>], iteration_bounds = array<i64: 2>, scalar_prefetch = 0 : i64, scratch_operands = 3 : i64, tpu.core_type = #tpu.core_type<tc>, window_params = [{pipeline_mode = #tpu.pipeline_mode<synchronous>, transform_indices = @transform_0, window_bounds = array<i64: 8, 8, 128>}, {pipeline_mode = #tpu.pipeline_mode<synchronous>, transform_indices = @transform_1, window_bounds = array<i64: 8, 8, 1>}, {transform_indices = @transform_2, window_bounds = array<i64: 1, 128, 512>}, {transform_indices = @transform_3, window_bounds = array<i64: 1, 128, 512>}, {transform_indices = @transform_4, window_bounds = array<i64: 1, 1, 512>}, {transform_indices = @transform_5, window_bounds = array<i64: 8, 8, 128>}]} {
    %c0 = arith.constant 0 : index
    %c0_0 = arith.constant 0 : index
    %c0_1 = arith.constant 0 : index
    %0 = vector.load %arg1[%c0, %c0_0, %c0_1] : memref<8x8x128xf32, #tpu.memory_space<vmem>>, vector<8x8x128xf32>
    %1 = vector.shape_cast %0 : vector<8x8x128xf32> to vector<64x128xf32>
    %c0_2 = arith.constant 0 : index
    %c0_3 = arith.constant 0 : index
    %c0_4 = arith.constant 0 : index
    %2 = vector.load %arg3[%c0_2, %c0_3, %c0_4] : memref<1x128x512xf32, #tpu.memory_space<vmem>>, vector<1x128x512xf32>
    %3 = vector.shape_cast %2 : vector<1x128x512xf32> to vector<128x512xf32>
    %cst = arith.constant dense<0.000000e+00> : vector<64x512xf32>
    %4 = tpu.matmul %1, %3, %cst {dimension_numbers = #tpu.dot_dimension_numbers<[1], [0], [0], [1], [0, 0, 1, 1], [], []>} : vector<64x128xf32>, vector<128x512xf32>, vector<64x512xf32> -> vector<64x512xf32>
    %c0_5 = arith.constant 0 : index
    %c0_6 = arith.constant 0 : index
    %c0_7 = arith.constant 0 : index
    %5 = vector.load %arg5[%c0_5, %c0_6, %c0_7] : memref<1x1x512xf32, #tpu.memory_space<vmem>>, vector<1x1x512xf32>
    %6 = vector.shape_cast %5 : vector<1x1x512xf32> to vector<1x512xf32>
    %7 = vector.broadcast %6 : vector<1x512xf32> to vector<64x512xf32>
    %8 = arith.addf %4, %7 : vector<64x512xf32>
    %9 = vector.shape_cast %8 : vector<64x512xf32> to vector<8x8x512xf32>
    %c0_8 = arith.constant 0 : index
    %c0_9 = arith.constant 0 : index
    %c0_10 = arith.constant 0 : index
    %10 = vector.load %arg7[%c0_8, %c0_9, %c0_10] : memref<8x8x512xf32, #tpu.memory_space<vmem>>, vector<8x8x512xf32>
    tpu.vector_store %arg7[%c0_8, %c0_9, %c0_10], %9 {strides = array<i32>} : memref<8x8x512xf32, #tpu.memory_space<vmem>>, vector<8x8x512xf32>,
    %cst_11 = arith.constant 0.000000e+00 : f32
    %11 = vector.broadcast %cst_11 : f32 to vector<8x128xf32>
    %c0_12 = arith.constant 0 : index
    %c0_13 = arith.constant 0 : index
    %12 = vector.load %arg8[%c0_12, %c0_13] : memref<8x128xf32, #tpu.memory_space<vmem>>, vector<8x128xf32>
    tpu.vector_store %arg8[%c0_12, %c0_13], %11 {strides = array<i32>} : memref<8x128xf32, #tpu.memory_space<vmem>>, vector<8x128xf32>,
    %cst_14 = arith.constant 0.000000e+00 : f32
    %13 = vector.broadcast %cst_14 : f32 to vector<8x128xf32>
    %c0_15 = arith.constant 0 : index
    %c0_16 = arith.constant 0 : index
    %14 = vector.load %arg9[%c0_15, %c0_16] : memref<8x128xf32, #tpu.memory_space<vmem>>, vector<8x128xf32>
    tpu.vector_store %arg9[%c0_15, %c0_16], %13 {strides = array<i32>} : memref<8x128xf32, #tpu.memory_space<vmem>>, vector<8x128xf32>,
    %c0_i32 = arith.constant 0 : i32
    %c0_i32_17 = arith.constant 0 : i32
    %15 = arith.cmpi eq, %arg0, %c0_i32_17 : i32
    %c7_i32 = arith.constant 7 : i32
    %16 = arith.subi %c7_i32, %c0_i32 : i32
    %17 = arith.select %15, %c0_i32, %16 : i32
    %18 = arith.index_cast %17 : i32 to index
    %c0_18 = arith.constant 0 : index
    %c0_19 = arith.constant 0 : index
    %19 = vector.load %arg2[%18, %c0_18, %c0_19] : memref<8x8x1xf32, #tpu.memory_space<vmem>>, vector<1x8x1xf32>
    %20 = vector.shape_cast %19 : vector<1x8x1xf32> to vector<8x1xf32>
    %21 = arith.index_cast %17 : i32 to index
    %c0_20 = arith.constant 0 : index
    %c0_21 = arith.constant 0 : index
    %22 = vector.load %arg7[%21, %c0_20, %c0_21] : memref<8x8x512xf32, #tpu.memory_space<vmem>>, vector<1x8x512xf32>
    %23 = vector.shape_cast %22 : vector<1x8x512xf32> to vector<8x512xf32>
    %c0_22 = arith.constant 0 : index
    %c0_23 = arith.constant 0 : index
    %24 = vector.load %arg8[%c0_22, %c0_23] : memref<8x128xf32, #tpu.memory_space<vmem>>, vector<8x128xf32>
    %c0_24 = arith.constant 0 : index
    %c0_25 = arith.constant 0 : index
    %c0_26 = arith.constant 0 : index
    %25 = vector.load %arg4[%c0_24, %c0_25, %c0_26] : memref<1x128x512xf32, #tpu.memory_space<vmem>>, vector<1x128x512xf32>
    %26 = vector.shape_cast %25 : vector<1x128x512xf32> to vector<128x512xf32>
    %cst_27 = arith.constant dense<0.000000e+00> : vector<8x512xf32>
    %27 = tpu.matmul %24, %26, %cst_27 {dimension_numbers = #tpu.dot_dimension_numbers<[1], [0], [0], [1], [0, 0, 1, 1], [], []>} : vector<8x128xf32>, vector<128x512xf32>, vector<8x512xf32> -> vector<8x512xf32>
    %28 = arith.addf %23, %27 : vector<8x512xf32>
    %29 = vector.extract_strided_slice %28 {offsets = [0, 0], sizes = [8, 128], strides = [1, 1]} : vector<8x512xf32> to vector<8x128xf32>
    %30 = arith.negf %29 : vector<8x128xf32>
    %31 = math.exp %30 : vector<8x128xf32>
    %cst_28 = arith.constant 1.000000e+00 : f32
    %32 = vector.broadcast %cst_28 : f32 to vector<8x128xf32>
    %33 = arith.addf %32, %31 : vector<8x128xf32>
    %34 = arith.divf %32, %33 : vector<8x128xf32>
    %35 = vector.extract_strided_slice %28 {offsets = [0, 128], sizes = [8, 128], strides = [1, 1]} : vector<8x512xf32> to vector<8x128xf32>
    %36 = arith.negf %35 : vector<8x128xf32>
    %37 = math.exp %36 : vector<8x128xf32>
    %cst_29 = arith.constant 1.000000e+00 : f32
    %38 = vector.broadcast %cst_29 : f32 to vector<8x128xf32>
    %39 = arith.addf %38, %37 : vector<8x128xf32>
    %40 = arith.divf %38, %39 : vector<8x128xf32>
    %41 = vector.extract_strided_slice %28 {offsets = [0, 256], sizes = [8, 128], strides = [1, 1]} : vector<8x512xf32> to vector<8x128xf32>
    %42 = math.tanh %41 : vector<8x128xf32>
    %43 = vector.extract_strided_slice %28 {offsets = [0, 384], sizes = [8, 128], strides = [1, 1]} : vector<8x512xf32> to vector<8x128xf32>
    %44 = arith.negf %43 : vector<8x128xf32>
    %45 = math.exp %44 : vector<8x128xf32>
    %cst_30 = arith.constant 1.000000e+00 : f32
    %46 = vector.broadcast %cst_30 : f32 to vector<8x128xf32>
    %47 = arith.addf %46, %45 : vector<8x128xf32>
    %48 = arith.divf %46, %47 : vector<8x128xf32>
    %c0_31 = arith.constant 0 : index
    %c0_32 = arith.constant 0 : index
    %49 = vector.load %arg9[%c0_31, %c0_32] : memref<8x128xf32, #tpu.memory_space<vmem>>, vector<8x128xf32>
    %50 = arith.mulf %40, %49 : vector<8x128xf32>
    %51 = arith.mulf %34, %42 : vector<8x128xf32>
    %52 = arith.addf %50, %51 : vector<8x128xf32>
    %53 = vector.broadcast %20 : vector<8x1xf32> to vector<8x128xf32>
    %54 = arith.mulf %52, %53 : vector<8x128xf32>
    %55 = math.tanh %54 : vector<8x128xf32>
    %56 = arith.mulf %48, %55 : vector<8x128xf32>
    %57 = vector.broadcast %20 : vector<8x1xf32> to vector<8x128xf32>
    %58 = arith.mulf %56, %57 : vector<8x128xf32>
    %c0_33 = arith.constant 0 : index
    %c0_34 = arith.constant 0 : index
    %59 = vector.load %arg8[%c0_33, %c0_34] : memref<8x128xf32, #tpu.memory_space<vmem>>, vector<8x128xf32>
    tpu.vector_store %arg8[%c0_33, %c0_34], %58 {strides = array<i32>} : memref<8x128xf32, #tpu.memory_space<vmem>>, vector<8x128xf32>,
    %c0_35 = arith.constant 0 : index
    %c0_36 = arith.constant 0 : index
    %60 = vector.load %arg9[%c0_35, %c0_36] : memref<8x128xf32, #tpu.memory_space<vmem>>, vector<8x128xf32>
    tpu.vector_store %arg9[%c0_35, %c0_36], %54 {strides = array<i32>} : memref<8x128xf32, #tpu.memory_space<vmem>>, vector<8x128xf32>,
    %61 = arith.index_cast %17 : i32 to index
    %c0_37 = arith.constant 0 : index
    %c0_38 = arith.constant 0 : index
    %62 = vector.load %arg6[%61, %c0_37, %c0_38] : memref<8x8x128xf32, #tpu.memory_space<vmem>>, vector<1x8x128xf32>
    %63 = vector.shape_cast %62 : vector<1x8x128xf32> to vector<8x128xf32>
    %64 = vector.shape_cast %58 : vector<8x128xf32> to vector<1x8x128xf32>
    tpu.vector_store %arg6[%61, %c0_37, %c0_38], %64 {strides = array<i32>} : memref<8x8x128xf32, #tpu.memory_space<vmem>>, vector<1x8x128xf32>,
    %c1_i32 = arith.constant 1 : i32
    %c0_i32_39 = arith.constant 0 : i32
    %65 = arith.cmpi eq, %arg0, %c0_i32_39 : i32
    %c7_i32_40 = arith.constant 7 : i32
    %66 = arith.subi %c7_i32_40, %c1_i32 : i32
    %67 = arith.select %65, %c1_i32, %66 : i32
    %68 = arith.index_cast %67 : i32 to index
    %c0_41 = arith.constant 0 : index
    %c0_42 = arith.constant 0 : index
    %69 = vector.load %arg2[%68, %c0_41, %c0_42] : memref<8x8x1xf32, #tpu.memory_space<vmem>>, vector<1x8x1xf32>
    %70 = vector.shape_cast %69 : vector<1x8x1xf32> to vector<8x1xf32>
    %71 = arith.index_cast %67 : i32 to index
    %c0_43 = arith.constant 0 : index
    %c0_44 = arith.constant 0 : index
    %72 = vector.load %arg7[%71, %c0_43, %c0_44] : memref<8x8x512xf32, #tpu.memory_space<vmem>>, vector<1x8x512xf32>
    %73 = vector.shape_cast %72 : vector<1x8x512xf32> to vector<8x512xf32>
    %c0_45 = arith.constant 0 : index
    %c0_46 = arith.constant 0 : index
    %74 = vector.load %arg8[%c0_45, %c0_46] : memref<8x128xf32, #tpu.memory_space<vmem>>, vector<8x128xf32>
    %c0_47 = arith.constant 0 : index
    %c0_48 = arith.constant 0 : index
    %c0_49 = arith.constant 0 : index
    %75 = vector.load %arg4[%c0_47, %c0_48, %c0_49] : memref<1x128x512xf32, #tpu.memory_space<vmem>>, vector<1x128x512xf32>
    %76 = vector.shape_cast %75 : vector<1x128x512xf32> to vector<128x512xf32>
    %cst_50 = arith.constant dense<0.000000e+00> : vector<8x512xf32>
    %77 = tpu.matmul %74, %76, %cst_50 {dimension_numbers = #tpu.dot_dimension_numbers<[1], [0], [0], [1], [0, 0, 1, 1], [], []>} : vector<8x128xf32>, vector<128x512xf32>, vector<8x512xf32> -> vector<8x512xf32>
    %78 = arith.addf %73, %77 : vector<8x512xf32>
    %79 = vector.extract_strided_slice %78 {offsets = [0, 0], sizes = [8, 128], strides = [1, 1]} : vector<8x512xf32> to vector<8x128xf32>
    %80 = arith.negf %79 : vector<8x128xf32>
    %81 = math.exp %80 : vector<8x128xf32>
    %cst_51 = arith.constant 1.000000e+00 : f32
    %82 = vector.broadcast %cst_51 : f32 to vector<8x128xf32>
    %83 = arith.addf %82, %81 : vector<8x128xf32>
    %84 = arith.divf %82, %83 : vector<8x128xf32>
    %85 = vector.extract_strided_slice %78 {offsets = [0, 128], sizes = [8, 128], strides = [1, 1]} : vector<8x512xf32> to vector<8x128xf32>
    %86 = arith.negf %85 : vector<8x128xf32>
    %87 = math.exp %86 : vector<8x128xf32>
    %cst_52 = arith.constant 1.000000e+00 : f32
    %88 = vector.broadcast %cst_52 : f32 to vector<8x128xf32>
    %89 = arith.addf %88, %87 : vector<8x128xf32>
    %90 = arith.divf %88, %89 : vector<8x128xf32>
    %91 = vector.extract_strided_slice %78 {offsets = [0, 256], sizes = [8, 128], strides = [1, 1]} : vector<8x512xf32> to vector<8x128xf32>
    %92 = math.tanh %91 : vector<8x128xf32>
    %93 = vector.extract_strided_slice %78 {offsets = [0, 384], sizes = [8, 128], strides = [1, 1]} : vector<8x512xf32> to vector<8x128xf32>
    %94 = arith.negf %93 : vector<8x128xf32>
    %95 = math.exp %94 : vector<8x128xf32>
    %cst_53 = arith.constant 1.000000e+00 : f32
    %96 = vector.broadcast %cst_53 : f32 to vector<8x128xf32>
    %97 = arith.addf %96, %95 : vector<8x128xf32>
    %98 = arith.divf %96, %97 : vector<8x128xf32>
    %c0_54 = arith.constant 0 : index
    %c0_55 = arith.constant 0 : index
    %99 = vector.load %arg9[%c0_54, %c0_55] : memref<8x128xf32, #tpu.memory_space<vmem>>, vector<8x128xf32>
    %100 = arith.mulf %90, %99 : vector<8x128xf32>
    %101 = arith.mulf %84, %92 : vector<8x128xf32>
    %102 = arith.addf %100, %101 : vector<8x128xf32>
    %103 = vector.broadcast %70 : vector<8x1xf32> to vector<8x128xf32>
    %104 = arith.mulf %102, %103 : vector<8x128xf32>
    %105 = math.tanh %104 : vector<8x128xf32>
    %106 = arith.mulf %98, %105 : vector<8x128xf32>
    %107 = vector.broadcast %70 : vector<8x1xf32> to vector<8x128xf32>
    %108 = arith.mulf %106, %107 : vector<8x128xf32>
    %c0_56 = arith.constant 0 : index
    %c0_57 = arith.constant 0 : index
    %109 = vector.load %arg8[%c0_56, %c0_57] : memref<8x128xf32, #tpu.memory_space<vmem>>, vector<8x128xf32>
    tpu.vector_store %arg8[%c0_56, %c0_57], %108 {strides = array<i32>} : memref<8x128xf32, #tpu.memory_space<vmem>>, vector<8x128xf32>,
    %c0_58 = arith.constant 0 : index
    %c0_59 = arith.constant 0 : index
    %110 = vector.load %arg9[%c0_58, %c0_59] : memref<8x128xf32, #tpu.memory_space<vmem>>, vector<8x128xf32>
    tpu.vector_store %arg9[%c0_58, %c0_59], %104 {strides = array<i32>} : memref<8x128xf32, #tpu.memory_space<vmem>>, vector<8x128xf32>,
    %111 = arith.index_cast %67 : i32 to index
    %c0_60 = arith.constant 0 : index
    %c0_61 = arith.constant 0 : index
    %112 = vector.load %arg6[%111, %c0_60, %c0_61] : memref<8x8x128xf32, #tpu.memory_space<vmem>>, vector<1x8x128xf32>
    %113 = vector.shape_cast %112 : vector<1x8x128xf32> to vector<8x128xf32>
    %114 = vector.shape_cast %108 : vector<8x128xf32> to vector<1x8x128xf32>
    tpu.vector_store %arg6[%111, %c0_60, %c0_61], %114 {strides = array<i32>} : memref<8x8x128xf32, #tpu.memory_space<vmem>>, vector<1x8x128xf32>,
    %c2_i32 = arith.constant 2 : i32
    %c0_i32_62 = arith.constant 0 : i32
    %115 = arith.cmpi eq, %arg0, %c0_i32_62 : i32
    %c7_i32_63 = arith.constant 7 : i32
    %116 = arith.subi %c7_i32_63, %c2_i32 : i32
    %117 = arith.select %115, %c2_i32, %116 : i32
    %118 = arith.index_cast %117 : i32 to index
    %c0_64 = arith.constant 0 : index
    %c0_65 = arith.constant 0 : index
    %119 = vector.load %arg2[%118, %c0_64, %c0_65] : memref<8x8x1xf32, #tpu.memory_space<vmem>>, vector<1x8x1xf32>
    %120 = vector.shape_cast %119 : vector<1x8x1xf32> to vector<8x1xf32>
    %121 = arith.index_cast %117 : i32 to index
    %c0_66 = arith.constant 0 : index
    %c0_67 = arith.constant 0 : index
    %122 = vector.load %arg7[%121, %c0_66, %c0_67] : memref<8x8x512xf32, #tpu.memory_space<vmem>>, vector<1x8x512xf32>
    %123 = vector.shape_cast %122 : vector<1x8x512xf32> to vector<8x512xf32>
    %c0_68 = arith.constant 0 : index
    %c0_69 = arith.constant 0 : index
    %124 = vector.load %arg8[%c0_68, %c0_69] : memref<8x128xf32, #tpu.memory_space<vmem>>, vector<8x128xf32>
    %c0_70 = arith.constant 0 : index
    %c0_71 = arith.constant 0 : index
    %c0_72 = arith.constant 0 : index
    %125 = vector.load %arg4[%c0_70, %c0_71, %c0_72] : memref<1x128x512xf32, #tpu.memory_space<vmem>>, vector<1x128x512xf32>
    %126 = vector.shape_cast %125 : vector<1x128x512xf32> to vector<128x512xf32>
    %cst_73 = arith.constant dense<0.000000e+00> : vector<8x512xf32>
    %127 = tpu.matmul %124, %126, %cst_73 {dimension_numbers = #tpu.dot_dimension_numbers<[1], [0], [0], [1], [0, 0, 1, 1], [], []>} : vector<8x128xf32>, vector<128x512xf32>, vector<8x512xf32> -> vector<8x512xf32>
    %128 = arith.addf %123, %127 : vector<8x512xf32>
    %129 = vector.extract_strided_slice %128 {offsets = [0, 0], sizes = [8, 128], strides = [1, 1]} : vector<8x512xf32> to vector<8x128xf32>
    %130 = arith.negf %129 : vector<8x128xf32>
    %131 = math.exp %130 : vector<8x128xf32>
    %cst_74 = arith.constant 1.000000e+00 : f32
    %132 = vector.broadcast %cst_74 : f32 to vector<8x128xf32>
    %133 = arith.addf %132, %131 : vector<8x128xf32>
    %134 = arith.divf %132, %133 : vector<8x128xf32>
    %135 = vector.extract_strided_slice %128 {offsets = [0, 128], sizes = [8, 128], strides = [1, 1]} : vector<8x512xf32> to vector<8x128xf32>
    %136 = arith.negf %135 : vector<8x128xf32>
    %137 = math.exp %136 : vector<8x128xf32>
    %cst_75 = arith.constant 1.000000e+00 : f32
    %138 = vector.broadcast %cst_75 : f32 to vector<8x128xf32>
    %139 = arith.addf %138, %137 : vector<8x128xf32>
    %140 = arith.divf %138, %139 : vector<8x128xf32>
    %141 = vector.extract_strided_slice %128 {offsets = [0, 256], sizes = [8, 128], strides = [1, 1]} : vector<8x512xf32> to vector<8x128xf32>
    %142 = math.tanh %141 : vector<8x128xf32>
    %143 = vector.extract_strided_slice %128 {offsets = [0, 384], sizes = [8, 128], strides = [1, 1]} : vector<8x512xf32> to vector<8x128xf32>
    %144 = arith.negf %143 : vector<8x128xf32>
    %145 = math.exp %144 : vector<8x128xf32>
    %cst_76 = arith.constant 1.000000e+00 : f32
    %146 = vector.broadcast %cst_76 : f32 to vector<8x128xf32>
    %147 = arith.addf %146, %145 : vector<8x128xf32>
    %148 = arith.divf %146, %147 : vector<8x128xf32>
    %c0_77 = arith.constant 0 : index
    %c0_78 = arith.constant 0 : index
    %149 = vector.load %arg9[%c0_77, %c0_78] : memref<8x128xf32, #tpu.memory_space<vmem>>, vector<8x128xf32>
    %150 = arith.mulf %140, %149 : vector<8x128xf32>
    %151 = arith.mulf %134, %142 : vector<8x128xf32>
    %152 = arith.addf %150, %151 : vector<8x128xf32>
    %153 = vector.broadcast %120 : vector<8x1xf32> to vector<8x128xf32>
    %154 = arith.mulf %152, %153 : vector<8x128xf32>
    %155 = math.tanh %154 : vector<8x128xf32>
    %156 = arith.mulf %148, %155 : vector<8x128xf32>
    %157 = vector.broadcast %120 : vector<8x1xf32> to vector<8x128xf32>
    %158 = arith.mulf %156, %157 : vector<8x128xf32>
    %c0_79 = arith.constant 0 : index
    %c0_80 = arith.constant 0 : index
    %159 = vector.load %arg8[%c0_79, %c0_80] : memref<8x128xf32, #tpu.memory_space<vmem>>, vector<8x128xf32>
    tpu.vector_store %arg8[%c0_79, %c0_80], %158 {strides = array<i32>} : memref<8x128xf32, #tpu.memory_space<vmem>>, vector<8x128xf32>,
    %c0_81 = arith.constant 0 : index
    %c0_82 = arith.constant 0 : index
    %160 = vector.load %arg9[%c0_81, %c0_82] : memref<8x128xf32, #tpu.memory_space<vmem>>, vector<8x128xf32>
    tpu.vector_store %arg9[%c0_81, %c0_82], %154 {strides = array<i32>} : memref<8x128xf32, #tpu.memory_space<vmem>>, vector<8x128xf32>,
    %161 = arith.index_cast %117 : i32 to index
    %c0_83 = arith.constant 0 : index
    %c0_84 = arith.constant 0 : index
    %162 = vector.load %arg6[%161, %c0_83, %c0_84] : memref<8x8x128xf32, #tpu.memory_space<vmem>>, vector<1x8x128xf32>
    %163 = vector.shape_cast %162 : vector<1x8x128xf32> to vector<8x128xf32>
    %164 = vector.shape_cast %158 : vector<8x128xf32> to vector<1x8x128xf32>
    tpu.vector_store %arg6[%161, %c0_83, %c0_84], %164 {strides = array<i32>} : memref<8x8x128xf32, #tpu.memory_space<vmem>>, vector<1x8x128xf32>,
    %c3_i32 = arith.constant 3 : i32
    %c0_i32_85 = arith.constant 0 : i32
    %165 = arith.cmpi eq, %arg0, %c0_i32_85 : i32
    %c7_i32_86 = arith.constant 7 : i32
    %166 = arith.subi %c7_i32_86, %c3_i32 : i32
    %167 = arith.select %165, %c3_i32, %166 : i32
    %168 = arith.index_cast %167 : i32 to index
    %c0_87 = arith.constant 0 : index
    %c0_88 = arith.constant 0 : index
    %169 = vector.load %arg2[%168, %c0_87, %c0_88] : memref<8x8x1xf32, #tpu.memory_space<vmem>>, vector<1x8x1xf32>
    %170 = vector.shape_cast %169 : vector<1x8x1xf32> to vector<8x1xf32>
    %171 = arith.index_cast %167 : i32 to index
    %c0_89 = arith.constant 0 : index
    %c0_90 = arith.constant 0 : index
    %172 = vector.load %arg7[%171, %c0_89, %c0_90] : memref<8x8x512xf32, #tpu.memory_space<vmem>>, vector<1x8x512xf32>
    %173 = vector.shape_cast %172 : vector<1x8x512xf32> to vector<8x512xf32>
    %c0_91 = arith.constant 0 : index
    %c0_92 = arith.constant 0 : index
    %174 = vector.load %arg8[%c0_91, %c0_92] : memref<8x128xf32, #tpu.memory_space<vmem>>, vector<8x128xf32>
    %c0_93 = arith.constant 0 : index
    %c0_94 = arith.constant 0 : index
    %c0_95 = arith.constant 0 : index
    %175 = vector.load %arg4[%c0_93, %c0_94, %c0_95] : memref<1x128x512xf32, #tpu.memory_space<vmem>>, vector<1x128x512xf32>
    %176 = vector.shape_cast %175 : vector<1x128x512xf32> to vector<128x512xf32>
    %cst_96 = arith.constant dense<0.000000e+00> : vector<8x512xf32>
    %177 = tpu.matmul %174, %176, %cst_96 {dimension_numbers = #tpu.dot_dimension_numbers<[1], [0], [0], [1], [0, 0, 1, 1], [], []>} : vector<8x128xf32>, vector<128x512xf32>, vector<8x512xf32> -> vector<8x512xf32>
    %178 = arith.addf %173, %177 : vector<8x512xf32>
    %179 = vector.extract_strided_slice %178 {offsets = [0, 0], sizes = [8, 128], strides = [1, 1]} : vector<8x512xf32> to vector<8x128xf32>
    %180 = arith.negf %179 : vector<8x128xf32>
    %181 = math.exp %180 : vector<8x128xf32>
    %cst_97 = arith.constant 1.000000e+00 : f32
    %182 = vector.broadcast %cst_97 : f32 to vector<8x128xf32>
    %183 = arith.addf %182, %181 : vector<8x128xf32>
    %184 = arith.divf %182, %183 : vector<8x128xf32>
    %185 = vector.extract_strided_slice %178 {offsets = [0, 128], sizes = [8, 128], strides = [1, 1]} : vector<8x512xf32> to vector<8x128xf32>
    %186 = arith.negf %185 : vector<8x128xf32>
    %187 = math.exp %186 : vector<8x128xf32>
    %cst_98 = arith.constant 1.000000e+00 : f32
    %188 = vector.broadcast %cst_98 : f32 to vector<8x128xf32>
    %189 = arith.addf %188, %187 : vector<8x128xf32>
    %190 = arith.divf %188, %189 : vector<8x128xf32>
    %191 = vector.extract_strided_slice %178 {offsets = [0, 256], sizes = [8, 128], strides = [1, 1]} : vector<8x512xf32> to vector<8x128xf32>
    %192 = math.tanh %191 : vector<8x128xf32>
    %193 = vector.extract_strided_slice %178 {offsets = [0, 384], sizes = [8, 128], strides = [1, 1]} : vector<8x512xf32> to vector<8x128xf32>
    %194 = arith.negf %193 : vector<8x128xf32>
    %195 = math.exp %194 : vector<8x128xf32>
    %cst_99 = arith.constant 1.000000e+00 : f32
    %196 = vector.broadcast %cst_99 : f32 to vector<8x128xf32>
    %197 = arith.addf %196, %195 : vector<8x128xf32>
    %198 = arith.divf %196, %197 : vector<8x128xf32>
    %c0_100 = arith.constant 0 : index
    %c0_101 = arith.constant 0 : index
    %199 = vector.load %arg9[%c0_100, %c0_101] : memref<8x128xf32, #tpu.memory_space<vmem>>, vector<8x128xf32>
    %200 = arith.mulf %190, %199 : vector<8x128xf32>
    %201 = arith.mulf %184, %192 : vector<8x128xf32>
    %202 = arith.addf %200, %201 : vector<8x128xf32>
    %203 = vector.broadcast %170 : vector<8x1xf32> to vector<8x128xf32>
    %204 = arith.mulf %202, %203 : vector<8x128xf32>
    %205 = math.tanh %204 : vector<8x128xf32>
    %206 = arith.mulf %198, %205 : vector<8x128xf32>
    %207 = vector.broadcast %170 : vector<8x1xf32> to vector<8x128xf32>
    %208 = arith.mulf %206, %207 : vector<8x128xf32>
    %c0_102 = arith.constant 0 : index
    %c0_103 = arith.constant 0 : index
    %209 = vector.load %arg8[%c0_102, %c0_103] : memref<8x128xf32, #tpu.memory_space<vmem>>, vector<8x128xf32>
    tpu.vector_store %arg8[%c0_102, %c0_103], %208 {strides = array<i32>} : memref<8x128xf32, #tpu.memory_space<vmem>>, vector<8x128xf32>,
    %c0_104 = arith.constant 0 : index
    %c0_105 = arith.constant 0 : index
    %210 = vector.load %arg9[%c0_104, %c0_105] : memref<8x128xf32, #tpu.memory_space<vmem>>, vector<8x128xf32>
    tpu.vector_store %arg9[%c0_104, %c0_105], %204 {strides = array<i32>} : memref<8x128xf32, #tpu.memory_space<vmem>>, vector<8x128xf32>,
    %211 = arith.index_cast %167 : i32 to index
    %c0_106 = arith.constant 0 : index
    %c0_107 = arith.constant 0 : index
    %212 = vector.load %arg6[%211, %c0_106, %c0_107] : memref<8x8x128xf32, #tpu.memory_space<vmem>>, vector<1x8x128xf32>
    %213 = vector.shape_cast %212 : vector<1x8x128xf32> to vector<8x128xf32>
    %214 = vector.shape_cast %208 : vector<8x128xf32> to vector<1x8x128xf32>
    tpu.vector_store %arg6[%211, %c0_106, %c0_107], %214 {strides = array<i32>} : memref<8x8x128xf32, #tpu.memory_space<vmem>>, vector<1x8x128xf32>,
    %c4_i32 = arith.constant 4 : i32
    %c0_i32_108 = arith.constant 0 : i32
    %215 = arith.cmpi eq, %arg0, %c0_i32_108 : i32
    %c7_i32_109 = arith.constant 7 : i32
    %216 = arith.subi %c7_i32_109, %c4_i32 : i32
    %217 = arith.select %215, %c4_i32, %216 : i32
    %218 = arith.index_cast %217 : i32 to index
    %c0_110 = arith.constant 0 : index
    %c0_111 = arith.constant 0 : index
    %219 = vector.load %arg2[%218, %c0_110, %c0_111] : memref<8x8x1xf32, #tpu.memory_space<vmem>>, vector<1x8x1xf32>
    %220 = vector.shape_cast %219 : vector<1x8x1xf32> to vector<8x1xf32>
    %221 = arith.index_cast %217 : i32 to index
    %c0_112 = arith.constant 0 : index
    %c0_113 = arith.constant 0 : index
    %222 = vector.load %arg7[%221, %c0_112, %c0_113] : memref<8x8x512xf32, #tpu.memory_space<vmem>>, vector<1x8x512xf32>
    %223 = vector.shape_cast %222 : vector<1x8x512xf32> to vector<8x512xf32>
    %c0_114 = arith.constant 0 : index
    %c0_115 = arith.constant 0 : index
    %224 = vector.load %arg8[%c0_114, %c0_115] : memref<8x128xf32, #tpu.memory_space<vmem>>, vector<8x128xf32>
    %c0_116 = arith.constant 0 : index
    %c0_117 = arith.constant 0 : index
    %c0_118 = arith.constant 0 : index
    %225 = vector.load %arg4[%c0_116, %c0_117, %c0_118] : memref<1x128x512xf32, #tpu.memory_space<vmem>>, vector<1x128x512xf32>
    %226 = vector.shape_cast %225 : vector<1x128x512xf32> to vector<128x512xf32>
    %cst_119 = arith.constant dense<0.000000e+00> : vector<8x512xf32>
    %227 = tpu.matmul %224, %226, %cst_119 {dimension_numbers = #tpu.dot_dimension_numbers<[1], [0], [0], [1], [0, 0, 1, 1], [], []>} : vector<8x128xf32>, vector<128x512xf32>, vector<8x512xf32> -> vector<8x512xf32>
    %228 = arith.addf %223, %227 : vector<8x512xf32>
    %229 = vector.extract_strided_slice %228 {offsets = [0, 0], sizes = [8, 128], strides = [1, 1]} : vector<8x512xf32> to vector<8x128xf32>
    %230 = arith.negf %229 : vector<8x128xf32>
    %231 = math.exp %230 : vector<8x128xf32>
    %cst_120 = arith.constant 1.000000e+00 : f32
    %232 = vector.broadcast %cst_120 : f32 to vector<8x128xf32>
    %233 = arith.addf %232, %231 : vector<8x128xf32>
    %234 = arith.divf %232, %233 : vector<8x128xf32>
    %235 = vector.extract_strided_slice %228 {offsets = [0, 128], sizes = [8, 128], strides = [1, 1]} : vector<8x512xf32> to vector<8x128xf32>
    %236 = arith.negf %235 : vector<8x128xf32>
    %237 = math.exp %236 : vector<8x128xf32>
    %cst_121 = arith.constant 1.000000e+00 : f32
    %238 = vector.broadcast %cst_121 : f32 to vector<8x128xf32>
    %239 = arith.addf %238, %237 : vector<8x128xf32>
    %240 = arith.divf %238, %239 : vector<8x128xf32>
    %241 = vector.extract_strided_slice %228 {offsets = [0, 256], sizes = [8, 128], strides = [1, 1]} : vector<8x512xf32> to vector<8x128xf32>
    %242 = math.tanh %241 : vector<8x128xf32>
    %243 = vector.extract_strided_slice %228 {offsets = [0, 384], sizes = [8, 128], strides = [1, 1]} : vector<8x512xf32> to vector<8x128xf32>
    %244 = arith.negf %243 : vector<8x128xf32>
    %245 = math.exp %244 : vector<8x128xf32>
    %cst_122 = arith.constant 1.000000e+00 : f32
    %246 = vector.broadcast %cst_122 : f32 to vector<8x128xf32>
    %247 = arith.addf %246, %245 : vector<8x128xf32>
    %248 = arith.divf %246, %247 : vector<8x128xf32>
    %c0_123 = arith.constant 0 : index
    %c0_124 = arith.constant 0 : index
    %249 = vector.load %arg9[%c0_123, %c0_124] : memref<8x128xf32, #tpu.memory_space<vmem>>, vector<8x128xf32>
    %250 = arith.mulf %240, %249 : vector<8x128xf32>
    %251 = arith.mulf %234, %242 : vector<8x128xf32>
    %252 = arith.addf %250, %251 : vector<8x128xf32>
    %253 = vector.broadcast %220 : vector<8x1xf32> to vector<8x128xf32>
    %254 = arith.mulf %252, %253 : vector<8x128xf32>
    %255 = math.tanh %254 : vector<8x128xf32>
    %256 = arith.mulf %248, %255 : vector<8x128xf32>
    %257 = vector.broadcast %220 : vector<8x1xf32> to vector<8x128xf32>
    %258 = arith.mulf %256, %257 : vector<8x128xf32>
    %c0_125 = arith.constant 0 : index
    %c0_126 = arith.constant 0 : index
    %259 = vector.load %arg8[%c0_125, %c0_126] : memref<8x128xf32, #tpu.memory_space<vmem>>, vector<8x128xf32>
    tpu.vector_store %arg8[%c0_125, %c0_126], %258 {strides = array<i32>} : memref<8x128xf32, #tpu.memory_space<vmem>>, vector<8x128xf32>,
    %c0_127 = arith.constant 0 : index
    %c0_128 = arith.constant 0 : index
    %260 = vector.load %arg9[%c0_127, %c0_128] : memref<8x128xf32, #tpu.memory_space<vmem>>, vector<8x128xf32>
    tpu.vector_store %arg9[%c0_127, %c0_128], %254 {strides = array<i32>} : memref<8x128xf32, #tpu.memory_space<vmem>>, vector<8x128xf32>,
    %261 = arith.index_cast %217 : i32 to index
    %c0_129 = arith.constant 0 : index
    %c0_130 = arith.constant 0 : index
    %262 = vector.load %arg6[%261, %c0_129, %c0_130] : memref<8x8x128xf32, #tpu.memory_space<vmem>>, vector<1x8x128xf32>
    %263 = vector.shape_cast %262 : vector<1x8x128xf32> to vector<8x128xf32>
    %264 = vector.shape_cast %258 : vector<8x128xf32> to vector<1x8x128xf32>
    tpu.vector_store %arg6[%261, %c0_129, %c0_130], %264 {strides = array<i32>} : memref<8x8x128xf32, #tpu.memory_space<vmem>>, vector<1x8x128xf32>,
    %c5_i32 = arith.constant 5 : i32
    %c0_i32_131 = arith.constant 0 : i32
    %265 = arith.cmpi eq, %arg0, %c0_i32_131 : i32
    %c7_i32_132 = arith.constant 7 : i32
    %266 = arith.subi %c7_i32_132, %c5_i32 : i32
    %267 = arith.select %265, %c5_i32, %266 : i32
    %268 = arith.index_cast %267 : i32 to index
    %c0_133 = arith.constant 0 : index
    %c0_134 = arith.constant 0 : index
    %269 = vector.load %arg2[%268, %c0_133, %c0_134] : memref<8x8x1xf32, #tpu.memory_space<vmem>>, vector<1x8x1xf32>
    %270 = vector.shape_cast %269 : vector<1x8x1xf32> to vector<8x1xf32>
    %271 = arith.index_cast %267 : i32 to index
    %c0_135 = arith.constant 0 : index
    %c0_136 = arith.constant 0 : index
    %272 = vector.load %arg7[%271, %c0_135, %c0_136] : memref<8x8x512xf32, #tpu.memory_space<vmem>>, vector<1x8x512xf32>
    %273 = vector.shape_cast %272 : vector<1x8x512xf32> to vector<8x512xf32>
    %c0_137 = arith.constant 0 : index
    %c0_138 = arith.constant 0 : index
    %274 = vector.load %arg8[%c0_137, %c0_138] : memref<8x128xf32, #tpu.memory_space<vmem>>, vector<8x128xf32>
    %c0_139 = arith.constant 0 : index
    %c0_140 = arith.constant 0 : index
    %c0_141 = arith.constant 0 : index
    %275 = vector.load %arg4[%c0_139, %c0_140, %c0_141] : memref<1x128x512xf32, #tpu.memory_space<vmem>>, vector<1x128x512xf32>
    %276 = vector.shape_cast %275 : vector<1x128x512xf32> to vector<128x512xf32>
    %cst_142 = arith.constant dense<0.000000e+00> : vector<8x512xf32>
    %277 = tpu.matmul %274, %276, %cst_142 {dimension_numbers = #tpu.dot_dimension_numbers<[1], [0], [0], [1], [0, 0, 1, 1], [], []>} : vector<8x128xf32>, vector<128x512xf32>, vector<8x512xf32> -> vector<8x512xf32>
    %278 = arith.addf %273, %277 : vector<8x512xf32>
    %279 = vector.extract_strided_slice %278 {offsets = [0, 0], sizes = [8, 128], strides = [1, 1]} : vector<8x512xf32> to vector<8x128xf32>
    %280 = arith.negf %279 : vector<8x128xf32>
    %281 = math.exp %280 : vector<8x128xf32>
    %cst_143 = arith.constant 1.000000e+00 : f32
    %282 = vector.broadcast %cst_143 : f32 to vector<8x128xf32>
    %283 = arith.addf %282, %281 : vector<8x128xf32>
    %284 = arith.divf %282, %283 : vector<8x128xf32>
    %285 = vector.extract_strided_slice %278 {offsets = [0, 128], sizes = [8, 128], strides = [1, 1]} : vector<8x512xf32> to vector<8x128xf32>
    %286 = arith.negf %285 : vector<8x128xf32>
    %287 = math.exp %286 : vector<8x128xf32>
    %cst_144 = arith.constant 1.000000e+00 : f32
    %288 = vector.broadcast %cst_144 : f32 to vector<8x128xf32>
    %289 = arith.addf %288, %287 : vector<8x128xf32>
    %290 = arith.divf %288, %289 : vector<8x128xf32>
    %291 = vector.extract_strided_slice %278 {offsets = [0, 256], sizes = [8, 128], strides = [1, 1]} : vector<8x512xf32> to vector<8x128xf32>
    %292 = math.tanh %291 : vector<8x128xf32>
    %293 = vector.extract_strided_slice %278 {offsets = [0, 384], sizes = [8, 128], strides = [1, 1]} : vector<8x512xf32> to vector<8x128xf32>
    %294 = arith.negf %293 : vector<8x128xf32>
    %295 = math.exp %294 : vector<8x128xf32>
    %cst_145 = arith.constant 1.000000e+00 : f32
    %296 = vector.broadcast %cst_145 : f32 to vector<8x128xf32>
    %297 = arith.addf %296, %295 : vector<8x128xf32>
    %298 = arith.divf %296, %297 : vector<8x128xf32>
    %c0_146 = arith.constant 0 : index
    %c0_147 = arith.constant 0 : index
    %299 = vector.load %arg9[%c0_146, %c0_147] : memref<8x128xf32, #tpu.memory_space<vmem>>, vector<8x128xf32>
    %300 = arith.mulf %290, %299 : vector<8x128xf32>
    %301 = arith.mulf %284, %292 : vector<8x128xf32>
    %302 = arith.addf %300, %301 : vector<8x128xf32>
    %303 = vector.broadcast %270 : vector<8x1xf32> to vector<8x128xf32>
    %304 = arith.mulf %302, %303 : vector<8x128xf32>
    %305 = math.tanh %304 : vector<8x128xf32>
    %306 = arith.mulf %298, %305 : vector<8x128xf32>
    %307 = vector.broadcast %270 : vector<8x1xf32> to vector<8x128xf32>
    %308 = arith.mulf %306, %307 : vector<8x128xf32>
    %c0_148 = arith.constant 0 : index
    %c0_149 = arith.constant 0 : index
    %309 = vector.load %arg8[%c0_148, %c0_149] : memref<8x128xf32, #tpu.memory_space<vmem>>, vector<8x128xf32>
    tpu.vector_store %arg8[%c0_148, %c0_149], %308 {strides = array<i32>} : memref<8x128xf32, #tpu.memory_space<vmem>>, vector<8x128xf32>,
    %c0_150 = arith.constant 0 : index
    %c0_151 = arith.constant 0 : index
    %310 = vector.load %arg9[%c0_150, %c0_151] : memref<8x128xf32, #tpu.memory_space<vmem>>, vector<8x128xf32>
    tpu.vector_store %arg9[%c0_150, %c0_151], %304 {strides = array<i32>} : memref<8x128xf32, #tpu.memory_space<vmem>>, vector<8x128xf32>,
    %311 = arith.index_cast %267 : i32 to index
    %c0_152 = arith.constant 0 : index
    %c0_153 = arith.constant 0 : index
    %312 = vector.load %arg6[%311, %c0_152, %c0_153] : memref<8x8x128xf32, #tpu.memory_space<vmem>>, vector<1x8x128xf32>
    %313 = vector.shape_cast %312 : vector<1x8x128xf32> to vector<8x128xf32>
    %314 = vector.shape_cast %308 : vector<8x128xf32> to vector<1x8x128xf32>
    tpu.vector_store %arg6[%311, %c0_152, %c0_153], %314 {strides = array<i32>} : memref<8x8x128xf32, #tpu.memory_space<vmem>>, vector<1x8x128xf32>,
    %c6_i32 = arith.constant 6 : i32
    %c0_i32_154 = arith.constant 0 : i32
    %315 = arith.cmpi eq, %arg0, %c0_i32_154 : i32
    %c7_i32_155 = arith.constant 7 : i32
    %316 = arith.subi %c7_i32_155, %c6_i32 : i32
    %317 = arith.select %315, %c6_i32, %316 : i32
    %318 = arith.index_cast %317 : i32 to index
    %c0_156 = arith.constant 0 : index
    %c0_157 = arith.constant 0 : index
    %319 = vector.load %arg2[%318, %c0_156, %c0_157] : memref<8x8x1xf32, #tpu.memory_space<vmem>>, vector<1x8x1xf32>
    %320 = vector.shape_cast %319 : vector<1x8x1xf32> to vector<8x1xf32>
    %321 = arith.index_cast %317 : i32 to index
    %c0_158 = arith.constant 0 : index
    %c0_159 = arith.constant 0 : index
    %322 = vector.load %arg7[%321, %c0_158, %c0_159] : memref<8x8x512xf32, #tpu.memory_space<vmem>>, vector<1x8x512xf32>
    %323 = vector.shape_cast %322 : vector<1x8x512xf32> to vector<8x512xf32>
    %c0_160 = arith.constant 0 : index
    %c0_161 = arith.constant 0 : index
    %324 = vector.load %arg8[%c0_160, %c0_161] : memref<8x128xf32, #tpu.memory_space<vmem>>, vector<8x128xf32>
    %c0_162 = arith.constant 0 : index
    %c0_163 = arith.constant 0 : index
    %c0_164 = arith.constant 0 : index
    %325 = vector.load %arg4[%c0_162, %c0_163, %c0_164] : memref<1x128x512xf32, #tpu.memory_space<vmem>>, vector<1x128x512xf32>
    %326 = vector.shape_cast %325 : vector<1x128x512xf32> to vector<128x512xf32>
    %cst_165 = arith.constant dense<0.000000e+00> : vector<8x512xf32>
    %327 = tpu.matmul %324, %326, %cst_165 {dimension_numbers = #tpu.dot_dimension_numbers<[1], [0], [0], [1], [0, 0, 1, 1], [], []>} : vector<8x128xf32>, vector<128x512xf32>, vector<8x512xf32> -> vector<8x512xf32>
    %328 = arith.addf %323, %327 : vector<8x512xf32>
    %329 = vector.extract_strided_slice %328 {offsets = [0, 0], sizes = [8, 128], strides = [1, 1]} : vector<8x512xf32> to vector<8x128xf32>
    %330 = arith.negf %329 : vector<8x128xf32>
    %331 = math.exp %330 : vector<8x128xf32>
    %cst_166 = arith.constant 1.000000e+00 : f32
    %332 = vector.broadcast %cst_166 : f32 to vector<8x128xf32>
    %333 = arith.addf %332, %331 : vector<8x128xf32>
    %334 = arith.divf %332, %333 : vector<8x128xf32>
    %335 = vector.extract_strided_slice %328 {offsets = [0, 128], sizes = [8, 128], strides = [1, 1]} : vector<8x512xf32> to vector<8x128xf32>
    %336 = arith.negf %335 : vector<8x128xf32>
    %337 = math.exp %336 : vector<8x128xf32>
    %cst_167 = arith.constant 1.000000e+00 : f32
    %338 = vector.broadcast %cst_167 : f32 to vector<8x128xf32>
    %339 = arith.addf %338, %337 : vector<8x128xf32>
    %340 = arith.divf %338, %339 : vector<8x128xf32>
    %341 = vector.extract_strided_slice %328 {offsets = [0, 256], sizes = [8, 128], strides = [1, 1]} : vector<8x512xf32> to vector<8x128xf32>
    %342 = math.tanh %341 : vector<8x128xf32>
    %343 = vector.extract_strided_slice %328 {offsets = [0, 384], sizes = [8, 128], strides = [1, 1]} : vector<8x512xf32> to vector<8x128xf32>
    %344 = arith.negf %343 : vector<8x128xf32>
    %345 = math.exp %344 : vector<8x128xf32>
    %cst_168 = arith.constant 1.000000e+00 : f32
    %346 = vector.broadcast %cst_168 : f32 to vector<8x128xf32>
    %347 = arith.addf %346, %345 : vector<8x128xf32>
    %348 = arith.divf %346, %347 : vector<8x128xf32>
    %c0_169 = arith.constant 0 : index
    %c0_170 = arith.constant 0 : index
    %349 = vector.load %arg9[%c0_169, %c0_170] : memref<8x128xf32, #tpu.memory_space<vmem>>, vector<8x128xf32>
    %350 = arith.mulf %340, %349 : vector<8x128xf32>
    %351 = arith.mulf %334, %342 : vector<8x128xf32>
    %352 = arith.addf %350, %351 : vector<8x128xf32>
    %353 = vector.broadcast %320 : vector<8x1xf32> to vector<8x128xf32>
    %354 = arith.mulf %352, %353 : vector<8x128xf32>
    %355 = math.tanh %354 : vector<8x128xf32>
    %356 = arith.mulf %348, %355 : vector<8x128xf32>
    %357 = vector.broadcast %320 : vector<8x1xf32> to vector<8x128xf32>
    %358 = arith.mulf %356, %357 : vector<8x128xf32>
    %c0_171 = arith.constant 0 : index
    %c0_172 = arith.constant 0 : index
    %359 = vector.load %arg8[%c0_171, %c0_172] : memref<8x128xf32, #tpu.memory_space<vmem>>, vector<8x128xf32>
    tpu.vector_store %arg8[%c0_171, %c0_172], %358 {strides = array<i32>} : memref<8x128xf32, #tpu.memory_space<vmem>>, vector<8x128xf32>,
    %c0_173 = arith.constant 0 : index
    %c0_174 = arith.constant 0 : index
    %360 = vector.load %arg9[%c0_173, %c0_174] : memref<8x128xf32, #tpu.memory_space<vmem>>, vector<8x128xf32>
    tpu.vector_store %arg9[%c0_173, %c0_174], %354 {strides = array<i32>} : memref<8x128xf32, #tpu.memory_space<vmem>>, vector<8x128xf32>,
    %361 = arith.index_cast %317 : i32 to index
    %c0_175 = arith.constant 0 : index
    %c0_176 = arith.constant 0 : index
    %362 = vector.load %arg6[%361, %c0_175, %c0_176] : memref<8x8x128xf32, #tpu.memory_space<vmem>>, vector<1x8x128xf32>
    %363 = vector.shape_cast %362 : vector<1x8x128xf32> to vector<8x128xf32>
    %364 = vector.shape_cast %358 : vector<8x128xf32> to vector<1x8x128xf32>
    tpu.vector_store %arg6[%361, %c0_175, %c0_176], %364 {strides = array<i32>} : memref<8x8x128xf32, #tpu.memory_space<vmem>>, vector<1x8x128xf32>,
    %c7_i32_177 = arith.constant 7 : i32
    %c0_i32_178 = arith.constant 0 : i32
    %365 = arith.cmpi eq, %arg0, %c0_i32_178 : i32
    %c7_i32_179 = arith.constant 7 : i32
    %366 = arith.subi %c7_i32_179, %c7_i32_177 : i32
    %367 = arith.select %365, %c7_i32_177, %366 : i32
    %368 = arith.index_cast %367 : i32 to index
    %c0_180 = arith.constant 0 : index
    %c0_181 = arith.constant 0 : index
    %369 = vector.load %arg2[%368, %c0_180, %c0_181] : memref<8x8x1xf32, #tpu.memory_space<vmem>>, vector<1x8x1xf32>
    %370 = vector.shape_cast %369 : vector<1x8x1xf32> to vector<8x1xf32>
    %371 = arith.index_cast %367 : i32 to index
    %c0_182 = arith.constant 0 : index
    %c0_183 = arith.constant 0 : index
    %372 = vector.load %arg7[%371, %c0_182, %c0_183] : memref<8x8x512xf32, #tpu.memory_space<vmem>>, vector<1x8x512xf32>
    %373 = vector.shape_cast %372 : vector<1x8x512xf32> to vector<8x512xf32>
    %c0_184 = arith.constant 0 : index
    %c0_185 = arith.constant 0 : index
    %374 = vector.load %arg8[%c0_184, %c0_185] : memref<8x128xf32, #tpu.memory_space<vmem>>, vector<8x128xf32>
    %c0_186 = arith.constant 0 : index
    %c0_187 = arith.constant 0 : index
    %c0_188 = arith.constant 0 : index
    %375 = vector.load %arg4[%c0_186, %c0_187, %c0_188] : memref<1x128x512xf32, #tpu.memory_space<vmem>>, vector<1x128x512xf32>
    %376 = vector.shape_cast %375 : vector<1x128x512xf32> to vector<128x512xf32>
    %cst_189 = arith.constant dense<0.000000e+00> : vector<8x512xf32>
    %377 = tpu.matmul %374, %376, %cst_189 {dimension_numbers = #tpu.dot_dimension_numbers<[1], [0], [0], [1], [0, 0, 1, 1], [], []>} : vector<8x128xf32>, vector<128x512xf32>, vector<8x512xf32> -> vector<8x512xf32>
    %378 = arith.addf %373, %377 : vector<8x512xf32>
    %379 = vector.extract_strided_slice %378 {offsets = [0, 0], sizes = [8, 128], strides = [1, 1]} : vector<8x512xf32> to vector<8x128xf32>
    %380 = arith.negf %379 : vector<8x128xf32>
    %381 = math.exp %380 : vector<8x128xf32>
    %cst_190 = arith.constant 1.000000e+00 : f32
    %382 = vector.broadcast %cst_190 : f32 to vector<8x128xf32>
    %383 = arith.addf %382, %381 : vector<8x128xf32>
    %384 = arith.divf %382, %383 : vector<8x128xf32>
    %385 = vector.extract_strided_slice %378 {offsets = [0, 128], sizes = [8, 128], strides = [1, 1]} : vector<8x512xf32> to vector<8x128xf32>
    %386 = arith.negf %385 : vector<8x128xf32>
    %387 = math.exp %386 : vector<8x128xf32>
    %cst_191 = arith.constant 1.000000e+00 : f32
    %388 = vector.broadcast %cst_191 : f32 to vector<8x128xf32>
    %389 = arith.addf %388, %387 : vector<8x128xf32>
    %390 = arith.divf %388, %389 : vector<8x128xf32>
    %391 = vector.extract_strided_slice %378 {offsets = [0, 256], sizes = [8, 128], strides = [1, 1]} : vector<8x512xf32> to vector<8x128xf32>
    %392 = math.tanh %391 : vector<8x128xf32>
    %393 = vector.extract_strided_slice %378 {offsets = [0, 384], sizes = [8, 128], strides = [1, 1]} : vector<8x512xf32> to vector<8x128xf32>
    %394 = arith.negf %393 : vector<8x128xf32>
    %395 = math.exp %394 : vector<8x128xf32>
    %cst_192 = arith.constant 1.000000e+00 : f32
    %396 = vector.broadcast %cst_192 : f32 to vector<8x128xf32>
    %397 = arith.addf %396, %395 : vector<8x128xf32>
    %398 = arith.divf %396, %397 : vector<8x128xf32>
    %c0_193 = arith.constant 0 : index
    %c0_194 = arith.constant 0 : index
    %399 = vector.load %arg9[%c0_193, %c0_194] : memref<8x128xf32, #tpu.memory_space<vmem>>, vector<8x128xf32>
    %400 = arith.mulf %390, %399 : vector<8x128xf32>
    %401 = arith.mulf %384, %392 : vector<8x128xf32>
    %402 = arith.addf %400, %401 : vector<8x128xf32>
    %403 = vector.broadcast %370 : vector<8x1xf32> to vector<8x128xf32>
    %404 = arith.mulf %402, %403 : vector<8x128xf32>
    %405 = math.tanh %404 : vector<8x128xf32>
    %406 = arith.mulf %398, %405 : vector<8x128xf32>
    %407 = vector.broadcast %370 : vector<8x1xf32> to vector<8x128xf32>
    %408 = arith.mulf %406, %407 : vector<8x128xf32>
    %c0_195 = arith.constant 0 : index
    %c0_196 = arith.constant 0 : index
    %409 = vector.load %arg8[%c0_195, %c0_196] : memref<8x128xf32, #tpu.memory_space<vmem>>, vector<8x128xf32>
    tpu.vector_store %arg8[%c0_195, %c0_196], %408 {strides = array<i32>} : memref<8x128xf32, #tpu.memory_space<vmem>>, vector<8x128xf32>,
    %c0_197 = arith.constant 0 : index
    %c0_198 = arith.constant 0 : index
    %410 = vector.load %arg9[%c0_197, %c0_198] : memref<8x128xf32, #tpu.memory_space<vmem>>, vector<8x128xf32>
    tpu.vector_store %arg9[%c0_197, %c0_198], %404 {strides = array<i32>} : memref<8x128xf32, #tpu.memory_space<vmem>>, vector<8x128xf32>,
    %411 = arith.index_cast %367 : i32 to index
    %c0_199 = arith.constant 0 : index
    %c0_200 = arith.constant 0 : index
    %412 = vector.load %arg6[%411, %c0_199, %c0_200] : memref<8x8x128xf32, #tpu.memory_space<vmem>>, vector<1x8x128xf32>
    %413 = vector.shape_cast %412 : vector<1x8x128xf32> to vector<8x128xf32>
    %414 = vector.shape_cast %408 : vector<8x128xf32> to vector<1x8x128xf32>
    tpu.vector_store %arg6[%411, %c0_199, %c0_200], %414 {strides = array<i32>} : memref<8x8x128xf32, #tpu.memory_space<vmem>>, vector<1x8x128xf32>,
    %c8_i32 = arith.constant 8 : i32
    return
  }
  func.func @transform_0(%arg0: i32) -> (i32, i32, i32) {
    %c0_i32 = arith.constant 0 : i32
    %c0_i32_0 = arith.constant 0 : i32
    %c0_i32_1 = arith.constant 0 : i32
    %c0_i32_2 = arith.constant 0 : i32
    return %c0_i32, %c0_i32_0, %c0_i32_1 : i32, i32, i32
  }
  func.func @transform_1(%arg0: i32) -> (i32, i32, i32) {
    %c0_i32 = arith.constant 0 : i32
    %c0_i32_0 = arith.constant 0 : i32
    %c0_i32_1 = arith.constant 0 : i32
    %c0_i32_2 = arith.constant 0 : i32
    return %c0_i32, %c0_i32_0, %c0_i32_1 : i32, i32, i32
  }
  func.func @transform_2(%arg0: i32) -> (i32, i32, i32) {
    %c0_i32 = arith.constant 0 : i32
    %c0_i32_0 = arith.constant 0 : i32
    %c0_i32_1 = arith.constant 0 : i32
    return %arg0, %c0_i32, %c0_i32_0 : i32, i32, i32
  }
  func.func @transform_3(%arg0: i32) -> (i32, i32, i32) {
    %c0_i32 = arith.constant 0 : i32
    %c0_i32_0 = arith.constant 0 : i32
    %c0_i32_1 = arith.constant 0 : i32
    return %arg0, %c0_i32, %c0_i32_0 : i32, i32, i32
  }
  func.func @transform_4(%arg0: i32) -> (i32, i32, i32) {
    %c0_i32 = arith.constant 0 : i32
    %c0_i32_0 = arith.constant 0 : i32
    %c0_i32_1 = arith.constant 0 : i32
    return %arg0, %c0_i32, %c0_i32_0 : i32, i32, i32
  }
  func.func @transform_5(%arg0: i32) -> (i32, i32, i32) {
    %c0_i32 = arith.constant 0 : i32
    %c0_i32_0 = arith.constant 0 : i32
    %c0_i32_1 = arith.constant 0 : i32
    return %c0_i32, %c0_i32_0, %arg0 : i32, i32, i32
  }
}

</mosaic_0001>

<bundles_post_ra>
// kernel: tpu_custom_call.1
= control target key start
LH: loop header
LB: loop body
LE: loop exit
PB: predicated region body
PF: predicated region fallthrough
CT: control target
= control target key end

     0   :  { %s4980_s0 = inlined_call_operand.vmem [shape: f32[8,8,128], index: 0, kind: input, shape index: {}]   ;;  %s4981_s1 = inlined_call_operand.vmem [shape: f32[8,8,1], index: 1, kind: input, shape index: {}]   ;;  %s4982_s2 = inlined_call_operand.hbm [shape: f32[2,128,512], index: 2, kind: input, shape index: {}]   ;;  %s4983_s3 = inlined_call_operand.hbm [shape: f32[2,128,512], index: 3, kind: input, shape index: {}]   ;;  %s4984_s4 = inlined_call_operand.vmem [shape: f32[2,1,512], index: 4, kind: input, shape index: {}]   ;;  %s4985_s5 = inlined_call_operand.hbm [shape: f32[8,8,256], index: 5, kind: output, shape index: {}]  }
   0x1   :  { %4994 = sst [smem:[#allocation15_spill]] %s4980_s0 }
   0x2   :  { %4995 = sst [smem:[#allocation16_spill]] %s4982_s2 }
   0x3   :  { %4996 = sst [smem:[#allocation17_spill]] %s4983_s3 }
   0x4   :  { %4997 = sst [smem:[#allocation18_spill]] %s4984_s4 }
   0x5   :  { %10 = vsyncpa [#allocation6], 0 }
   0x6   :  { %12 = vsyncpa [#allocation6 + $0x1], 0 }
   0x7   :  { %13 = vsyncpa [#allocation9], 0 }
   0x8   :  { %15 = vsyncpa [#allocation9 + $0x1], 0 }
   0x9   :  { %16 = vsyncpa [#allocation7], 0 }
   0xa   :  { %18 = vsyncpa [#allocation7 + $0x1], 0  ;;  %s3900_s18 = smov 0   ;;  %s3902_s19 = smov 0  }
   0xb   :  { %s3904_s20 = smov 0   ;;  %s3906_s21 = smov 0  }
   0xc LB: > { %s3921_s22 = sadd.s32 4294967295, %s3858_s21   ;;  %s2888_s23 = sadd.s32 4294967294, %s3858_s21   ;;  %s3858_s21 = sphi %s3906_s21, %s5030_s21   ;;  %s3854_s20 = sphi %s3904_s20, %s5029_s20   ;;  %s3850_s19 = sphi %s3902_s19, %s5028_s19   ;;  %s3846_s18 = sphi %s3900_s18, %s5027_s18  }
   0xd   : > { %s3925_s24 = sadd.s32 1, %s3858_s21   ;;  %s73_s25 = sadd.s32 1, %s3854_s20 }
   0xe   : > { %s70_s26 = ssub.s32 %s3858_s21, %s3925_s24  ;;  %p80_p0 = scmp.ne.s32.totalorder %s3854_s20, %s3850_s19 }
   0xf   : > { %p71_p1 = scmp.eq.s32.totalorder %s70_s26, 0  ;;  %p81_p2 = scmp.eq.s32.totalorder %s3858_s21, 0 }
  0x10   : > { %p86_p3 = scmp.ne.s32.totalorder %s3850_s19, %s3846_s18  ;;  %p4986_p4 = scmp.eq.s32.totalorder %s3921_s22, 0 }
  0x11   : > { %s3937_s27 = scalar_select %p71_p1, %s3854_s20, %s73_s25  }
  0x12   : > { %p3939_p5 = por %p81_p2, %p80_p0  ;;  %p3945_p6 = por %p4986_p4, %p86_p3 }
  0x13   : > { %4998 = sst [smem:[#allocation14_spill]] %s3937_s27  ;;  %p162_p7 = scmp.eq.s32.totalorder %s3921_s22, 1 }
  0x14   : > { %s5000_s29 = scalar_select %p3945_p6, 1, 0 }
  0x15   : > { %p168_p8 = scmp.eq.s32.totalorder %s2888_s23, 1  ;;  %p3557_p10 = scmp.lt.s32.totalorder %s3858_s21, 2 }
  0x16   : > { %p3952_p11 = por %p162_p7, %p80_p0  ;;  %s3961_s7 = sand.u32 1, %s3854_s20  }
  0x17   : > { %p3956_p12 = por %p168_p8, %p86_p3  ;;  %s2954_s8 = sshll.u32 %s3858_s21, 13 }
  0x18   : > { %s5001_s30 = scalar_select %p3952_p11, 1, 0 }
  0x19   : > { %s5002_s6 = scalar_select %p3956_p12, 1, 0 }
  0x1a   : > { %s2891_s9 = sshll.u32 %s3961_s7, 9  ;;  %s5003_s2 = sld [smem:[#allocation16_spill]] }
  0x1b   : > { %s198_s13 = scalar_lea.vmem [#allocation5], %s2891_s9  ;;  %p3976_p13 = pnand %p3557_p10, %p3939_p5 }
  0x1c   : > { %s205_s14 = sshll.u32 %s198_s13, 4  ;;  %s195_s16 = scalar_lea.sflag [#allocation6], %s3961_s7  ;;  %s3980_s14 = int_to_ptr.vmem [resolvable:$true] %s205_s14 }
  0x1d   : > { %p3730_p1 = pneg %p3976_p13 }
  0x20   : > { %s3970_s12 = scalar_lea.hbm %s5003_s2, %s2954_s8  ;;  %s3733_s26 = scalar_lea.hbm %s5003_s2, 16384 }
  0x21   : > { %s3728_s17 = scalar_lea.hbm %s3970_s12, 8192  ;;  %p3734_p5 = scmp.lt.u32.totalorder %s3970_s12, %s5003_s2 }
  0x22   : > { %p3729_p0 = scmp.ne.s32.totalorder %s3970_s12, %s3728_s17  ;;  %p3735_p7 = scmp.lt.u32.totalorder %s3733_s26, %s3728_s17 }
  0x23   : > { %p3737_p10 = scmp.lt.u32.totalorder %s3728_s17, %s3970_s12 }
  0x24   : > { %p3731_p2 = pnand %p3730_p1, %p3729_p0  ;;  %p3736_p8 = por %p3735_p7, %p3734_p5 }
  0x26   : > { %p3732_p3 = pneg %p3731_p2  ;;  %p3738_p9 = por %p3737_p10, %p3736_p8 }
  0x28   : > { %p3739_p4 = pnand %p3738_p9, %p3732_p3 }
  0x2a   : > { %3742 = shalt.err (!%p3739_p4)
}
  0x2b   : > { %s3743_s11 = scalar_lea.vmem %s3980_s14, 8192  ;;  %s3860_s13 = smov [#allocation5]  }
  0x2c   : > { %p3744_p0 = scmp.ne.s32.totalorder %s3980_s14, %s3743_s11  ;;  %s3748_s23 = sshll.u32 %s3860_s13, 4  ;;  %s3749_s23 = int_to_ptr.vmem [resolvable:$false] %s3748_s23 }
  0x2d   : > { %s3750_s25 = scalar_lea.vmem %s3749_s23, 16384  ;;  %p3751_p11 = scmp.lt.s32.totalorder %s3980_s14, %s3749_s23 }
  0x2e   : > { %p3746_p2 = pnand %p3744_p0, %p3730_p1  ;;  %p3752_p5 = scmp.lt.s32.totalorder %s3750_s25, %s3743_s11 }
  0x30   : > { %p3747_p12 = pneg %p3746_p2  ;;  %p3753_p7 = por %p3752_p5, %p3751_p11 }
  0x32   : > { %p3754_p8 = pnand %p3753_p7, %p3747_p12 }
  0x34   : > { %3757 = shalt.err (!%p3754_p8)
}
  0x35   : > { %s4988_s17 = smov 512   ;;  %s3862_s26 = smov 32  }
  0x36   : > { %3549 = dma.hbm_to_vmem [thread:$0]  (!%p3976_p13), %s3970_s12, 8192, %s3980_s14, %s195_s16, %s4988_s17, %s4988_s17, %s3862_s26  }
  0x37   : > { %p2897_p4 = scmp.ge.s32.totalorder %s3858_s21, 1  ;;  %p241_p9 = scmp.lt.s32.totalorder %s3858_s21, 3 }
  0x38   : > { %s5006_s3 = sld [smem:[#allocation17_spill]]  ;;  %s219_s23 = scalar_lea.vmem [#allocation8], %s2891_s9 }
  0x39   : > { %p4015_p11 = pnand %p2897_p4, %p241_p9  ;;  %s226_s25 = sshll.u32 %s219_s23, 4  ;;  %s4028_s25 = int_to_ptr.vmem [resolvable:$true] %s226_s25 }
  0x3a   : > { %s216_s12 = scalar_lea.sflag [#allocation9], %s3961_s7 }
  0x3e   : > { %s4024_s13 = scalar_lea.hbm %s5006_s3, %s2954_s8  ;;  %s3763_s8 = scalar_lea.hbm %s5006_s3, 16384 }
  0x3f   : > { %s3758_s14 = scalar_lea.hbm %s4024_s13, 8192  ;;  %p3764_p0 = scmp.lt.u32.totalorder %s4024_s13, %s5006_s3 }
  0x40   : > { %p3759_p12 = scmp.ne.s32.totalorder %s4024_s13, %s3758_s14  ;;  %p3765_p2 = scmp.lt.u32.totalorder %s3763_s8, %s3758_s14 }
  0x41   : > { %p3767_p7 = scmp.lt.u32.totalorder %s3758_s14, %s4024_s13 }
  0x42   : > { %p3761_p3 = pnand %p3759_p12, %p3730_p1  ;;  %p3766_p5 = por %p3765_p2, %p3764_p0 }
  0x44   : > { %p3762_p10 = pneg %p3761_p3  ;;  %p3768_p8 = por %p3767_p7, %p3766_p5 }
  0x46   : > { %p3769_p4 = pnand %p3768_p8, %p3762_p10 }
  0x48   : > { %3772 = shalt.err (!%p3769_p4)
}
  0x49   : > { %s3773_s9 = scalar_lea.vmem %s4028_s25, 8192  ;;  %s3863_s23 = smov [#allocation8]  }
  0x4a   : > { %p3774_p9 = scmp.ne.s32.totalorder %s4028_s25, %s3773_s9  ;;  %s3778_s16 = sshll.u32 %s3863_s23, 4  ;;  %s3779_s16 = int_to_ptr.vmem [resolvable:$false] %s3778_s16 }
  0x4b   : > { %s3780_s17 = scalar_lea.vmem %s3779_s16, 16384  ;;  %p3781_p6 = scmp.lt.s32.totalorder %s4028_s25, %s3779_s16 }
  0x4c   : > { %p3776_p12 = pnand %p3774_p9, %p3730_p1  ;;  %p3782_p0 = scmp.lt.s32.totalorder %s3780_s17, %s3773_s9 }
  0x4e   : > { %p3777_p3 = pneg %p3776_p12  ;;  %p3783_p2 = por %p3782_p0, %p3781_p6 }
  0x50   : > { %p3784_p5 = pnand %p3783_p2, %p3777_p3 }
  0x52   : > { %3787 = shalt.err (!%p3784_p5)
}
  0x53   : > { %s5007_s14 = smov 512   ;;  %245 = sbr.rel (%p4015_p11) target bundleno = 2281 (0x8e9), region = 40 }
  0x54   : > { %3552 = dma.hbm_to_vmem [thread:$0]  (!%p3976_p13), %s4024_s13, 8192, %s4028_s25, %s216_s12, %s5007_s14, %s5007_s14, %s3862_s26  }
  0x55   : > { %s4062_s10 = sand.u32 (!%p4015_p11), 1, %s3850_s19   ;;  %p5008_p6 = scmp.ne.s32.totalorder (!%p4015_p11), %s5000_s29, 0 }
  0x56   : > { %s2898_s8 = sshll.u32 (!%p4015_p11), %s4062_s10, 9  ;;  %s248_s11 = scalar_lea.sflag (!%p4015_p11), [#allocation6], %s4062_s10 }
  0x57   : > { %s4066_s15 = scalar_lea.vmem (!%p4015_p11), [#allocation5], %s2898_s8 }
  0x5a   : > { %3833 = dma.done.wait (%p5008_p6), %s248_s11, 8192  }
  0x5b   : > { %3835 = vsyncadd (%p5008_p6), %s248_s11, 4294959104  ;;  %s257_s7 = scalar_lea.sflag [#allocation9], %s4062_s10  ;;  %s4073_s26 = scalar_lea.vmem [#allocation8], %s2898_s8 }
  0x5c   : > { %3837 = dma.done.wait (%p5008_p6), %s257_s7, 8192  }
  0x5d   : > { %3839 = vsyncadd (%p5008_p6), %s257_s7, 4294959104  ;;  %v3864_v0 = vmov 0.0   ;;  %v3865_v1 = vmov 0   ;;  %v309_v2 = vld [vmem:[%s4066_s15 + $0x8] sm:$0xff]  ;;  %v311_v4 = vld [vmem:[%s4066_s15 + $0x18] sm:$0xff]  ;;  %s5009_s0 = sld [smem:[#allocation15_spill]] }
  0x5e   : > { %458 = vmatprep.mubr.f32.mxu0 %v3864_v0  ;;  %571 = vmatprep.mubr.f32.mxu1 %v3864_v0  ;;  %v313_v3 = vld [vmem:[%s4066_s15 + $0x28] sm:$0xff]  ;;  %v315_v6 = vld [vmem:[%s4066_s15 + $0x38] sm:$0xff]  ;;  %v308_v7 = vld [vmem:[%s4066_s15] sm:$0xff]  ;;  %p5010_p13 = scmp.eq.s32.totalorder %s3921_s22, 0  ;;  %p296_p7 = scmp.lt.s32.totalorder %s3921_s22, 1 }
  0x5f   : > { %3598 = vset.pattern.permute.xlu0 %v3865_v1  ;;  %3599 = vset.pattern.permute.xlu1 %v3865_v1  ;;  %v2964_v5 = vpack.c.bf16 %v313_v3, %v309_v2  ;;  %v312_v8 = vld [vmem:[%s4066_s15 + $0x20] sm:$0xff]  ;;  %v2996_v9 = vpack.c.bf16 %v315_v6, %v311_v4  ;;  %v310_v11 = vld [vmem:[%s4066_s15 + $0x10] sm:$0xff]  ;;  %v317_v13 = vld [vmem:[%s4066_s15 + $0x48] sm:$0xff]  ;;  %s5014_s4 = sld [smem:[#allocation18_spill]]  ;;  %p5023_p0 = scmp.ne.s32.totalorder %s5001_s30, 0 }
  0x60   : > { %v2966_v10 = vpack.c.bf16 %v312_v8, %v308_v7  ;;  %v314_v12 = vld [vmem:[%s4066_s15 + $0x30] sm:$0xff]  ;;  %v321_v15 = vld [vmem:[%s4066_s15 + $0x68] sm:$0xff]  ;;  %v319_v16 = vld [vmem:[%s4066_s15 + $0x58] sm:$0xff]  ;;  %p5011_p1 = pmov %p5010_p13 }
  0x61   : > { %2965 = vmatprep.subr.bf16.mxu0 %v2964_v5  ;;  %v2998_v14 = vpack.c.bf16 %v314_v12, %v310_v11  ;;  %v323_v17 = vld [vmem:[%s4066_s15 + $0x78] sm:$0xff]  ;;  %2997 = vmatprep.subr.bf16.mxu1 %v2996_v9  ;;  %v2968_v18 = vpack.c.bf16 %v321_v15, %v317_v13  ;;  %v316_v20 = vld [vmem:[%s4066_s15 + $0x40] sm:$0xff]  ;;  %v318_v22 = vld [vmem:[%s4066_s15 + $0x50] sm:$0xff]  ;;  %s297_s12 = scalar_select %p296_p7, %s3921_s22, 1 }
  0x62   : > { %2967 = vmatpush1.bf16.msra.mxu0 %v2966_v10  ;;  %v3000_v19 = vpack.c.bf16 %v323_v17, %v319_v16  ;;  %v320_v21 = vld [vmem:[%s4066_s15 + $0x60] sm:$0xff]  ;;  %v322_v24 = vld [vmem:[%s4066_s15 + $0x70] sm:$0xff]  ;;  %v325_v25 = vld [vmem:[%s4066_s15 + $0x88] sm:$0xff]  ;;  %s4317_s28 = scalar_select %p5011_p1, 1, 6 }
  0x63   : > { %2999 = vmatpush1.bf16.msra.mxu1 %v2998_v14  ;;  %v2970_v23 = vpack.c.bf16 %v320_v21, %v316_v20  ;;  %v329_v26 = vld [vmem:[%s4066_s15 + $0xa8] sm:$0xff]  ;;  %2969 = vmatprep.subr.bf16.mxu0 %v2968_v18  ;;  %v3002_v27 = vpack.c.bf16 %v322_v24, %v318_v22  ;;  %v327_v29 = vld [vmem:[%s4066_s15 + $0x98] sm:$0xff]  ;;  %v324_v31 = vld [vmem:[%s4066_s15 + $0x80] sm:$0xff]  ;;  %p5012_p11 = pmov %p5011_p1  ;;  %p5013_p10 = pmov %p5011_p1 }
  0x64   : > { %3001 = vmatprep.subr.bf16.mxu1 %v3000_v19  ;;  %v2972_v28 = vpack.c.bf16 %v329_v26, %v325_v25  ;;  %v331_v30 = vld [vmem:[%s4066_s15 + $0xb8] sm:$0xff]  ;;  %v328_v33 = vld [vmem:[%s4066_s15 + $0xa0] sm:$0xff]  ;;  %v326_v34 = vld [vmem:[%s4066_s15 + $0x90] sm:$0xff]  ;;  %s4992_s17 = sshll.u32 %s4317_s28, 3  ;;  %s2901_s9 = sshll.u32 %s297_s12, 2 }
  0x65   : > { %v3004_v32 = vpack.c.bf16 %v331_v30, %v327_v29  ;;  %v330_v35 = vld [vmem:[%s4066_s15 + $0xb0] sm:$0xff]  ;;  %v2974_v36 = vpack.c.bf16 %v328_v33, %v324_v31  ;;  %v333_v37 = vld [vmem:[%s4066_s15 + $0xc8] sm:$0xff]  ;;  %v335_v39 = vld [vmem:[%s4066_s15 + $0xd8] sm:$0xff]  ;;  %s4353_s14 = scalar_select %p5012_p11, 4, 3 }
  0x66   : > { %2971 = vmatpush1.bf16.msra.mxu0 %v2970_v23  ;;  %v337_v38 = vld [vmem:[%s4066_s15 + $0xe8] sm:$0xff]  ;;  %v3006_v40 = vpack.c.bf16 %v330_v35, %v326_v34  ;;  %v339_v42 = vld [vmem:[%s4066_s15 + $0xf8] sm:$0xff]  ;;  %v332_v43 = vld [vmem:[%s4066_s15 + $0xc0] sm:$0xff]  ;;  %s915_s7 = scalar_lea.vmem %s4981_s1, %s4992_s17  ;;  %s299_s11 = scalar_lea.vmem %s5014_s4, %s2901_s9 }
  0x67   : > { %3003 = vmatpush1.bf16.msra.mxu1 %v3002_v27  ;;  %2973 = vmatprep.subr.bf16.mxu0 %v2972_v28  ;;  %v2976_v41 = vpack.c.bf16 %v337_v38, %v333_v37  ;;  %v336_v44 = vld [vmem:[%s4066_s15 + $0xe0] sm:$0xff]  ;;  %v3008_v45 = vpack.c.bf16 %v339_v42, %v335_v39  ;;  %v334_v46 = vld [vmem:[%s4066_s15 + $0xd0] sm:$0xff]  ;;  %v341_v48 = vld [vmem:[%s4066_s15 + $0x108] sm:$0xff]  ;;  %s4368_s29 = scalar_select %p5013_p10, 6, 1 }
  0x68   : > { %3005 = vmatprep.subr.bf16.mxu1 %v3004_v32  ;;  %v338_v47 = vld [vmem:[%s4066_s15 + $0xf0] sm:$0xff]  ;;  %v345_v49 = vld [vmem:[%s4066_s15 + $0x128] sm:$0xff]  ;;  %v343_v50 = vld [vmem:[%s4066_s15 + $0x118] sm:$0xff]  ;;  %v2978_v52 = vpack.c.bf16 %v336_v44, %v332_v43  ;;  %s4991_s25 = sshll.u32 %s4353_s14, 3  ;;  %s2900_s9 = sshll.u32 %s4062_s10, 6 }
  0x69   : > { %v347_v51 = vld [vmem:[%s4066_s15 + $0x138] sm:$0xff]  ;;  %v3010_v53 = vpack.c.bf16 %v338_v47, %v334_v46  ;;  %v2980_v54 = vpack.c.bf16 %v345_v49, %v341_v48  ;;  %v340_v55 = vld [vmem:[%s4066_s15 + $0x100] sm:$0xff]  ;;  %v342_v57 = vld [vmem:[%s4066_s15 + $0x110] sm:$0xff]  ;;  %s1689_s23 = scalar_lea.vmem %s4981_s1, %s4991_s25  ;;  %p5015_p8 = pmov %p5011_p1 }
  0x6a   : > { %2975 = vmatpush1.bf16.msra.mxu0 %v2974_v36  ;;  %v344_v56 = vld [vmem:[%s4066_s15 + $0x120] sm:$0xff]  ;;  %v3012_v58 = vpack.c.bf16 %v347_v51, %v343_v50  ;;  %v346_v59 = vld [vmem:[%s4066_s15 + $0x130] sm:$0xff]  ;;  %v349_v60 = vld [vmem:[%s4066_s15 + $0x148] sm:$0xff]  ;;  %p5016_p4 = pmov %p5011_p1  ;;  %p5017_p9 = pmov %p5011_p1 }
  0x6b   : > { %3007 = vmatpush1.bf16.msra.mxu1 %v3006_v40  ;;  %2977 = vmatprep.subr.bf16.mxu0 %v2976_v41  ;;  %v353_v61 = vld [vmem:[%s4066_s15 + $0x168] sm:$0xff]  ;;  %v351_v62 = vld [vmem:[%s4066_s15 + $0x158] sm:$0xff]  ;;  %v2982_v1 = vpack.c.bf16 %v344_v56, %v340_v55  ;;  %v3014_v2 = vpack.c.bf16 %v346_v59, %v342_v57  ;;  %v348_v4 = vld [vmem:[%s4066_s15 + $0x140] sm:$0xff]  ;;  %p5018_p12 = pmov %p5011_p1  ;;  %s5019_s4 = sshll.u32 %s4317_s28, 3 }
  0x6c   : > { %3009 = vmatprep.subr.bf16.mxu1 %v3008_v45  ;;  %v355_v63 = vld [vmem:[%s4066_s15 + $0x178] sm:$0xff]  ;;  %v2984_v3 = vpack.c.bf16 %v353_v61, %v349_v60  ;;  %v352_v5 = vld [vmem:[%s4066_s15 + $0x160] sm:$0xff]  ;;  %v350_v6 = vld [vmem:[%s4066_s15 + $0x150] sm:$0xff] }
  0x6d   : > { %v3016_v7 = vpack.c.bf16 %v355_v63, %v351_v62  ;;  %v354_v8 = vld [vmem:[%s4066_s15 + $0x170] sm:$0xff]  ;;  %v357_v9 = vld [vmem:[%s4066_s15 + $0x188] sm:$0xff]  ;;  %v359_v11 = vld [vmem:[%s4066_s15 + $0x198] sm:$0xff]  ;;  %v2986_v13 = vpack.c.bf16 %v352_v5, %v348_v4  ;;  %s4537_s3 = scalar_select %p5018_p12, 7, 0 }
  0x6e   : > { %2979 = vmatpush1.bf16.msra.mxu0 %v2978_v52  ;;  %v361_v10 = vld [vmem:[%s4066_s15 + $0x1a8] sm:$0xff]  ;;  %v363_v12 = vld [vmem:[%s4066_s15 + $0x1b8] sm:$0xff]  ;;  %v3018_v14 = vpack.c.bf16 %v354_v8, %v350_v6  ;;  %v356_v16 = vld [vmem:[%s4066_s15 + $0x180] sm:$0xff] }
  0x6f   : > { %3011 = vmatpush1.bf16.msra.mxu1 %v3010_v53  ;;  %2981 = vmatprep.subr.bf16.mxu0 %v2980_v54  ;;  %v2988_v15 = vpack.c.bf16 %v361_v10, %v357_v9  ;;  %v360_v17 = vld [vmem:[%s4066_s15 + $0x1a0] sm:$0xff]  ;;  %v358_v18 = vld [vmem:[%s4066_s15 + $0x190] sm:$0xff]  ;;  %v3020_v19 = vpack.c.bf16 %v363_v12, %v359_v11  ;;  %v365_v21 = vld [vmem:[%s4066_s15 + $0x1c8] sm:$0xff] }
  0x70   : > { %3013 = vmatprep.subr.bf16.mxu1 %v3012_v58  ;;  %v362_v20 = vld [vmem:[%s4066_s15 + $0x1b0] sm:$0xff]  ;;  %v369_v22 = vld [vmem:[%s4066_s15 + $0x1e8] sm:$0xff]  ;;  %v367_v23 = vld [vmem:[%s4066_s15 + $0x1d8] sm:$0xff]  ;;  %v2990_v25 = vpack.c.bf16 %v360_v17, %v356_v16 }
  0x71   : > { %v371_v24 = vld [vmem:[%s4066_s15 + $0x1f8] sm:$0xff]  ;;  %v3022_v26 = vpack.c.bf16 %v362_v20, %v358_v18  ;;  %v2992_v27 = vpack.c.bf16 %v369_v22, %v365_v21  ;;  %v364_v28 = vld [vmem:[%s4066_s15 + $0x1c0] sm:$0xff]  ;;  %v366_v30 = vld [vmem:[%s4066_s15 + $0x1d0] sm:$0xff] }
  0x72   : > { %2983 = vmatpush1.bf16.msra.mxu0 %v2982_v1  ;;  %v368_v29 = vld [vmem:[%s4066_s15 + $0x1e0] sm:$0xff]  ;;  %v3024_v31 = vpack.c.bf16 %v371_v24, %v367_v23  ;;  %v370_v32 = vld [vmem:[%s4066_s15 + $0x1f0] sm:$0xff]  ;;  %v668_v33 = vld [vmem:[%s4073_s26 + $0x8] sm:$0xff]  ;;  %s4292_s15 = scalar_select %p5010_p13, 0, 7 }
  0x73   : > { %3015 = vmatpush1.bf16.msra.mxu1 %v3014_v2  ;;  %2985 = vmatprep.subr.bf16.mxu0 %v2984_v3  ;;  %v672_v34 = vld [vmem:[%s4073_s26 + $0x28] sm:$0xff]  ;;  %v670_v35 = vld [vmem:[%s4073_s26 + $0x18] sm:$0xff]  ;;  %v2994_v37 = vpack.c.bf16 %v368_v29, %v364_v28  ;;  %v3026_v38 = vpack.c.bf16 %v370_v32, %v366_v30  ;;  %v667_v40 = vld [vmem:[%s4073_s26] sm:$0xff] }
  0x74   : > { %3017 = vmatprep.subr.bf16.mxu1 %v3016_v7  ;;  %v674_v36 = vld [vmem:[%s4073_s26 + $0x38] sm:$0xff]  ;;  %v4149_v39 = vpack.c.bf16 %v672_v34, %v668_v33  ;;  %v671_v41 = vld [vmem:[%s4073_s26 + $0x20] sm:$0xff]  ;;  %v669_v43 = vld [vmem:[%s4073_s26 + $0x10] sm:$0xff]  ;;  %s2902_s13 = sshll.u32 %s4292_s15, 3 }
  0x75   : > { %v4153_v42 = vpack.c.bf16 %v674_v36, %v670_v35  ;;  %v673_v44 = vld [vmem:[%s4073_s26 + $0x30] sm:$0xff]  ;;  %v676_v45 = vld [vmem:[%s4073_s26 + $0x48] sm:$0xff]  ;;  %v300_v47 = vld [vmem:[%s5009_s0] sm:$0xff]  ;;  %v4165_v50 = vpack.c.bf16 %v671_v41, %v667_v40  ;;  %s657_s16 = scalar_lea.vmem %s4981_s1, %s2902_s13 }
  0x76   : > { %2987 = vmatpush1.bf16.msra.mxu0 %v2986_v13  ;;  %v680_v46 = vld [vmem:[%s4073_s26 + $0x68] sm:$0xff]  ;;  %v678_v48 = vld [vmem:[%s4073_s26 + $0x58] sm:$0xff]  ;;  %v4168_v51 = vpack.c.bf16 %v673_v44, %v669_v43  ;;  %v675_v53 = vld [vmem:[%s4073_s26 + $0x40] sm:$0xff] }
  0x77   : > { %3019 = vmatpush1.bf16.msra.mxu1 %v3018_v14  ;;  %2989 = vmatprep.subr.bf16.mxu0 %v2988_v15  ;;  %v682_v49 = vld [vmem:[%s4073_s26 + $0x78] sm:$0xff]  ;;  %v4170_v52 = vpack.c.bf16 %v680_v46, %v676_v45  ;;  %v679_v54 = vld [vmem:[%s4073_s26 + $0x60] sm:$0xff]  ;;  %v677_v55 = vld [vmem:[%s4073_s26 + $0x50] sm:$0xff] }
  0x78   : > { %3021 = vmatprep.subr.bf16.mxu1 %v3020_v19  ;;  %v4175_v56 = vpack.c.bf16 %v682_v49, %v678_v48  ;;  %v681_v57 = vld [vmem:[%s4073_s26 + $0x70] sm:$0xff]  ;;  %v684_v58 = vld [vmem:[%s4073_s26 + $0x88] sm:$0xff]  ;;  %v686_v61 = vld [vmem:[%s4073_s26 + $0x98] sm:$0xff]  ;;  %v4188_v63 = vpack.c.bf16 %v679_v54, %v675_v53 }
  0x79   : > { %v688_v59 = vld [vmem:[%s4073_s26 + $0xa8] sm:$0xff]  ;;  %v690_v62 = vld [vmem:[%s4073_s26 + $0xb8] sm:$0xff]  ;;  %v4192_v1 = vpack.c.bf16 %v681_v57, %v677_v55  ;;  %v683_v3 = vld [vmem:[%s4073_s26 + $0x80] sm:$0xff] }
  0x7a   : > { %2991 = vmatpush1.bf16.msra.mxu0 %v2990_v25  ;;  %v301_v60 = vld [vmem:[%s5009_s0 + $0x8] sm:$0xff]  ;;  %v4194_v2 = vpack.c.bf16 %v688_v59, %v684_v58  ;;  %v687_v4 = vld [vmem:[%s4073_s26 + $0xa0] sm:$0xff]  ;;  %v685_v5 = vld [vmem:[%s4073_s26 + $0x90] sm:$0xff]  ;;  %v4200_v6 = vpack.c.bf16 %v690_v62, %v686_v61 }
  0x7b   : > { %3023 = vmatpush1.bf16.msra.mxu1 %v3022_v26  ;;  %2993 = vmatprep.subr.bf16.mxu0 %v2992_v27  ;;  %v689_v7 = vld [vmem:[%s4073_s26 + $0xb0] sm:$0xff]  ;;  %v692_v8 = vld [vmem:[%s4073_s26 + $0xc8] sm:$0xff]  ;;  %v694_v11 = vld [vmem:[%s4073_s26 + $0xd8] sm:$0xff]  ;;  %v4213_v13 = vpack.c.bf16 %v687_v4, %v683_v3 }
  0x7c   : > { %3025 = vmatprep.subr.bf16.mxu1 %v3024_v31  ;;  %v696_v9 = vld [vmem:[%s4073_s26 + $0xe8] sm:$0xff]  ;;  %v302_v10 = vld [vmem:[%s5009_s0 + $0x10] sm:$0xff]  ;;  %v698_v12 = vld [vmem:[%s4073_s26 + $0xf8] sm:$0xff]  ;;  %v4217_v14 = vpack.c.bf16 %v689_v7, %v685_v5 }
  0x7d   : > { %v4219_v15 = vpack.c.bf16 %v696_v9, %v692_v8  ;;  %v691_v16 = vld [vmem:[%s4073_s26 + $0xc0] sm:$0xff]  ;;  %v693_v18 = vld [vmem:[%s4073_s26 + $0xd0] sm:$0xff]  ;;  %v4225_v19 = vpack.c.bf16 %v698_v12, %v694_v11  ;;  %v700_v21 = vld [vmem:[%s4073_s26 + $0x108] sm:$0xff] }
  0x7e   : > { %2995 = vmatpush1.bf16.msra.mxu0 %v2994_v37  ;;  %v695_v17 = vld [vmem:[%s4073_s26 + $0xe0] sm:$0xff]  ;;  %v697_v20 = vld [vmem:[%s4073_s26 + $0xf0] sm:$0xff]  ;;  %v704_v22 = vld [vmem:[%s4073_s26 + $0x128] sm:$0xff] }
  0x7f   : > { %3027 = vmatpush1.bf16.msra.mxu1 %v3026_v38  ;;  %3029 = vmatprep.subr.bf16.mxu0 %v4149_v39  ;;  %v303_v23 = vld [vmem:[%s5009_s0 + $0x18] sm:$0xff]  ;;  %v4238_v26 = vpack.c.bf16 %v695_v17, %v691_v16  ;;  %v4242_v27 = vpack.c.bf16 %v697_v20, %v693_v18  ;;  %v4244_v28 = vpack.c.bf16 %v704_v22, %v700_v21  ;;  %v699_v29 = vld [vmem:[%s4073_s26 + $0x100] sm:$0xff]  ;;  %v701_v31 = vld [vmem:[%s4073_s26 + $0x110] sm:$0xff] }
  0x80   : > { %3061 = vmatprep.subr.bf16.mxu1 %v4153_v42  ;;  %v702_v24 = vld [vmem:[%s4073_s26 + $0x118] sm:$0xff]  ;;  %v703_v30 = vld [vmem:[%s4073_s26 + $0x120] sm:$0xff]  ;;  %v705_v33 = vld [vmem:[%s4073_s26 + $0x130] sm:$0xff] }
  0x81   : > { %459 = vmatmul.mubr.f32.vlgmr.msra.gmra.mrb[0].mxu0 %v300_v47  ;;  %v706_v25 = vld [vmem:[%s4073_s26 + $0x138] sm:$0xff]  ;;  %v708_v34 = vld [vmem:[%s4073_s26 + $0x148] sm:$0xff]  ;;  %v304_v36 = vld [vmem:[%s5009_s0 + $0x20] sm:$0xff]  ;;  %v4263_v40 = vpack.c.bf16 %v703_v30, %v699_v29  ;;  %v4267_v41 = vpack.c.bf16 %v705_v33, %v701_v31 }
  0x82   : > { %572 = vmatmul.mubr.f32.vlgmr.msra.gmra.mrb[0].mxu1 %v300_v47  ;;  %464 = vmatprep.mubr.f32.mxu0 %v3864_v0  ;;  %v4250_v32 = vpack.c.bf16 %v706_v25, %v702_v24  ;;  %v712_v35 = vld [vmem:[%s4073_s26 + $0x168] sm:$0xff]  ;;  %v710_v37 = vld [vmem:[%s4073_s26 + $0x158] sm:$0xff]  ;;  %v707_v44 = vld [vmem:[%s4073_s26 + $0x140] sm:$0xff] }
  0x83   : > { %577 = vmatprep.mubr.f32.mxu1 %v3864_v0  ;;  %3031 = vmatpush1.bf16.msra.mxu0 %v4165_v50  ;;  %v714_v38 = vld [vmem:[%s4073_s26 + $0x178] sm:$0xff]  ;;  %v4269_v43 = vpack.c.bf16 %v712_v35, %v708_v34  ;;  %v711_v45 = vld [vmem:[%s4073_s26 + $0x160] sm:$0xff]  ;;  %v709_v46 = vld [vmem:[%s4073_s26 + $0x150] sm:$0xff]  ;;  %v374_v35 = vlaneseq }
  0x84   : > { %3063 = vmatpush1.bf16.msra.mxu1 %v4168_v51  ;;  %3033 = vmatprep.subr.bf16.mxu0 %v4170_v52  ;;  %v4275_v47 = vpack.c.bf16 %v714_v38, %v710_v37  ;;  %v713_v48 = vld [vmem:[%s4073_s26 + $0x170] sm:$0xff]  ;;  %v716_v49 = vld [vmem:[%s4073_s26 + $0x188] sm:$0xff]  ;;  %v718_v55 = vld [vmem:[%s4073_s26 + $0x198] sm:$0xff]  ;;  %v4288_v58 = vpack.c.bf16 %v711_v45, %v707_v44 }
  0x85   : > { %465 = vmatmul.mubr.f32.gmra.mrb[2].mxu0 %v301_v60  ;;  %3065 = vmatprep.subr.bf16.mxu1 %v4175_v56  ;;  %v720_v53 = vld [vmem:[%s4073_s26 + $0x1a8] sm:$0xff]  ;;  %v722_v57 = vld [vmem:[%s4073_s26 + $0x1b8] sm:$0xff]  ;;  %v4296_v59 = vpack.c.bf16 %v713_v48, %v709_v46  ;;  %v715_v61 = vld [vmem:[%s4073_s26 + $0x180] sm:$0xff] }
  0x86   : > { %578 = vmatmul.mubr.f32.gmra.mrb[2].mxu1 %v301_v60  ;;  %470 = vmatprep.mubr.f32.mxu0 %v3864_v0  ;;  %v305_v54 = vld [vmem:[%s5009_s0 + $0x28] sm:$0xff]  ;;  %v4298_v60 = vpack.c.bf16 %v720_v53, %v716_v49  ;;  %v719_v62 = vld [vmem:[%s4073_s26 + $0x1a0] sm:$0xff]  ;;  %v717_v3 = vld [vmem:[%s4073_s26 + $0x190] sm:$0xff]  ;;  %v4304_v4 = vpack.c.bf16 %v722_v57, %v718_v55 }
  0x87   : > { %583 = vmatprep.mubr.f32.mxu1 %v3864_v0  ;;  %3035 = vmatpush1.bf16.msra.mxu0 %v4188_v63  ;;  %v721_v5 = vld [vmem:[%s4073_s26 + $0x1b0] sm:$0xff]  ;;  %v724_v7 = vld [vmem:[%s4073_s26 + $0x1c8] sm:$0xff]  ;;  %v730_v11 = vld [vmem:[%s4073_s26 + $0x1f8] sm:$0xff]  ;;  %v4321_v12 = vpack.c.bf16 %v719_v62, %v715_v61 }
  0x88   : > { %3067 = vmatpush1.bf16.msra.mxu1 %v4192_v1  ;;  %3037 = vmatprep.subr.bf16.mxu0 %v4194_v2  ;;  %v728_v8 = vld [vmem:[%s4073_s26 + $0x1e8] sm:$0xff]  ;;  %v306_v9 = vld [vmem:[%s5009_s0 + $0x30] sm:$0xff]  ;;  %v4326_v16 = vpack.c.bf16 %v721_v5, %v717_v3  ;;  %v723_v18 = vld [vmem:[%s4073_s26 + $0x1c0] sm:$0xff] }
  0x89   : > { %471 = vmatmul.mubr.f32.gmra.mrb[4].mxu0 %v302_v10  ;;  %3069 = vmatprep.subr.bf16.mxu1 %v4200_v6  ;;  %v4328_v17 = vpack.c.bf16 %v728_v8, %v724_v7  ;;  %v727_v20 = vld [vmem:[%s4073_s26 + $0x1e0] sm:$0xff]  ;;  %v725_v22 = vld [vmem:[%s4073_s26 + $0x1d0] sm:$0xff]  ;;  %v307_v24 = vld [vmem:[%s5009_s0 + $0x38] sm:$0xff] }
  0x8a   : > { %584 = vmatmul.mubr.f32.gmra.mrb[4].mxu1 %v302_v10  ;;  %476 = vmatprep.mubr.f32.mxu0 %v3864_v0  ;;  %v726_v10 = vld [vmem:[%s4073_s26 + $0x1d8] sm:$0xff]  ;;  %v4349_v25 = vpack.c.bf16 %v727_v20, %v723_v18  ;;  %v658_v30 = vld [vmem:[%s657_s16] sm:$0xff]  ;;  %s4990_s16 = sshll.u32 %s4368_s29, 3 }
  0x8b   : > { %589 = vmatprep.mubr.f32.mxu1 %v3864_v0  ;;  %3039 = vmatpush1.bf16.msra.mxu0 %v4213_v13  ;;  %v4333_v21 = vpack.c.bf16 %v730_v11, %v726_v10  ;;  %v916_v31 = vld [vmem:[%s915_s7] sm:$0xff]  ;;  %s2205_s7 = scalar_lea.vmem %s4981_s1, %s4990_s16 }
  0x8c   : > { %3071 = vmatpush1.bf16.msra.mxu1 %v4217_v14  ;;  %3041 = vmatprep.subr.bf16.mxu0 %v4219_v15  ;;  %v1690_v33 = vld [vmem:[%s1689_s23] sm:$0xff]  ;;  %s4473_s23 = scalar_lea.vmem [#allocation10], %s2900_s9 }
  0x8d   : > { %477 = vmatmul.mubr.f32.gmra.mrb[6].mxu0 %v303_v23  ;;  %3073 = vmatprep.subr.bf16.mxu1 %v4225_v19  ;;  %v2206_v34 = vld [vmem:[%s2205_s7] sm:$0xff]  ;;  %s2956_s7 = sshll.u32 %s4292_s15, 5  ;;  %s911_s8 = scalar_lea.vmem %s4473_s23, %s2902_s13 [#allocation10] }
  0x8e   : > { %590 = vmatmul.mubr.f32.gmra.mrb[6].mxu1 %v303_v23  ;;  %482 = vmatprep.mubr.f32.mxu0 %v3864_v0  ;;  %v729_v23 = vld [vmem:[%s4073_s26 + $0x1f0] sm:$0xff]  ;;  %v372_v38 = vld [vmem:[%s299_s11] sm:$0xf]  ;;  %s661_s12 = scalar_lea.vmem [#allocation2], %s2956_s7  ;;  %s1169_s27 = scalar_lea.vmem %s4473_s23, %s5019_s4 [#allocation10] }
  0x8f   : > { %595 = vmatprep.mubr.f32.mxu1 %v3864_v0  ;;  %3043 = vmatpush1.bf16.msra.mxu0 %v4238_v26  ;;  %v4357_v29 = vpack.c.bf16 %v729_v23, %v725_v22  ;;  %s4512_s15 = scalar_select %p5015_p8, 3, 4 }
  0x90   : > { %3075 = vmatpush1.bf16.msra.mxu1 %v4242_v27  ;;  %3045 = vmatprep.subr.bf16.mxu0 %v4244_v28  ;;  %s4516_s13 = scalar_select %p5016_p4, 2, 5 }
  0x91   : > { %483 = vmatmul.mubr.f32.gmra.mrb[8].mxu0 %v304_v36  ;;  %3077 = vmatprep.subr.bf16.mxu1 %v4250_v32  ;;  %s4520_s11 = scalar_select %p5017_p9, 5, 2 }
  0x92   : > { %596 = vmatmul.mubr.f32.gmra.mrb[8].mxu1 %v304_v36  ;;  %488 = vmatprep.mubr.f32.mxu0 %v3864_v0  ;;  %v375_v36 = vshrl.u32 %v374_v35, 7  ;;  %s2914_s7 = sshll.u32 %s4516_s13, 3 }
  0x93   : > { %601 = vmatprep.mubr.f32.mxu1 %v3864_v0  ;;  %3047 = vmatpush1.bf16.msra.mxu0 %v4263_v40  ;;  %s1173_s16 = scalar_lea.vmem %s4981_s1, %s2914_s7  ;;  %s2932_s2 = sshll.u32 %s4520_s11, 3 }
  0x94   : > { %3079 = vmatpush1.bf16.msra.mxu1 %v4267_v41  ;;  %3049 = vmatprep.subr.bf16.mxu0 %v4269_v43  ;;  %v376_v37 = vsub.s32 0, %v375_v36  ;;  %v380_v44 = vsub.s32 1, %v375_v36  ;;  %v384_v45 = vsub.s32 2, %v375_v36  ;;  %v388_v46 = vsub.s32 3, %v375_v36  ;;  %s1947_s9 = scalar_lea.vmem %s4981_s1, %s2932_s2 }
  0x95   : > { %489 = vmatmul.mubr.f32.gmra.mrb[10].mxu0 %v305_v54  ;;  %3081 = vmatprep.subr.bf16.mxu1 %v4275_v47 }
  0x96   : > { %602 = vmatmul.mubr.f32.gmra.mrb[10].mxu1 %v305_v54  ;;  %494 = vmatprep.mubr.f32.mxu0 %v3864_v0  ;;  %v4428_v48 = vrot.slane %v372_v38, %v376_v37  ;;  %v4430_v49 = vrot.slane %v372_v38, %v380_v44 }
  0x97   : > { %607 = vmatprep.mubr.f32.mxu1 %v3864_v0  ;;  %3051 = vmatpush1.bf16.msra.mxu0 %v4288_v58 }
  0x98   : > { %3083 = vmatpush1.bf16.msra.mxu1 %v4296_v59  ;;  %3053 = vmatprep.subr.bf16.mxu0 %v4298_v60 }
  0x99   : > { %495 = vmatmul.mubr.f32.gmra.mrb[12].mxu0 %v306_v9  ;;  %3085 = vmatprep.subr.bf16.mxu1 %v4304_v4 }
  0x9a   : > { %608 = vmatmul.mubr.f32.gmra.mrb[12].mxu1 %v306_v9  ;;  %500 = vmatprep.mubr.f32.mxu0 %v3864_v0 }
  0x9b   : > { %613 = vmatprep.mubr.f32.mxu1 %v3864_v0  ;;  %3055 = vmatpush1.bf16.msra.mxu0 %v4321_v12 }
  0x9c   : > { %3087 = vmatpush1.bf16.msra.mxu1 %v4326_v16  ;;  %3057 = vmatprep.subr.bf16.mxu0 %v4328_v17 }
  0x9d   : > { %501 = vmatmul.mubr.f32.gmra.mrb[14].mxu0 %v307_v24  ;;  %3089 = vmatprep.subr.bf16.mxu1 %v4333_v21 }
  0x9e   : > { %614 = vmatmul.mubr.f32.gmra.mrb[14].mxu1 %v307_v24  ;;  %795 = vmatprep.mubr.f32.mxu0 %v3864_v0 }
  0x9f   : > { %3059 = vmatpush1.bf16.msra.mxu0 %v4349_v25  ;;  %866 = vmatprep.mubr.f32.mxu1 %v3864_v0 }
  0xa0   : > { %3091 = vmatpush1.bf16.msra.mxu1 %v4357_v29  ;;  %902 = vperm.xlu0 %3598, %v658_v30  }
  0xa1   : > { %3093 = vmatprep.subr.bf16.mxu0 %v4149_v39  ;;  %3125 = vmatprep.subr.bf16.mxu1 %v4153_v42 }
  0xa2   : > { %796 = vmatmul.mubr.f32.vlgmr.msra.gmra.mrb[16].mxu0 %v3864_v0 }
  0xa3   : > { %867 = vmatmul.mubr.f32.vlgmr.msra.gmra.mrb[16].mxu1 %v3864_v0  ;;  %3095 = vmatpush1.bf16.msra.mxu0 %v4165_v50 }
  0xa4   : > { %1160 = vperm.xlu0 %3598, %v916_v31   ;;  %3127 = vmatpush1.bf16.msra.mxu1 %v4168_v51 }
  0xa5   : > { %3097 = vmatprep.subr.bf16.mxu0 %v4170_v52  ;;  %3129 = vmatprep.subr.bf16.mxu1 %v4175_v56 }
  0xa6   : > { %1053 = vmatprep.mubr.f32.mxu0 %v3864_v0  ;;  %1124 = vmatprep.mubr.f32.mxu1 %v3864_v0 }
  0xa7   : > { %3099 = vmatpush1.bf16.msra.mxu0 %v4188_v63 }
  0xa8   : > { %1934 = vperm.xlu0 %3598, %v1690_v33   ;;  %3131 = vmatpush1.bf16.msra.mxu1 %v4192_v1 }
  0xa9   : > { %3101 = vmatprep.subr.bf16.mxu0 %v4194_v2  ;;  %3133 = vmatprep.subr.bf16.mxu1 %v4200_v6 }
  0xab   : > { %3103 = vmatpush1.bf16.msra.mxu0 %v4213_v13 }
  0xac   : > { %2450 = vperm.xlu0 %3598, %v2206_v34   ;;  %3135 = vmatpush1.bf16.msra.mxu1 %v4217_v14 }
  0xad   : > { %3105 = vmatprep.subr.bf16.mxu0 %v4219_v15  ;;  %3137 = vmatprep.subr.bf16.mxu1 %v4225_v19 }
  0xaf   : > { %3107 = vmatpush1.bf16.msra.mxu0 %v4238_v26 }
  0xb0   : > { %3139 = vmatpush1.bf16.msra.mxu1 %v4242_v27  ;;  %3109 = vmatprep.subr.bf16.mxu0 %v4244_v28 }
  0xb1   : > { %3141 = vmatprep.subr.bf16.mxu1 %v4250_v32 }
  0xb3   : > { %3111 = vmatpush1.bf16.msra.mxu0 %v4263_v40 }
  0xb4   : > { %3143 = vmatpush1.bf16.msra.mxu1 %v4267_v41  ;;  %3113 = vmatprep.subr.bf16.mxu0 %v4269_v43 }
  0xb5   : > { %3145 = vmatprep.subr.bf16.mxu1 %v4275_v47 }
  0xb7   : > { %3115 = vmatpush1.bf16.msra.mxu0 %v4288_v58 }
  0xb8   : > { %3147 = vmatpush1.bf16.msra.mxu1 %v4296_v59  ;;  %3117 = vmatprep.subr.bf16.mxu0 %v4298_v60 }
  0xb9   : > { %3149 = vmatprep.subr.bf16.mxu1 %v4304_v4 }
  0xbb   : > { %3119 = vmatpush1.bf16.msra.mxu0 %v4321_v12 }
  0xbc   : > { %3151 = vmatpush1.bf16.msra.mxu1 %v4326_v16  ;;  %3121 = vmatprep.subr.bf16.mxu0 %v4328_v17 }
  0xbd   : > { %3153 = vmatprep.subr.bf16.mxu1 %v4333_v21 }
  0xbf   : > { %3123 = vmatpush1.bf16.msra.mxu0 %v4349_v25 }
  0xc0   : > { %3155 = vmatpush1.bf16.msra.mxu1 %v4357_v29  ;;  %3157 = vmatprep.subr.bf16.mxu0 %v4149_v39  ;;  %v4432_v39 = vrot.slane %v372_v38, %v384_v45 }
  0xc1   : > { %3189 = vmatprep.subr.bf16.mxu1 %v4153_v42  ;;  %v4434_v42 = vrot.slane %v372_v38, %v388_v46 }
 0x154   : > { %v460_v53 = vpop.f32.mrb[0].mxu0 }
 0x155   : > { %v461_v54 = vadd.f32 %v460_v53, %v4428_v48  ;;  %v462_v55 = vpop.f32.mrb[1].mxu0  ;;  %v573_v57 = vpop.f32.mrb[0].mxu1 }
 0x156   : > { %v463_v61 = vadd.f32 %v462_v55, %v4430_v49  ;;  %v574_v62 = vadd.f32 %v573_v57, %v4432_v39  ;;  %v575_v3 = vpop.f32.mrb[1].mxu1 }
 0x157   : > { %620 = vst [vmem:[#allocation2] sm:$0xff] %v461_v54  ;;  %v576_v5 = vadd.f32 %v575_v3, %v4434_v42 }
 0x158   : > { %621 = vst [vmem:[#allocation2 + $0x8] sm:$0xff] %v463_v61  ;;  %v466_v7 = vpop.f32.mrb[2].mxu0  ;;  %622 = vst [vmem:[#allocation2 + $0x10] sm:$0xff] %v574_v62 }
 0x159   : > { %v467_v8 = vadd.f32 %v466_v7, %v4428_v48  ;;  %v468_v9 = vpop.f32.mrb[3].mxu0  ;;  %623 = vst [vmem:[#allocation2 + $0x18] sm:$0xff] %v576_v5  ;;  %v579_v10 = vpop.f32.mrb[2].mxu1 }
 0x15a   : > { %v469_v11 = vadd.f32 %v468_v9, %v4430_v49  ;;  %v580_v18 = vadd.f32 %v579_v10, %v4432_v39  ;;  %v581_v20 = vpop.f32.mrb[3].mxu1 }
 0x15b   : > { %624 = vst [vmem:[#allocation2 + $0x20] sm:$0xff] %v467_v8  ;;  %v582_v22 = vadd.f32 %v581_v20, %v4434_v42 }
 0x15c   : > { %625 = vst [vmem:[#allocation2 + $0x28] sm:$0xff] %v469_v11  ;;  %v472_v23 = vpop.f32.mrb[4].mxu0  ;;  %626 = vst [vmem:[#allocation2 + $0x30] sm:$0xff] %v580_v18 }
 0x15d   : > { %v473_v24 = vadd.f32 %v472_v23, %v4428_v48  ;;  %v474_v30 = vpop.f32.mrb[5].mxu0  ;;  %627 = vst [vmem:[#allocation2 + $0x38] sm:$0xff] %v582_v22  ;;  %v585_v31 = vpop.f32.mrb[4].mxu1 }
 0x15e   : > { %v475_v33 = vadd.f32 %v474_v30, %v4430_v49  ;;  %v586_v34 = vadd.f32 %v585_v31, %v4432_v39  ;;  %v587_v35 = vpop.f32.mrb[5].mxu1 }
 0x15f   : > { %628 = vst [vmem:[#allocation2 + $0x40] sm:$0xff] %v473_v24  ;;  %v588_v36 = vadd.f32 %v587_v35, %v4434_v42 }
 0x160   : > { %629 = vst [vmem:[#allocation2 + $0x48] sm:$0xff] %v475_v33  ;;  %v478_v37 = vpop.f32.mrb[6].mxu0  ;;  %630 = vst [vmem:[#allocation2 + $0x50] sm:$0xff] %v586_v34 }
 0x161   : > { %v479_v38 = vadd.f32 %v478_v37, %v4428_v48  ;;  %v480_v44 = vpop.f32.mrb[7].mxu0  ;;  %631 = vst [vmem:[#allocation2 + $0x58] sm:$0xff] %v588_v36  ;;  %v591_v45 = vpop.f32.mrb[6].mxu1 }
 0x162   : > { %v481_v46 = vadd.f32 %v480_v44, %v4430_v49  ;;  %v592_v53 = vadd.f32 %v591_v45, %v4432_v39  ;;  %v593_v54 = vpop.f32.mrb[7].mxu1 }
 0x163   : > { %632 = vst [vmem:[#allocation2 + $0x60] sm:$0xff] %v479_v38  ;;  %v594_v55 = vadd.f32 %v593_v54, %v4434_v42 }
 0x164   : > { %633 = vst [vmem:[#allocation2 + $0x68] sm:$0xff] %v481_v46  ;;  %v484_v57 = vpop.f32.mrb[8].mxu0  ;;  %634 = vst [vmem:[#allocation2 + $0x70] sm:$0xff] %v592_v53 }
 0x165   : > { %v485_v61 = vadd.f32 %v484_v57, %v4428_v48  ;;  %v486_v62 = vpop.f32.mrb[9].mxu0  ;;  %635 = vst [vmem:[#allocation2 + $0x78] sm:$0xff] %v594_v55  ;;  %v597_v3 = vpop.f32.mrb[8].mxu1 }
 0x166   : > { %v487_v5 = vadd.f32 %v486_v62, %v4430_v49  ;;  %v598_v7 = vadd.f32 %v597_v3, %v4432_v39  ;;  %v599_v8 = vpop.f32.mrb[9].mxu1 }
 0x167   : > { %636 = vst [vmem:[#allocation2 + $0x80] sm:$0xff] %v485_v61  ;;  %v600_v9 = vadd.f32 %v599_v8, %v4434_v42 }
 0x168   : > { %637 = vst [vmem:[#allocation2 + $0x88] sm:$0xff] %v487_v5  ;;  %v490_v10 = vpop.f32.mrb[10].mxu0  ;;  %638 = vst [vmem:[#allocation2 + $0x90] sm:$0xff] %v598_v7 }
 0x169   : > { %v491_v11 = vadd.f32 %v490_v10, %v4428_v48  ;;  %v492_v18 = vpop.f32.mrb[11].mxu0  ;;  %639 = vst [vmem:[#allocation2 + $0x98] sm:$0xff] %v600_v9  ;;  %v603_v20 = vpop.f32.mrb[10].mxu1 }
 0x16a   : > { %v493_v22 = vadd.f32 %v492_v18, %v4430_v49  ;;  %v604_v23 = vadd.f32 %v603_v20, %v4432_v39  ;;  %v605_v24 = vpop.f32.mrb[11].mxu1 }
 0x16b   : > { %640 = vst [vmem:[#allocation2 + $0xa0] sm:$0xff] %v491_v11  ;;  %v606_v30 = vadd.f32 %v605_v24, %v4434_v42 }
 0x16c   : > { %641 = vst [vmem:[#allocation2 + $0xa8] sm:$0xff] %v493_v22  ;;  %642 = vst [vmem:[#allocation2 + $0xb0] sm:$0xff] %v604_v23  ;;  %v496_v31 = vpop.f32.mrb[12].mxu0 }
 0x16d   : > { %643 = vst [vmem:[#allocation2 + $0xb8] sm:$0xff] %v606_v30  ;;  %v497_v33 = vadd.f32 %v496_v31, %v4428_v48  ;;  %v609_v34 = vpop.f32.mrb[12].mxu1  ;;  %v498_v35 = vpop.f32.mrb[13].mxu0 }
 0x16e   : > { %v610_v36 = vadd.f32 %v609_v34, %v4432_v39  ;;  %v499_v37 = vadd.f32 %v498_v35, %v4430_v49  ;;  %v611_v38 = vpop.f32.mrb[13].mxu1 }
 0x16f   : > { %644 = vst [vmem:[#allocation2 + $0xc0] sm:$0xff] %v497_v33  ;;  %v612_v44 = vadd.f32 %v611_v38, %v4434_v42 }
 0x170   : > { %646 = vst [vmem:[#allocation2 + $0xd0] sm:$0xff] %v610_v36  ;;  %645 = vst [vmem:[#allocation2 + $0xc8] sm:$0xff] %v499_v37  ;;  %v502_v45 = vpop.f32.mrb[14].mxu0 }
 0x171   : > { %647 = vst [vmem:[#allocation2 + $0xd8] sm:$0xff] %v612_v44  ;;  %v503_v46 = vadd.f32 %v502_v45, %v4428_v48  ;;  %v615_v53 = vpop.f32.mrb[14].mxu1  ;;  %v504_v54 = vpop.f32.mrb[15].mxu0 }
 0x172   : > { %v616_v55 = vadd.f32 %v615_v53, %v4432_v39  ;;  %v505_v57 = vadd.f32 %v504_v54, %v4430_v49  ;;  %v617_v61 = vpop.f32.mrb[15].mxu1  ;;  %v903_v53 = vpop.permute.xlu0 %902 }
 0x173   : > { %648 = vst [vmem:[#allocation2 + $0xe0] sm:$0xff] %v503_v46  ;;  %v618_v62 = vadd.f32 %v617_v61, %v4434_v42 }
 0x174   : > { %650 = vst [vmem:[#allocation2 + $0xf0] sm:$0xff] %v616_v55  ;;  %649 = vst [vmem:[#allocation2 + $0xe8] sm:$0xff] %v505_v57 }
 0x175   : > { %651 = vst [vmem:[#allocation2 + $0xf8] sm:$0xff] %v618_v62  ;;  %v797_v3 = vpop.f32.mrb[16].mxu0 }
 0x176   : > { %v799_v5 = vpop.f32.mrb[17].mxu0  ;;  %v868_v7 = vpop.f32.mrb[16].mxu1 }
 0x177   : > { %v870_v8 = vpop.f32.mrb[17].mxu1 }
 0x17c   : > { %v662_v48 = vld [vmem:[%s661_s12] sm:$0xff]  ;;  %v663_v10 = vld [vmem:[%s661_s12 + $0x8] sm:$0xff]  ;;  %v665_v49 = vld [vmem:[%s661_s12 + $0x18] sm:$0xff] }
 0x17d   : > { %v873_v9 = vadd.f32 %v797_v3, %v662_v48  ;;  %v874_v11 = vadd.f32 %v799_v5, %v663_v10  ;;  %v664_v20 = vld [vmem:[%s661_s12 + $0x10] sm:$0xff]  ;;  %v876_v42 = vadd.f32 %v870_v8, %v665_v49  ;;  %s4993_s12 = sshll.u32 %s4512_s15, 3  ;;  %v1161_v5 = vpop.permute.xlu0 %1160 }
 0x17e   : > { %v875_v22 = vadd.f32 %v868_v7, %v664_v20  ;;  %s1431_s0 = scalar_lea.vmem %s4981_s1, %s4993_s12  ;;  %v1448_v20 = vld [vmem:[%s4073_s26 + $0x38] sm:$0xff] }
 0x17f   : > { %v2905_v39 = vmul.f32 -1.442695, %v873_v9  ;;  %v2906_v18 = vmul.f32 -1.442695, %v874_v11  ;;  %v2907_v23 = vmul.f32 -1.442695, %v876_v42 }
 0x180   : > { %v1442_v11 = vld [vmem:[%s4073_s26 + $0x8] sm:$0xff]  ;;  %v1441_v42 = vld [vmem:[%s4073_s26] sm:$0xff] }
 0x181   : > { %3600 = vpow2.f32 %v2905_v39  ;;  %v1446_v39 = vld [vmem:[%s4073_s26 + $0x28] sm:$0xff] }
 0x182   : > { %3602 = vpow2.f32 %v2906_v18  ;;  %v1444_v18 = vld [vmem:[%s4073_s26 + $0x18] sm:$0xff]  ;;  %v4563_v49 = vpack.c.bf16 %v1446_v39, %v1442_v11 }
 0x183   : > { %3604 = vtanh.f32 %v875_v22  ;;  %v1445_v22 = vld [vmem:[%s4073_s26 + $0x20] sm:$0xff]  ;;  %v1484_v11 = vld [vmem:[%s4073_s26 + $0x158] sm:$0xff] }
 0x184   : > { %3606 = vpow2.f32 %v2907_v23  ;;  %v4568_v23 = vpack.c.bf16 %v1448_v20, %v1444_v18  ;;  %v1488_v18 = vld [vmem:[%s4073_s26 + $0x178] sm:$0xff]  ;;  %v1481_v20 = vld [vmem:[%s4073_s26 + $0x140] sm:$0xff] }
 0x18b   : > { %v3601_v24 = vpop.eup %3600 }
 0x18c   : > { %v3603_v30 = vpop.eup %3602  ;;  %v880_v31 = vadd.f32 1.0, %v3601_v24  ;;  %v4570_v24 = vpack.c.bf16 %v1445_v22, %v1441_v42  ;;  %v1485_v42 = vld [vmem:[%s4073_s26 + $0x160] sm:$0xff]  ;;  %v4668_v22 = vpack.c.bf16 %v1488_v18, %v1484_v11 }
 0x18d   : > { %v886_v33 = vadd.f32 1.0, %v3603_v30  ;;  %v3605_v34 = vpop.eup %3604  ;;  %v1443_v30 = vld [vmem:[%s4073_s26 + $0x10] sm:$0xff] }
 0x18e   : > { %3608 = vrcp.f32 %v880_v31  ;;  %v3607_v35 = vpop.eup %3606  ;;  %v1447_v31 = vld [vmem:[%s4073_s26 + $0x30] sm:$0xff] }
 0x18f   : > { %3610 = vrcp.f32 %v886_v33  ;;  %v893_v45 = vadd.f32 1.0, %v3607_v35  ;;  %v4575_v33 = vpack.c.bf16 %v1447_v31, %v1443_v30  ;;  %v1454_v35 = vld [vmem:[%s4073_s26 + $0x68] sm:$0xff]  ;;  %v4670_v30 = vpack.c.bf16 %v1485_v42, %v1481_v20  ;;  %v1483_v31 = vld [vmem:[%s4073_s26 + $0x150] sm:$0xff] }
 0x191   : > { %3612 = vrcp.f32 %v893_v45  ;;  %v1453_v45 = vld [vmem:[%s4073_s26 + $0x60] sm:$0xff] }
 0x198   : > { %v3609_v36 = vpop.eup %3608 }
 0x199   : > { %v3611_v37 = vpop.eup %3610  ;;  %v898_v38 = vmul.f32 %v3609_v36, %v3605_v34  ;;  %v1450_v34 = vld [vmem:[%s4073_s26 + $0x48] sm:$0xff]  ;;  %v1452_v36 = vld [vmem:[%s4073_s26 + $0x58] sm:$0xff] }
 0x19a   : > { %v897_v44 = vmul.f32 0.0, %v3611_v37  ;;  %v4583_v37 = vpack.c.bf16 %v1454_v35, %v1450_v34  ;;  %v1487_v34 = vld [vmem:[%s4073_s26 + $0x170] sm:$0xff] }
 0x19b   : > { %v3613_v55 = vpop.eup %3612  ;;  %v4675_v35 = vpack.c.bf16 %v1487_v34, %v1483_v31 }
 0x19c   : > { %v899_v46 = vadd.f32 %v898_v38, %v897_v44  ;;  %v1456_v38 = vld [vmem:[%s4073_s26 + $0x78] sm:$0xff]  ;;  %v1449_v44 = vld [vmem:[%s4073_s26 + $0x40] sm:$0xff] }
 0x19e   : > { %v4469_v54 = vmul.f32 %v903_v53, %v899_v46  ;;  %v4588_v46 = vpack.c.bf16 %v1456_v38, %v1452_v36  ;;  %v1490_v36 = vld [vmem:[%s4073_s26 + $0x188] sm:$0xff] }
 0x19f   : > { %v1494_v38 = vld [vmem:[%s4073_s26 + $0x1a8] sm:$0xff] }
 0x1a0   : > { %3614 = vtanh.f32 %v4469_v54 }
 0x1aa   : > { %v3615_v57 = vpop.eup %3614 }
 0x1ab   : > { %v907_v61 = vmul.f32 %v3615_v57, %v3613_v55  ;;  %v1455_v55 = vld [vmem:[%s4073_s26 + $0x70] sm:$0xff] }
 0x1ad   : > { %v908_v62 = vmul.f32 %v907_v61, %v903_v53  ;;  %v4590_v53 = vpack.c.bf16 %v1453_v45, %v1449_v44  ;;  %v1458_v61 = vld [vmem:[%s4073_s26 + $0x88] sm:$0xff]  ;;  %v1492_v44 = vld [vmem:[%s4073_s26 + $0x198] sm:$0xff]  ;;  %v4683_v45 = vpack.c.bf16 %v1494_v38, %v1490_v36 }
 0x1af   : > { %912 = vst [vmem:[%s911_s8] sm:$0xff] %v908_v62  ;;  %1054 = vmatmul.mubr.f32.vlgmr.msra.gmra.mrb[18].mxu0 %v908_v62  ;;  %1125 = vmatmul.mubr.f32.vlgmr.msra.gmra.mrb[18].mxu1 %v908_v62  ;;  %s2944_s8 = sshll.u32 %s4537_s3, 3  ;;  %v1462_v62 = vld [vmem:[%s4073_s26 + $0xa8] sm:$0xff] }
 0x1b0   : > { %3159 = vmatpush1.bf16.msra.mxu0 %v4165_v50  ;;  %3191 = vmatpush1.bf16.msra.mxu1 %v4168_v51  ;;  %v1174_v50 = vld [vmem:[%s1173_s16] sm:$0xff]  ;;  %s2463_s25 = scalar_lea.vmem %s4981_s1, %s2944_s8  ;;  %s5020_s16 = sshll.u32 %s4512_s15, 3 }
 0x1b1   : > { %3161 = vmatprep.subr.bf16.mxu0 %v4170_v52  ;;  %3193 = vmatprep.subr.bf16.mxu1 %v4175_v56  ;;  %v1432_v51 = vld [vmem:[%s1431_s0] sm:$0xff]  ;;  %s2957_s0 = sshll.u32 %s4317_s28, 5  ;;  %s2958_s28 = sshll.u32 %s4516_s13, 5 }
 0x1b2   : > { %1311 = vmatprep.mubr.f32.mxu0 %v3864_v0  ;;  %1382 = vmatprep.mubr.f32.mxu1 %v3864_v0  ;;  %v1948_v52 = vld [vmem:[%s1947_s9] sm:$0xff]  ;;  %s919_s12 = scalar_lea.vmem [#allocation2], %s2957_s0  ;;  %s1427_s9 = scalar_lea.vmem %s4473_s23, %s2914_s7 [#allocation10] }
 0x1b3   : > { %1418 = vperm.xlu1 %3599, %v1174_v50   ;;  %v2464_v56 = vld [vmem:[%s2463_s25] sm:$0xff]  ;;  %v1460_v50 = vld [vmem:[%s4073_s26 + $0x98] sm:$0xff]  ;;  %s2959_s13 = sshll.u32 %s4512_s15, 5  ;;  %s1685_s17 = scalar_lea.vmem %s4473_s23, %s5020_s16 [#allocation10] }
 0x1b4   : > { %3163 = vmatpush1.bf16.msra.mxu0 %v4188_v63  ;;  %3195 = vmatpush1.bf16.msra.mxu1 %v4192_v1  ;;  %v920_v63 = vld [vmem:[%s919_s12] sm:$0xff]  ;;  %s1435_s7 = scalar_lea.vmem [#allocation2], %s2959_s13  ;;  %s2960_s15 = sshll.u32 %s4353_s14, 5 }
 0x1b5   : > { %3165 = vmatprep.subr.bf16.mxu0 %v4194_v2  ;;  %3197 = vmatprep.subr.bf16.mxu1 %v4200_v6  ;;  %s1693_s25 = scalar_lea.vmem [#allocation2], %s2960_s15  ;;  %s5021_s0 = sshll.u32 %s4353_s14, 3 }
 0x1b6   : > { %s1943_s4 = scalar_lea.vmem %s4473_s23, %s5021_s0 [#allocation10]  ;;  %s2961_s14 = sshll.u32 %s4520_s11, 5 }
 0x1b7   : > { %1676 = vperm.xlu1 %3599, %v1432_v51   ;;  %v4603_v51 = vpack.c.bf16 %v1462_v62, %v1458_v61  ;;  %v1493_v61 = vld [vmem:[%s4073_s26 + $0x1a0] sm:$0xff]  ;;  %s2717_s16 = scalar_lea.vmem %s4473_s23, %s2944_s8 [#allocation10]  ;;  %s2720_s0 = scalar_lea.sflag [#allocation7], %s4062_s10 }
 0x1b8   : > { %3167 = vmatpush1.bf16.msra.mxu0 %v4213_v13  ;;  %3199 = vmatpush1.bf16.msra.mxu1 %v4217_v14  ;;  %v921_v13 = vld [vmem:[%s919_s12 + $0x8] sm:$0xff] }
 0x1b9   : > { %3169 = vmatprep.subr.bf16.mxu0 %v4219_v15  ;;  %3201 = vmatprep.subr.bf16.mxu1 %v4225_v19 }
 0x1bb   : > { %2192 = vperm.xlu1 %3599, %v1948_v52   ;;  %v1464_v52 = vld [vmem:[%s4073_s26 + $0xb8] sm:$0xff] }
 0x1bc   : > { %3171 = vmatpush1.bf16.msra.mxu0 %v4238_v26  ;;  %3203 = vmatpush1.bf16.msra.mxu1 %v4242_v27 }
 0x1bd   : > { %3173 = vmatprep.subr.bf16.mxu0 %v4244_v28  ;;  %3205 = vmatprep.subr.bf16.mxu1 %v4250_v32  ;;  %v923_v28 = vld [vmem:[%s919_s12 + $0x18] sm:$0xff] }
 0x1bf   : > { %2708 = vperm.xlu1 %3599, %v2464_v56   ;;  %v1457_v56 = vld [vmem:[%s4073_s26 + $0x80] sm:$0xff] }
 0x1c0   : > { %3175 = vmatpush1.bf16.msra.mxu0 %v4263_v40  ;;  %3207 = vmatpush1.bf16.msra.mxu1 %v4267_v41  ;;  %v922_v40 = vld [vmem:[%s919_s12 + $0x10] sm:$0xff]  ;;  %s1177_s12 = scalar_lea.vmem [#allocation2], %s2958_s28  ;;  %s2201_s28 = scalar_lea.vmem %s4473_s23, %s2932_s2 [#allocation10] }
 0x1c1   : > { %3177 = vmatprep.subr.bf16.mxu0 %v4269_v43  ;;  %3209 = vmatprep.subr.bf16.mxu1 %v4275_v47  ;;  %v1181_v20 = vld [vmem:[%s1177_s12 + $0x18] sm:$0xff]  ;;  %v1180_v31 = vld [vmem:[%s1177_s12 + $0x10] sm:$0xff]  ;;  %s2962_s2 = sshll.u32 %s4368_s29, 5 }
 0x1c2   : > { %s2209_s11 = scalar_lea.vmem [#allocation2], %s2962_s2 }
 0x1c4   : > { %3179 = vmatpush1.bf16.msra.mxu0 %v4288_v58  ;;  %3211 = vmatpush1.bf16.msra.mxu1 %v4296_v59 }
 0x1c5   : > { %3181 = vmatprep.subr.bf16.mxu0 %v4298_v60  ;;  %3213 = vmatprep.subr.bf16.mxu1 %v4304_v4 }
 0x1c8   : > { %3183 = vmatpush1.bf16.msra.mxu0 %v4321_v12  ;;  %3215 = vmatpush1.bf16.msra.mxu1 %v4326_v16 }
 0x1c9   : > { %3185 = vmatprep.subr.bf16.mxu0 %v4328_v17  ;;  %3217 = vmatprep.subr.bf16.mxu1 %v4333_v21 }
 0x1cc   : > { %3187 = vmatpush1.bf16.msra.mxu0 %v4349_v25  ;;  %3219 = vmatpush1.bf16.msra.mxu1 %v4357_v29 }
 0x1cd   : > { %3221 = vmatprep.subr.bf16.mxu0 %v4563_v49  ;;  %3253 = vmatprep.subr.bf16.mxu1 %v4568_v23 }
 0x282   : > { %v1055_v1 = vpop.f32.mrb[18].mxu0  ;;  %v1126_v2 = vpop.f32.mrb[18].mxu1 }
 0x283   : > { %v1131_v6 = vadd.f32 %v1055_v1, %v920_v63  ;;  %v1057_v14 = vpop.f32.mrb[19].mxu0  ;;  %v1128_v15 = vpop.f32.mrb[19].mxu1  ;;  %v1133_v41 = vadd.f32 %v1126_v2, %v922_v40  ;;  %v1461_v63 = vld [vmem:[%s4073_s26 + $0xa0] sm:$0xff]  ;;  %v4608_v1 = vpack.c.bf16 %v1464_v52, %v1460_v50  ;;  %v1491_v52 = vld [vmem:[%s4073_s26 + $0x190] sm:$0xff] }
 0x284   : > { %v1132_v19 = vadd.f32 %v1057_v14, %v921_v13  ;;  %v1134_v32 = vadd.f32 %v1128_v15, %v923_v28  ;;  %v4610_v2 = vpack.c.bf16 %v1461_v63, %v1457_v56  ;;  %v1463_v13 = vld [vmem:[%s4073_s26 + $0xb0] sm:$0xff]  ;;  %v1466_v15 = vld [vmem:[%s4073_s26 + $0xc8] sm:$0xff]  ;;  %v1472_v28 = vld [vmem:[%s4073_s26 + $0xf8] sm:$0xff] }
 0x285   : > { %v2911_v26 = vmul.f32 -1.442695, %v1131_v6  ;;  %v1459_v6 = vld [vmem:[%s4073_s26 + $0x90] sm:$0xff]  ;;  %v1469_v40 = vld [vmem:[%s4073_s26 + $0xe0] sm:$0xff] }
 0x286   : > { %v2912_v27 = vmul.f32 -1.442695, %v1132_v19  ;;  %v2913_v43 = vmul.f32 -1.442695, %v1134_v32  ;;  %v4615_v14 = vpack.c.bf16 %v1463_v13, %v1459_v6  ;;  %v1470_v19 = vld [vmem:[%s4073_s26 + $0xe8] sm:$0xff]  ;;  %v1465_v32 = vld [vmem:[%s4073_s26 + $0xc0] sm:$0xff] }
 0x287   : > { %3616 = vpow2.f32 %v2911_v26  ;;  %v1468_v26 = vld [vmem:[%s4073_s26 + $0xd8] sm:$0xff]  ;;  %v1495_v56 = vld [vmem:[%s4073_s26 + $0x1b0] sm:$0xff]  ;;  %v1498_v6 = vld [vmem:[%s4073_s26 + $0x1c8] sm:$0xff] }
 0x288   : > { %3618 = vpow2.f32 %v2912_v27  ;;  %v4623_v27 = vpack.c.bf16 %v1470_v19, %v1466_v15  ;;  %v4695_v63 = vpack.c.bf16 %v1495_v56, %v1491_v52  ;;  %v1502_v13 = vld [vmem:[%s4073_s26 + $0x1e8] sm:$0xff]  ;;  %v1500_v15 = vld [vmem:[%s4073_s26 + $0x1d8] sm:$0xff] }
 0x289   : > { %3620 = vtanh.f32 %v1133_v41  ;;  %v4628_v41 = vpack.c.bf16 %v1472_v28, %v1468_v26  ;;  %v4703_v19 = vpack.c.bf16 %v1502_v13, %v1498_v6  ;;  %v1504_v26 = vld [vmem:[%s4073_s26 + $0x1f8] sm:$0xff]  ;;  %v1497_v28 = vld [vmem:[%s4073_s26 + $0x1c0] sm:$0xff] }
 0x28a   : > { %3622 = vpow2.f32 %v2913_v43  ;;  %v4630_v43 = vpack.c.bf16 %v1469_v40, %v1465_v32  ;;  %v1501_v32 = vld [vmem:[%s4073_s26 + $0x1e0] sm:$0xff]  ;;  %v4708_v40 = vpack.c.bf16 %v1504_v26, %v1500_v15 }
 0x291   : > { %v3617_v47 = vpop.eup %3616 }
 0x292   : > { %v3619_v58 = vpop.eup %3618  ;;  %v1138_v59 = vadd.f32 1.0, %v3617_v47  ;;  %v1467_v47 = vld [vmem:[%s4073_s26 + $0xd0] sm:$0xff] }
 0x293   : > { %v1144_v60 = vadd.f32 1.0, %v3619_v58  ;;  %v3621_v4 = vpop.eup %3620  ;;  %v1471_v58 = vld [vmem:[%s4073_s26 + $0xf0] sm:$0xff] }
 0x294   : > { %3624 = vrcp.f32 %v1138_v59  ;;  %v3623_v12 = vpop.eup %3622  ;;  %v4635_v59 = vpack.c.bf16 %v1471_v58, %v1467_v47  ;;  %v4710_v47 = vpack.c.bf16 %v1501_v32, %v1497_v28  ;;  %v1499_v58 = vld [vmem:[%s4073_s26 + $0x1d0] sm:$0xff]  ;;  %v1419_v32 = vpop.permute.xlu1 %1418 }
 0x295   : > { %3626 = vrcp.f32 %v1144_v60  ;;  %v1151_v29 = vadd.f32 1.0, %v3623_v12  ;;  %v1474_v60 = vld [vmem:[%s4073_s26 + $0x108] sm:$0xff]  ;;  %v1476_v12 = vld [vmem:[%s4073_s26 + $0x118] sm:$0xff] }
 0x297   : > { %3628 = vrcp.f32 %v1151_v29 }
 0x29e   : > { %v3625_v16 = vpop.eup %3624 }
 0x29f   : > { %v3627_v17 = vpop.eup %3626  ;;  %v1156_v21 = vmul.f32 %v3625_v16, %v3621_v4  ;;  %v1478_v4 = vld [vmem:[%s4073_s26 + $0x128] sm:$0xff] }
 0x2a0   : > { %v1155_v25 = vmul.f32 %v3627_v17, %v4469_v54  ;;  %v1451_v54 = vld [vmem:[%s4073_s26 + $0x50] sm:$0xff]  ;;  %v4643_v16 = vpack.c.bf16 %v1478_v4, %v1474_v60  ;;  %v1480_v17 = vld [vmem:[%s4073_s26 + $0x138] sm:$0xff] }
 0x2a1   : > { %v3629_v8 = vpop.eup %3628  ;;  %v4595_v57 = vpack.c.bf16 %v1455_v55, %v1451_v54  ;;  %v4648_v29 = vpack.c.bf16 %v1480_v17, %v1476_v12  ;;  %v1496_v54 = vld [vmem:[%s4073_s26 + $0x1b8] sm:$0xff]  ;;  %v1489_v55 = vld [vmem:[%s4073_s26 + $0x180] sm:$0xff]  ;;  %v1503_v60 = vld [vmem:[%s4073_s26 + $0x1f0] sm:$0xff] }
 0x2a2   : > { %v1157_v3 = vadd.f32 %v1156_v21, %v1155_v25  ;;  %v1473_v21 = vld [vmem:[%s4073_s26 + $0x100] sm:$0xff]  ;;  %v4688_v62 = vpack.c.bf16 %v1496_v54, %v1492_v44  ;;  %v4690_v50 = vpack.c.bf16 %v1493_v61, %v1489_v55  ;;  %v4715_v4 = vpack.c.bf16 %v1503_v60, %v1499_v58 }
 0x2a3   : > { %v1477_v25 = vld [vmem:[%s4073_s26 + $0x120] sm:$0xff] }
 0x2a4   : > { %v4552_v7 = vmul.f32 %v1161_v5, %v1157_v3  ;;  %v4650_v3 = vpack.c.bf16 %v1477_v25, %v1473_v21  ;;  %v1178_v12 = vld [vmem:[%s1177_s12] sm:$0xff] }
 0x2a6   : > { %3630 = vtanh.f32 %v4552_v7 }
 0x2b0   : > { %v3631_v48 = vpop.eup %3630 }
 0x2b1   : > { %v1165_v9 = vmul.f32 %v3631_v48, %v3629_v8  ;;  %v1479_v8 = vld [vmem:[%s4073_s26 + $0x130] sm:$0xff] }
 0x2b3   : > { %v1166_v10 = vmul.f32 %v1165_v9, %v1161_v5  ;;  %v1475_v5 = vld [vmem:[%s4073_s26 + $0x110] sm:$0xff]  ;;  %v1482_v9 = vld [vmem:[%s4073_s26 + $0x148] sm:$0xff] }
 0x2b4   : > { %v4655_v48 = vpack.c.bf16 %v1479_v8, %v1475_v5  ;;  %v1179_v5 = vld [vmem:[%s1177_s12 + $0x8] sm:$0xff] }
 0x2b5   : > { %1170 = vst [vmem:[%s1169_s27] sm:$0xff] %v1166_v10  ;;  %1312 = vmatmul.mubr.f32.vlgmr.msra.gmra.mrb[20].mxu0 %v1166_v10  ;;  %1383 = vmatmul.mubr.f32.vlgmr.msra.gmra.mrb[20].mxu1 %v1166_v10  ;;  %v1486_v10 = vld [vmem:[%s4073_s26 + $0x168] sm:$0xff]  ;;  %s1951_s27 = scalar_lea.vmem [#allocation2], %s2961_s14 }
 0x2b6   : > { %1569 = vmatprep.mubr.f32.mxu0 %v3864_v0  ;;  %1640 = vmatprep.mubr.f32.mxu1 %v3864_v0  ;;  %v4663_v39 = vpack.c.bf16 %v1486_v10, %v1482_v9 }
 0x2b7   : > { %3223 = vmatpush1.bf16.msra.mxu0 %v4570_v24  ;;  %3255 = vmatpush1.bf16.msra.mxu1 %v4575_v33 }
 0x2b8   : > { %3225 = vmatprep.subr.bf16.mxu0 %v4583_v37  ;;  %3257 = vmatprep.subr.bf16.mxu1 %v4588_v46 }
 0x2bb   : > { %3227 = vmatpush1.bf16.msra.mxu0 %v4590_v53  ;;  %3259 = vmatpush1.bf16.msra.mxu1 %v4595_v57 }
 0x2bc   : > { %3229 = vmatprep.subr.bf16.mxu0 %v4603_v51  ;;  %3261 = vmatprep.subr.bf16.mxu1 %v4608_v1 }
 0x2bf   : > { %3231 = vmatpush1.bf16.msra.mxu0 %v4610_v2  ;;  %3263 = vmatpush1.bf16.msra.mxu1 %v4615_v14 }
 0x2c0   : > { %3233 = vmatprep.subr.bf16.mxu0 %v4623_v27  ;;  %3265 = vmatprep.subr.bf16.mxu1 %v4628_v41 }
 0x2c3   : > { %3235 = vmatpush1.bf16.msra.mxu0 %v4630_v43  ;;  %3267 = vmatpush1.bf16.msra.mxu1 %v4635_v59 }
 0x2c4   : > { %3237 = vmatprep.subr.bf16.mxu0 %v4643_v16  ;;  %3269 = vmatprep.subr.bf16.mxu1 %v4648_v29 }
 0x2c7   : > { %3239 = vmatpush1.bf16.msra.mxu0 %v4650_v3  ;;  %3271 = vmatpush1.bf16.msra.mxu1 %v4655_v48 }
 0x2c8   : > { %3241 = vmatprep.subr.bf16.mxu0 %v4663_v39  ;;  %3273 = vmatprep.subr.bf16.mxu1 %v4668_v22 }
 0x2cb   : > { %3243 = vmatpush1.bf16.msra.mxu0 %v4670_v30  ;;  %3275 = vmatpush1.bf16.msra.mxu1 %v4675_v35 }
 0x2cc   : > { %3245 = vmatprep.subr.bf16.mxu0 %v4683_v45  ;;  %3277 = vmatprep.subr.bf16.mxu1 %v4688_v62 }
 0x2cf   : > { %3247 = vmatpush1.bf16.msra.mxu0 %v4690_v50  ;;  %3279 = vmatpush1.bf16.msra.mxu1 %v4695_v63 }
 0x2d0   : > { %3249 = vmatprep.subr.bf16.mxu0 %v4703_v19  ;;  %3281 = vmatprep.subr.bf16.mxu1 %v4708_v40 }
 0x2d3   : > { %3251 = vmatpush1.bf16.msra.mxu0 %v4710_v47  ;;  %3283 = vmatpush1.bf16.msra.mxu1 %v4715_v4 }
 0x2d4   : > { %3285 = vmatprep.subr.bf16.mxu0 %v4563_v49  ;;  %3317 = vmatprep.subr.bf16.mxu1 %v4568_v23 }
 0x388   : > { %v1313_v17 = vpop.f32.mrb[20].mxu0  ;;  %v1384_v21 = vpop.f32.mrb[20].mxu1 }
 0x389   : > { %v1389_v25 = vadd.f32 %v1313_v17, %v1178_v12  ;;  %v1315_v8 = vpop.f32.mrb[21].mxu0  ;;  %v1386_v9 = vpop.f32.mrb[21].mxu1  ;;  %v1391_v34 = vadd.f32 %v1384_v21, %v1180_v31  ;;  %v1439_v31 = vld [vmem:[%s1435_s7 + $0x18] sm:$0xff] }
 0x38a   : > { %v1390_v10 = vadd.f32 %v1315_v8, %v1179_v5  ;;  %v1392_v42 = vadd.f32 %v1386_v9, %v1181_v20  ;;  %v1437_v9 = vld [vmem:[%s1435_s7 + $0x8] sm:$0xff] }
 0x38b   : > { %v2917_v11 = vmul.f32 -1.442695, %v1389_v25 }
 0x38c   : > { %v2918_v18 = vmul.f32 -1.442695, %v1390_v10  ;;  %v2919_v36 = vmul.f32 -1.442695, %v1392_v42 }
 0x38d   : > { %3632 = vpow2.f32 %v2917_v11 }
 0x38e   : > { %3634 = vpow2.f32 %v2918_v18 }
 0x38f   : > { %3636 = vtanh.f32 %v1391_v34 }
 0x390   : > { %3638 = vpow2.f32 %v2919_v36  ;;  %v1438_v36 = vld [vmem:[%s1435_s7 + $0x10] sm:$0xff] }
 0x397   : > { %v3633_v38 = vpop.eup %3632 }
 0x398   : > { %v3635_v44 = vpop.eup %3634  ;;  %v1396_v54 = vadd.f32 1.0, %v3633_v38 }
 0x399   : > { %v1402_v55 = vadd.f32 1.0, %v3635_v44  ;;  %v3637_v61 = vpop.eup %3636 }
 0x39a   : > { %3640 = vrcp.f32 %v1396_v54  ;;  %v3639_v52 = vpop.eup %3638 }
 0x39b   : > { %3642 = vrcp.f32 %v1402_v55  ;;  %v1409_v26 = vadd.f32 1.0, %v3639_v52 }
 0x39d   : > { %3644 = vrcp.f32 %v1409_v26 }
 0x3a4   : > { %v3641_v56 = vpop.eup %3640 }
 0x3a5   : > { %v3643_v6 = vpop.eup %3642  ;;  %v1414_v13 = vmul.f32 %v3641_v56, %v3637_v61 }
 0x3a6   : > { %v1413_v15 = vmul.f32 %v3643_v6, %v4552_v7  ;;  %v1436_v7 = vld [vmem:[%s1435_s7] sm:$0xff]  ;;  %s2732_s7 = sshll.u32 %s4473_s23, 4  ;;  %s4936_s7 = int_to_ptr.vmem [resolvable:$true] %s2732_s7 }
 0x3a7   : > { %v3645_v60 = vpop.eup %3644 }
 0x3a8   : > { %v1415_v28 = vadd.f32 %v1414_v13, %v1413_v15 }
 0x3aa   : > { %v4724_v58 = vmul.f32 %v1419_v32, %v1415_v28 }
 0x3ac   : > { %3646 = vtanh.f32 %v4724_v58 }
 0x3b6   : > { %v3647_v12 = vpop.eup %3646 }
 0x3b7   : > { %v1423_v17 = vmul.f32 %v3647_v12, %v3645_v60  ;;  %v1677_v12 = vpop.permute.xlu1 %1676 }
 0x3b9   : > { %v1424_v21 = vmul.f32 %v1423_v17, %v1419_v32 }
 0x3bb   : > { %1428 = vst [vmem:[%s1427_s9] sm:$0xff] %v1424_v21  ;;  %1570 = vmatmul.mubr.f32.vlgmr.msra.gmra.mrb[22].mxu0 %v1424_v21  ;;  %1641 = vmatmul.mubr.f32.vlgmr.msra.gmra.mrb[22].mxu1 %v1424_v21  ;;  %s2963_s9 = sshll.u32 %s4537_s3, 5  ;;  %s3866_s3 = smov [#allocation10]  }
 0x3bc   : > { %3287 = vmatpush1.bf16.msra.mxu0 %v4570_v24  ;;  %3319 = vmatpush1.bf16.msra.mxu1 %v4575_v33  ;;  %s2467_s13 = scalar_lea.vmem [#allocation2], %s2963_s9 }
 0x3bd   : > { %3289 = vmatprep.subr.bf16.mxu0 %v4583_v37  ;;  %3321 = vmatprep.subr.bf16.mxu1 %v4588_v46 }
 0x3be   : > { %1827 = vmatprep.mubr.f32.mxu0 %v3864_v0  ;;  %1898 = vmatprep.mubr.f32.mxu1 %v3864_v0 }
 0x3c0   : > { %3291 = vmatpush1.bf16.msra.mxu0 %v4590_v53  ;;  %3323 = vmatpush1.bf16.msra.mxu1 %v4595_v57 }
 0x3c1   : > { %3293 = vmatprep.subr.bf16.mxu0 %v4603_v51  ;;  %3325 = vmatprep.subr.bf16.mxu1 %v4608_v1 }
 0x3c4   : > { %3295 = vmatpush1.bf16.msra.mxu0 %v4610_v2  ;;  %3327 = vmatpush1.bf16.msra.mxu1 %v4615_v14 }
 0x3c5   : > { %3297 = vmatprep.subr.bf16.mxu0 %v4623_v27  ;;  %3329 = vmatprep.subr.bf16.mxu1 %v4628_v41 }
 0x3c8   : > { %3299 = vmatpush1.bf16.msra.mxu0 %v4630_v43  ;;  %3331 = vmatpush1.bf16.msra.mxu1 %v4635_v59 }
 0x3c9   : > { %3301 = vmatprep.subr.bf16.mxu0 %v4643_v16  ;;  %3333 = vmatprep.subr.bf16.mxu1 %v4648_v29 }
 0x3cc   : > { %3303 = vmatpush1.bf16.msra.mxu0 %v4650_v3  ;;  %3335 = vmatpush1.bf16.msra.mxu1 %v4655_v48 }
 0x3cd   : > { %3305 = vmatprep.subr.bf16.mxu0 %v4663_v39  ;;  %3337 = vmatprep.subr.bf16.mxu1 %v4668_v22 }
 0x3d0   : > { %3307 = vmatpush1.bf16.msra.mxu0 %v4670_v30  ;;  %3339 = vmatpush1.bf16.msra.mxu1 %v4675_v35 }
 0x3d1   : > { %3309 = vmatprep.subr.bf16.mxu0 %v4683_v45  ;;  %3341 = vmatprep.subr.bf16.mxu1 %v4688_v62 }
 0x3d4   : > { %3311 = vmatpush1.bf16.msra.mxu0 %v4690_v50  ;;  %3343 = vmatpush1.bf16.msra.mxu1 %v4695_v63 }
 0x3d5   : > { %3313 = vmatprep.subr.bf16.mxu0 %v4703_v19  ;;  %3345 = vmatprep.subr.bf16.mxu1 %v4708_v40 }
 0x3d8   : > { %3315 = vmatpush1.bf16.msra.mxu0 %v4710_v47  ;;  %3347 = vmatpush1.bf16.msra.mxu1 %v4715_v4 }
 0x3d9   : > { %3349 = vmatprep.subr.bf16.mxu0 %v4563_v49  ;;  %3381 = vmatprep.subr.bf16.mxu1 %v4568_v23 }
 0x48e   : > { %v1571_v25 = vpop.f32.mrb[22].mxu0  ;;  %v1642_v5 = vpop.f32.mrb[22].mxu1 }
 0x48f   : > { %v1647_v8 = vadd.f32 %v1571_v25, %v1436_v7  ;;  %v1573_v10 = vpop.f32.mrb[23].mxu0  ;;  %v1644_v11 = vpop.f32.mrb[23].mxu1  ;;  %v1649_v38 = vadd.f32 %v1642_v5, %v1438_v36  ;;  %v1697_v36 = vld [vmem:[%s1693_s25 + $0x18] sm:$0xff] }
 0x490   : > { %v1648_v18 = vadd.f32 %v1573_v10, %v1437_v9  ;;  %v1650_v34 = vadd.f32 %v1644_v11, %v1439_v31  ;;  %v1695_v11 = vld [vmem:[%s1693_s25 + $0x8] sm:$0xff] }
 0x491   : > { %v2923_v20 = vmul.f32 -1.442695, %v1647_v8 }
 0x492   : > { %v2924_v42 = vmul.f32 -1.442695, %v1648_v18  ;;  %v2925_v44 = vmul.f32 -1.442695, %v1650_v34 }
 0x493   : > { %3648 = vpow2.f32 %v2923_v20 }
 0x494   : > { %3650 = vpow2.f32 %v2924_v42 }
 0x495   : > { %3652 = vtanh.f32 %v1649_v38 }
 0x496   : > { %3654 = vpow2.f32 %v2925_v44  ;;  %v1696_v44 = vld [vmem:[%s1693_s25 + $0x10] sm:$0xff] }
 0x49d   : > { %v3649_v54 = vpop.eup %3648 }
 0x49e   : > { %v3651_v55 = vpop.eup %3650  ;;  %v1654_v61 = vadd.f32 1.0, %v3649_v54 }
 0x49f   : > { %v1660_v52 = vadd.f32 1.0, %v3651_v55  ;;  %v3653_v56 = vpop.eup %3652 }
 0x4a0   : > { %3656 = vrcp.f32 %v1654_v61  ;;  %v3655_v6 = vpop.eup %3654 }
 0x4a1   : > { %3658 = vrcp.f32 %v1660_v52  ;;  %v1667_v32 = vadd.f32 1.0, %v3655_v6 }
 0x4a3   : > { %3660 = vrcp.f32 %v1667_v32 }
 0x4aa   : > { %v3657_v13 = vpop.eup %3656 }
 0x4ab   : > { %v3659_v15 = vpop.eup %3658  ;;  %v1672_v26 = vmul.f32 %v3657_v13, %v3653_v56 }
 0x4ac   : > { %v1671_v28 = vmul.f32 %v3659_v15, %v4724_v58  ;;  %v1694_v58 = vld [vmem:[%s1693_s25] sm:$0xff] }
 0x4ad   : > { %v3661_v21 = vpop.eup %3660 }
 0x4ae   : > { %v1673_v60 = vadd.f32 %v1672_v26, %v1671_v28 }
 0x4b0   : > { %v4766_v17 = vmul.f32 %v1677_v12, %v1673_v60 }
 0x4b2   : > { %3662 = vtanh.f32 %v4766_v17 }
 0x4bc   : > { %v3663_v7 = vpop.eup %3662 }
 0x4bd   : > { %v1681_v25 = vmul.f32 %v3663_v7, %v3661_v21 }
 0x4bf   : > { %v1682_v5 = vmul.f32 %v1681_v25, %v1677_v12  ;;  %v1935_v12 = vpop.permute.xlu0 %1934 }
 0x4c1   : > { %1686 = vst [vmem:[%s1685_s17] sm:$0xff] %v1682_v5  ;;  %1828 = vmatmul.mubr.f32.vlgmr.msra.gmra.mrb[24].mxu0 %v1682_v5  ;;  %1899 = vmatmul.mubr.f32.vlgmr.msra.gmra.mrb[24].mxu1 %v1682_v5 }
 0x4c2   : > { %3351 = vmatpush1.bf16.msra.mxu0 %v4570_v24  ;;  %3383 = vmatpush1.bf16.msra.mxu1 %v4575_v33 }
 0x4c3   : > { %3353 = vmatprep.subr.bf16.mxu0 %v4583_v37  ;;  %3385 = vmatprep.subr.bf16.mxu1 %v4588_v46 }
 0x4c4   : > { %2085 = vmatprep.mubr.f32.mxu0 %v3864_v0  ;;  %2156 = vmatprep.mubr.f32.mxu1 %v3864_v0 }
 0x4c6   : > { %3355 = vmatpush1.bf16.msra.mxu0 %v4590_v53  ;;  %3387 = vmatpush1.bf16.msra.mxu1 %v4595_v57 }
 0x4c7   : > { %3357 = vmatprep.subr.bf16.mxu0 %v4603_v51  ;;  %3389 = vmatprep.subr.bf16.mxu1 %v4608_v1 }
 0x4ca   : > { %3359 = vmatpush1.bf16.msra.mxu0 %v4610_v2  ;;  %3391 = vmatpush1.bf16.msra.mxu1 %v4615_v14 }
 0x4cb   : > { %3361 = vmatprep.subr.bf16.mxu0 %v4623_v27  ;;  %3393 = vmatprep.subr.bf16.mxu1 %v4628_v41 }
 0x4ce   : > { %3363 = vmatpush1.bf16.msra.mxu0 %v4630_v43  ;;  %3395 = vmatpush1.bf16.msra.mxu1 %v4635_v59 }
 0x4cf   : > { %3365 = vmatprep.subr.bf16.mxu0 %v4643_v16  ;;  %3397 = vmatprep.subr.bf16.mxu1 %v4648_v29 }
 0x4d2   : > { %3367 = vmatpush1.bf16.msra.mxu0 %v4650_v3  ;;  %3399 = vmatpush1.bf16.msra.mxu1 %v4655_v48 }
 0x4d3   : > { %3369 = vmatprep.subr.bf16.mxu0 %v4663_v39  ;;  %3401 = vmatprep.subr.bf16.mxu1 %v4668_v22 }
 0x4d6   : > { %3371 = vmatpush1.bf16.msra.mxu0 %v4670_v30  ;;  %3403 = vmatpush1.bf16.msra.mxu1 %v4675_v35 }
 0x4d7   : > { %3373 = vmatprep.subr.bf16.mxu0 %v4683_v45  ;;  %3405 = vmatprep.subr.bf16.mxu1 %v4688_v62 }
 0x4da   : > { %3375 = vmatpush1.bf16.msra.mxu0 %v4690_v50  ;;  %3407 = vmatpush1.bf16.msra.mxu1 %v4695_v63 }
 0x4db   : > { %3377 = vmatprep.subr.bf16.mxu0 %v4703_v19  ;;  %3409 = vmatprep.subr.bf16.mxu1 %v4708_v40 }
 0x4de   : > { %3379 = vmatpush1.bf16.msra.mxu0 %v4710_v47  ;;  %3411 = vmatpush1.bf16.msra.mxu1 %v4715_v4 }
 0x4df   : > { %3413 = vmatprep.subr.bf16.mxu0 %v4563_v49  ;;  %3445 = vmatprep.subr.bf16.mxu1 %v4568_v23 }
 0x594   : > { %v1829_v8 = vpop.f32.mrb[24].mxu0  ;;  %v1900_v9 = vpop.f32.mrb[24].mxu1 }
 0x595   : > { %v1905_v10 = vadd.f32 %v1829_v8, %v1694_v58  ;;  %v1831_v18 = vpop.f32.mrb[25].mxu0  ;;  %v1902_v20 = vpop.f32.mrb[25].mxu1  ;;  %v1907_v49 = vadd.f32 %v1900_v9, %v1696_v44  ;;  %v2475_v44 = vld [vmem:[%s4073_s26 + $0x10] sm:$0xff] }
 0x596   : > { %v1906_v42 = vadd.f32 %v1831_v18, %v1695_v11  ;;  %v1908_v38 = vadd.f32 %v1902_v20, %v1697_v36  ;;  %v2478_v11 = vld [vmem:[%s4073_s26 + $0x28] sm:$0xff]  ;;  %v2476_v18 = vld [vmem:[%s4073_s26 + $0x18] sm:$0xff] }
 0x597   : > { %v2929_v31 = vmul.f32 -1.442695, %v1905_v10  ;;  %v2474_v10 = vld [vmem:[%s4073_s26 + $0x8] sm:$0xff] }
 0x598   : > { %v2930_v34 = vmul.f32 -1.442695, %v1906_v42  ;;  %v2931_v54 = vmul.f32 -1.442695, %v1908_v38  ;;  %v3476_v20 = vpack.c.bf16 %v2478_v11, %v2474_v10  ;;  %v2480_v42 = vld [vmem:[%s4073_s26 + $0x38] sm:$0xff] }
 0x599   : > { %3664 = vpow2.f32 %v2929_v31  ;;  %v2473_v31 = vld [vmem:[%s4073_s26] sm:$0xff]  ;;  %v3508_v36 = vpack.c.bf16 %v2480_v42, %v2476_v18  ;;  %v2520_v10 = vld [vmem:[%s4073_s26 + $0x178] sm:$0xff] }
 0x59a   : > { %3666 = vpow2.f32 %v2930_v34  ;;  %v2477_v34 = vld [vmem:[%s4073_s26 + $0x20] sm:$0xff] }
 0x59b   : > { %3668 = vtanh.f32 %v1907_v49  ;;  %v3478_v38 = vpack.c.bf16 %v2477_v34, %v2473_v31  ;;  %v2479_v49 = vld [vmem:[%s4073_s26 + $0x30] sm:$0xff]  ;;  %v2517_v42 = vld [vmem:[%s4073_s26 + $0x160] sm:$0xff] }
 0x59c   : > { %3670 = vpow2.f32 %v2931_v54  ;;  %v2482_v54 = vld [vmem:[%s4073_s26 + $0x48] sm:$0xff]  ;;  %v2515_v31 = vld [vmem:[%s4073_s26 + $0x150] sm:$0xff] }
 0x5a3   : > { %v3665_v23 = vpop.eup %3664 }
 0x5a4   : > { %v3667_v55 = vpop.eup %3666  ;;  %v1912_v61 = vadd.f32 1.0, %v3665_v23  ;;  %v2486_v23 = vld [vmem:[%s4073_s26 + $0x68] sm:$0xff] }
 0x5a5   : > { %v1918_v52 = vadd.f32 1.0, %v3667_v55  ;;  %v3669_v56 = vpop.eup %3668  ;;  %v2484_v55 = vld [vmem:[%s4073_s26 + $0x58] sm:$0xff] }
 0x5a6   : > { %3672 = vrcp.f32 %v1912_v61  ;;  %v3671_v6 = vpop.eup %3670  ;;  %v3480_v61 = vpack.c.bf16 %v2486_v23, %v2482_v54  ;;  %v2524_v54 = vld [vmem:[%s4073_s26 + $0x198] sm:$0xff] }
 0x5a7   : > { %3674 = vrcp.f32 %v1918_v52  ;;  %v1925_v32 = vadd.f32 1.0, %v3671_v6  ;;  %v2488_v52 = vld [vmem:[%s4073_s26 + $0x78] sm:$0xff]  ;;  %v2485_v6 = vld [vmem:[%s4073_s26 + $0x60] sm:$0xff] }
 0x5a8   : > { %v2528_v23 = vld [vmem:[%s4073_s26 + $0x1b8] sm:$0xff] }
 0x5a9   : > { %3676 = vrcp.f32 %v1925_v32 }
 0x5b0   : > { %v3673_v13 = vpop.eup %3672 }
 0x5b1   : > { %v3675_v15 = vpop.eup %3674  ;;  %v1930_v26 = vmul.f32 %v3673_v13, %v3669_v56  ;;  %v2481_v56 = vld [vmem:[%s4073_s26 + $0x40] sm:$0xff]  ;;  %v3512_v13 = vpack.c.bf16 %v2488_v52, %v2484_v55 }
 0x5b2   : > { %v1929_v28 = vmul.f32 %v3675_v15, %v4766_v17  ;;  %v3482_v15 = vpack.c.bf16 %v2485_v6, %v2481_v56  ;;  %v2521_v55 = vld [vmem:[%s4073_s26 + $0x180] sm:$0xff]  ;;  %v2523_v56 = vld [vmem:[%s4073_s26 + $0x190] sm:$0xff] }
 0x5b3   : > { %v3677_v7 = vpop.eup %3676  ;;  %v2525_v52 = vld [vmem:[%s4073_s26 + $0x1a0] sm:$0xff]  ;;  %v2527_v6 = vld [vmem:[%s4073_s26 + $0x1b0] sm:$0xff] }
 0x5b4   : > { %v1931_v60 = vadd.f32 %v1930_v26, %v1929_v28  ;;  %v2483_v26 = vld [vmem:[%s4073_s26 + $0x50] sm:$0xff] }
 0x5b5   : > { %v2487_v28 = vld [vmem:[%s4073_s26 + $0x70] sm:$0xff] }
 0x5b6   : > { %v4808_v21 = vmul.f32 %v1935_v12, %v1931_v60  ;;  %v3514_v32 = vpack.c.bf16 %v2487_v28, %v2483_v26  ;;  %v2490_v60 = vld [vmem:[%s4073_s26 + $0x88] sm:$0xff]  ;;  %v2532_v28 = vld [vmem:[%s4073_s26 + $0x1d8] sm:$0xff] }
 0x5b7   : > { %v2534_v26 = vld [vmem:[%s4073_s26 + $0x1e8] sm:$0xff] }
 0x5b8   : > { %3678 = vtanh.f32 %v4808_v21 }
 0x5c2   : > { %v3679_v25 = vpop.eup %3678 }
 0x5c3   : > { %v1939_v5 = vmul.f32 %v3679_v25, %v3677_v7  ;;  %v2496_v25 = vld [vmem:[%s4073_s26 + $0xb8] sm:$0xff] }
 0x5c5   : > { %v1940_v58 = vmul.f32 %v1939_v5, %v1935_v12  ;;  %v2494_v12 = vld [vmem:[%s4073_s26 + $0xa8] sm:$0xff]  ;;  %v2489_v5 = vld [vmem:[%s4073_s26 + $0x80] sm:$0xff] }
 0x5c6   : > { %v3484_v7 = vpack.c.bf16 %v2494_v12, %v2490_v60  ;;  %v2536_v12 = vld [vmem:[%s4073_s26 + $0x1f8] sm:$0xff] }
 0x5c7   : > { %1944 = vst [vmem:[%s1943_s4] sm:$0xff] %v1940_v58  ;;  %2086 = vmatmul.mubr.f32.vlgmr.msra.gmra.mrb[26].mxu0 %v1940_v58  ;;  %2157 = vmatmul.mubr.f32.vlgmr.msra.gmra.mrb[26].mxu1 %v1940_v58  ;;  %v2493_v58 = vld [vmem:[%s4073_s26 + $0xa0] sm:$0xff] }
 0x5c8   : > { %3415 = vmatpush1.bf16.msra.mxu0 %v4570_v24  ;;  %3447 = vmatpush1.bf16.msra.mxu1 %v4575_v33  ;;  %v1952_v24 = vld [vmem:[%s1951_s27] sm:$0xff] }
 0x5c9   : > { %3417 = vmatprep.subr.bf16.mxu0 %v4583_v37  ;;  %3449 = vmatprep.subr.bf16.mxu1 %v4588_v46 }
 0x5ca   : > { %2343 = vmatprep.mubr.f32.mxu0 %v3864_v0  ;;  %2414 = vmatprep.mubr.f32.mxu1 %v3864_v0 }
 0x5cc   : > { %3419 = vmatpush1.bf16.msra.mxu0 %v4590_v53  ;;  %3451 = vmatpush1.bf16.msra.mxu1 %v4595_v57  ;;  %v1953_v53 = vld [vmem:[%s1951_s27 + $0x8] sm:$0xff] }
 0x5cd   : > { %3421 = vmatprep.subr.bf16.mxu0 %v4603_v51  ;;  %3453 = vmatprep.subr.bf16.mxu1 %v4608_v1 }
 0x5d0   : > { %3423 = vmatpush1.bf16.msra.mxu0 %v4610_v2  ;;  %3455 = vmatpush1.bf16.msra.mxu1 %v4615_v14 }
 0x5d1   : > { %3425 = vmatprep.subr.bf16.mxu0 %v4623_v27  ;;  %3457 = vmatprep.subr.bf16.mxu1 %v4628_v41  ;;  %v1955_v27 = vld [vmem:[%s1951_s27 + $0x18] sm:$0xff] }
 0x5d4   : > { %3427 = vmatpush1.bf16.msra.mxu0 %v4630_v43  ;;  %3459 = vmatpush1.bf16.msra.mxu1 %v4635_v59  ;;  %v1954_v43 = vld [vmem:[%s1951_s27 + $0x10] sm:$0xff] }
 0x5d5   : > { %3429 = vmatprep.subr.bf16.mxu0 %v4643_v16  ;;  %3461 = vmatprep.subr.bf16.mxu1 %v4648_v29 }
 0x5d8   : > { %3431 = vmatpush1.bf16.msra.mxu0 %v4650_v3  ;;  %3463 = vmatpush1.bf16.msra.mxu1 %v4655_v48 }
 0x5d9   : > { %3433 = vmatprep.subr.bf16.mxu0 %v4663_v39  ;;  %3465 = vmatprep.subr.bf16.mxu1 %v4668_v22 }
 0x5dc   : > { %3435 = vmatpush1.bf16.msra.mxu0 %v4670_v30  ;;  %3467 = vmatpush1.bf16.msra.mxu1 %v4675_v35 }
 0x5dd   : > { %3437 = vmatprep.subr.bf16.mxu0 %v4683_v45  ;;  %3469 = vmatprep.subr.bf16.mxu1 %v4688_v62 }
 0x5e0   : > { %3439 = vmatpush1.bf16.msra.mxu0 %v4690_v50  ;;  %3471 = vmatpush1.bf16.msra.mxu1 %v4695_v63 }
 0x5e1   : > { %3441 = vmatprep.subr.bf16.mxu0 %v4703_v19  ;;  %3473 = vmatprep.subr.bf16.mxu1 %v4708_v40  ;;  %v2193_v40 = vpop.permute.xlu1 %2192 }
 0x5e4   : > { %3443 = vmatpush1.bf16.msra.mxu0 %v4710_v47  ;;  %3475 = vmatpush1.bf16.msra.mxu1 %v4715_v4 }
 0x5e5   : > { %3477 = vmatprep.subr.bf16.mxu0 %v3476_v20  ;;  %3509 = vmatprep.subr.bf16.mxu1 %v3508_v36  ;;  %v2513_v20 = vld [vmem:[%s4073_s26 + $0x140] sm:$0xff]  ;;  %v2519_v36 = vld [vmem:[%s4073_s26 + $0x170] sm:$0xff] }
 0x5e6   : > { %v3498_v34 = vpack.c.bf16 %v2517_v42, %v2513_v20  ;;  %v2468_v20 = vld [vmem:[%s2467_s13] sm:$0xff] }
 0x69a   : > { %v2087_v33 = vpop.f32.mrb[26].mxu0  ;;  %v2158_v37 = vpop.f32.mrb[26].mxu1 }
 0x69b   : > { %v2163_v46 = vadd.f32 %v2087_v33, %v1952_v24  ;;  %v2089_v57 = vpop.f32.mrb[27].mxu0  ;;  %v2160_v51 = vpop.f32.mrb[27].mxu1  ;;  %v2165_v59 = vadd.f32 %v2158_v37, %v1954_v43  ;;  %v3486_v33 = vpack.c.bf16 %v2493_v58, %v2489_v5  ;;  %v2491_v37 = vld [vmem:[%s4073_s26 + $0x90] sm:$0xff] }
 0x69c   : > { %v2164_v1 = vadd.f32 %v2089_v57, %v1953_v53  ;;  %v2166_v41 = vadd.f32 %v2160_v51, %v1955_v27  ;;  %v2498_v57 = vld [vmem:[%s4073_s26 + $0xc8] sm:$0xff]  ;;  %v2497_v27 = vld [vmem:[%s4073_s26 + $0xc0] sm:$0xff]  ;;  %v2531_v5 = vld [vmem:[%s4073_s26 + $0x1d0] sm:$0xff] }
 0x69d   : > { %v2935_v2 = vmul.f32 -1.442695, %v2163_v46  ;;  %v2495_v46 = vld [vmem:[%s4073_s26 + $0xb0] sm:$0xff]  ;;  %v2502_v51 = vld [vmem:[%s4073_s26 + $0xe8] sm:$0xff] }
 0x69e   : > { %v2936_v14 = vmul.f32 -1.442695, %v2164_v1  ;;  %v2937_v16 = vmul.f32 -1.442695, %v2166_v41  ;;  %v3518_v53 = vpack.c.bf16 %v2495_v46, %v2491_v37  ;;  %v2500_v1 = vld [vmem:[%s4073_s26 + $0xd8] sm:$0xff]  ;;  %v2501_v41 = vld [vmem:[%s4073_s26 + $0xe0] sm:$0xff] }
 0x69f   : > { %3680 = vpow2.f32 %v2935_v2  ;;  %v3488_v2 = vpack.c.bf16 %v2502_v51, %v2498_v57  ;;  %v2535_v58 = vld [vmem:[%s4073_s26 + $0x1f0] sm:$0xff]  ;;  %v2210_v37 = vld [vmem:[%s2209_s11] sm:$0xff]  ;;  %v2211_v51 = vld [vmem:[%s2209_s11 + $0x8] sm:$0xff] }
 0x6a0   : > { %3682 = vpow2.f32 %v2936_v14  ;;  %v2504_v14 = vld [vmem:[%s4073_s26 + $0xf8] sm:$0xff] }
 0x6a1   : > { %3684 = vtanh.f32 %v2165_v59  ;;  %v3520_v43 = vpack.c.bf16 %v2504_v14, %v2500_v1  ;;  %v3490_v59 = vpack.c.bf16 %v2501_v41, %v2497_v27 }
 0x6a2   : > { %3686 = vpow2.f32 %v2937_v16  ;;  %v2499_v16 = vld [vmem:[%s4073_s26 + $0xd0] sm:$0xff] }
 0x6a9   : > { %v3681_v29 = vpop.eup %3680 }
 0x6aa   : > { %v3683_v3 = vpop.eup %3682  ;;  %v2170_v48 = vadd.f32 1.0, %v3681_v29  ;;  %v2503_v29 = vld [vmem:[%s4073_s26 + $0xf0] sm:$0xff] }
 0x6ab   : > { %v2176_v39 = vadd.f32 1.0, %v3683_v3  ;;  %v3685_v22 = vpop.eup %3684  ;;  %v3522_v3 = vpack.c.bf16 %v2503_v29, %v2499_v16  ;;  %v2212_v16 = vld [vmem:[%s2209_s11 + $0x10] sm:$0xff] }
 0x6ac   : > { %3688 = vrcp.f32 %v2170_v48  ;;  %v3687_v30 = vpop.eup %3686  ;;  %v2506_v48 = vld [vmem:[%s4073_s26 + $0x108] sm:$0xff] }
 0x6ad   : > { %3690 = vrcp.f32 %v2176_v39  ;;  %v2183_v63 = vadd.f32 1.0, %v3687_v30  ;;  %v2510_v39 = vld [vmem:[%s4073_s26 + $0x128] sm:$0xff] }
 0x6ae   : > { %v3492_v30 = vpack.c.bf16 %v2510_v39, %v2506_v48 }
 0x6af   : > { %3692 = vrcp.f32 %v2183_v63 }
 0x6b6   : > { %v3689_v35 = vpop.eup %3688 }
 0x6b7   : > { %v3691_v45 = vpop.eup %3690  ;;  %v2188_v62 = vmul.f32 %v3689_v35, %v3685_v22  ;;  %v2508_v22 = vld [vmem:[%s4073_s26 + $0x118] sm:$0xff] }
 0x6b8   : > { %v2187_v50 = vmul.f32 %v3691_v45, %v4808_v21  ;;  %v2492_v21 = vld [vmem:[%s4073_s26 + $0x98] sm:$0xff]  ;;  %v2505_v45 = vld [vmem:[%s4073_s26 + $0x100] sm:$0xff] }
 0x6b9   : > { %v3693_v4 = vpop.eup %3692  ;;  %v3516_v24 = vpack.c.bf16 %v2496_v25, %v2492_v21  ;;  %v2512_v35 = vld [vmem:[%s4073_s26 + $0x138] sm:$0xff]  ;;  %v2529_v21 = vld [vmem:[%s4073_s26 + $0x1c0] sm:$0xff]  ;;  %v3536_v25 = vpack.c.bf16 %v2536_v12, %v2532_v28 }
 0x6ba   : > { %v2189_v19 = vadd.f32 %v2188_v62, %v2187_v50  ;;  %v2509_v62 = vld [vmem:[%s4073_s26 + $0x120] sm:$0xff]  ;;  %v3524_v50 = vpack.c.bf16 %v2512_v35, %v2508_v22 }
 0x6bb   : > { %v3494_v63 = vpack.c.bf16 %v2509_v62, %v2505_v45 }
 0x6bc   : > { %v4848_v47 = vmul.f32 %v2193_v40, %v2189_v19  ;;  %v2507_v19 = vld [vmem:[%s4073_s26 + $0x110] sm:$0xff] }
 0x6be   : > { %3694 = vtanh.f32 %v4848_v47 }
 0x6c8   : > { %v3695_v17 = vpop.eup %3694 }
 0x6c9   : > { %v2197_v8 = vmul.f32 %v3695_v17, %v3693_v4  ;;  %v2514_v4 = vld [vmem:[%s4073_s26 + $0x148] sm:$0xff] }
 0x6cb   : > { %v2198_v9 = vmul.f32 %v2197_v8, %v2193_v40  ;;  %v2511_v40 = vld [vmem:[%s4073_s26 + $0x130] sm:$0xff]  ;;  %v2518_v8 = vld [vmem:[%s4073_s26 + $0x168] sm:$0xff] }
 0x6cc   : > { %v3526_v17 = vpack.c.bf16 %v2511_v40, %v2507_v19  ;;  %v3496_v11 = vpack.c.bf16 %v2518_v8, %v2514_v4 }
 0x6cd   : > { %2202 = vst [vmem:[%s2201_s28] sm:$0xff] %v2198_v9  ;;  %2344 = vmatmul.mubr.f32.vlgmr.msra.gmra.mrb[28].mxu0 %v2198_v9  ;;  %2415 = vmatmul.mubr.f32.vlgmr.msra.gmra.mrb[28].mxu1 %v2198_v9  ;;  %v2516_v9 = vld [vmem:[%s4073_s26 + $0x158] sm:$0xff] }
 0x6ce   : > { %2601 = vmatprep.mubr.f32.mxu0 %v3864_v0  ;;  %2672 = vmatprep.mubr.f32.mxu1 %v3864_v0  ;;  %v3510_v0 = vpack.c.bf16 %v2479_v49, %v2475_v44  ;;  %v3528_v18 = vpack.c.bf16 %v2520_v10, %v2516_v9  ;;  %v2526_v44 = vld [vmem:[%s4073_s26 + $0x1a8] sm:$0xff]  ;;  %v3530_v49 = vpack.c.bf16 %v2519_v36, %v2515_v31 }
 0x6cf   : > { %3479 = vmatpush1.bf16.msra.mxu0 %v3478_v38  ;;  %v2522_v38 = vld [vmem:[%s4073_s26 + $0x188] sm:$0xff] }
 0x6d0   : > { %3511 = vmatpush1.bf16.msra.mxu1 %v3510_v0  ;;  %3481 = vmatprep.subr.bf16.mxu0 %v3480_v61  ;;  %v3500_v0 = vpack.c.bf16 %v2526_v44, %v2522_v38  ;;  %v3532_v61 = vpack.c.bf16 %v2528_v23, %v2524_v54  ;;  %v2471_v54 = vld [vmem:[%s2467_s13 + $0x18] sm:$0xff] }
 0x6d1   : > { %3513 = vmatprep.subr.bf16.mxu1 %v3512_v13  ;;  %v3502_v13 = vpack.c.bf16 %v2525_v52, %v2521_v55  ;;  %v2470_v55 = vld [vmem:[%s2467_s13 + $0x10] sm:$0xff] }
 0x6d3   : > { %3483 = vmatpush1.bf16.msra.mxu0 %v3482_v15  ;;  %v2530_v15 = vld [vmem:[%s4073_s26 + $0x1c8] sm:$0xff] }
 0x6d4   : > { %3515 = vmatpush1.bf16.msra.mxu1 %v3514_v32  ;;  %3485 = vmatprep.subr.bf16.mxu0 %v3484_v7  ;;  %v3534_v32 = vpack.c.bf16 %v2527_v6, %v2523_v56  ;;  %v3504_v60 = vpack.c.bf16 %v2534_v26, %v2530_v15  ;;  %v2533_v7 = vld [vmem:[%s4073_s26 + $0x1e0] sm:$0xff]  ;;  %s5022_s26 = sshll.u32 %s4368_s29, 3  ;;  %s2951_s29 = sshll.u32 %s3921_s22, 7 }
 0x6d5   : > { %3517 = vmatprep.subr.bf16.mxu1 %v3516_v24  ;;  %v3506_v24 = vpack.c.bf16 %v2533_v7, %v2529_v21  ;;  %s2459_s12 = scalar_lea.vmem %s4473_s23, %s5022_s26 [#allocation10]  ;;  %s4934_s25 = scalar_lea.hbm %s4985_s5, %s2951_s29 }
 0x6d6   : > { %s3788_s22 = scalar_lea.vmem %s4936_s7, 1024  ;;  %s3792_s23 = sshll.u32 %s3866_s3, 4  ;;  %s3793_s23 = int_to_ptr.vmem [resolvable:$false] %s3792_s23 }
 0x6d7   : > { %3487 = vmatpush1.bf16.msra.mxu0 %v3486_v33  ;;  %v3538_v33 = vpack.c.bf16 %v2535_v58, %v2531_v5  ;;  %v2709_v5 = vpop.permute.xlu1 %2708  ;;  %p3789_p3 = scmp.ne.s32.totalorder %s4936_s7, %s3788_s22  ;;  %s3794_s8 = scalar_lea.vmem %s3793_s23, 2048 }
 0x6d8   : > { %3519 = vmatpush1.bf16.msra.mxu1 %v3518_v53  ;;  %3489 = vmatprep.subr.bf16.mxu0 %v3488_v2  ;;  %p3795_p6 = scmp.lt.s32.totalorder %s4936_s7, %s3793_s23  ;;  %p3796_p13 = scmp.lt.s32.totalorder %s3794_s8, %s3788_s22 }
 0x6d9   : > { %3521 = vmatprep.subr.bf16.mxu1 %v3520_v43  ;;  %v2213_v43 = vld [vmem:[%s2209_s11 + $0x18] sm:$0xff]  ;;  %p3790_p2 = pnand %p3789_p3, %p5023_p0 }
 0x6da   : > { %p3797_p1 = por %p3796_p13, %p3795_p6 }
 0x6db   : > { %3491 = vmatpush1.bf16.msra.mxu0 %v3490_v59  ;;  %p3791_p5 = pneg %p3790_p2 }
 0x6dc   : > { %3523 = vmatpush1.bf16.msra.mxu1 %v3522_v3  ;;  %3493 = vmatprep.subr.bf16.mxu0 %v3492_v30 }
 0x6dd   : > { %3525 = vmatprep.subr.bf16.mxu1 %v3524_v50  ;;  %p3798_p11 = pnand %p3797_p1, %p3791_p5 }
 0x6df   : > { %3495 = vmatpush1.bf16.msra.mxu0 %v3494_v63 }
 0x6e0   : > { %3527 = vmatpush1.bf16.msra.mxu1 %v3526_v17  ;;  %3497 = vmatprep.subr.bf16.mxu0 %v3496_v11  ;;  %v2451_v17 = vpop.permute.xlu0 %2450 }
 0x6e1   : > { %3529 = vmatprep.subr.bf16.mxu1 %v3528_v18 }
 0x6e3   : > { %3499 = vmatpush1.bf16.msra.mxu0 %v3498_v34  ;;  %v2469_v34 = vld [vmem:[%s2467_s13 + $0x8] sm:$0xff] }
 0x6e4   : > { %3531 = vmatpush1.bf16.msra.mxu1 %v3530_v49  ;;  %3501 = vmatprep.subr.bf16.mxu0 %v3500_v0 }
 0x6e5   : > { %3533 = vmatprep.subr.bf16.mxu1 %v3532_v61 }
 0x6e7   : > { %3503 = vmatpush1.bf16.msra.mxu0 %v3502_v13 }
 0x6e8   : > { %3535 = vmatpush1.bf16.msra.mxu1 %v3534_v32  ;;  %3505 = vmatprep.subr.bf16.mxu0 %v3504_v60 }
 0x6e9   : > { %3537 = vmatprep.subr.bf16.mxu1 %v3536_v25 }
 0x6eb   : > { %3507 = vmatpush1.bf16.msra.mxu0 %v3506_v24 }
 0x6ec   : > { %3539 = vmatpush1.bf16.msra.mxu1 %v3538_v33 }
 0x7a0   : > { %v2345_v46 = vpop.f32.mrb[28].mxu0  ;;  %v2416_v53 = vpop.f32.mrb[28].mxu1 }
 0x7a1   : > { %v2421_v57 = vadd.f32 %v2345_v46, %v2210_v37  ;;  %v2347_v1 = vpop.f32.mrb[29].mxu0  ;;  %v2418_v2 = vpop.f32.mrb[29].mxu1  ;;  %v2423_v29 = vadd.f32 %v2416_v53, %v2212_v16 }
 0x7a2   : > { %v2422_v14 = vadd.f32 %v2347_v1, %v2211_v51  ;;  %v2424_v59 = vadd.f32 %v2418_v2, %v2213_v43 }
 0x7a3   : > { %v2941_v27 = vmul.f32 -1.442695, %v2421_v57 }
 0x7a4   : > { %v2942_v41 = vmul.f32 -1.442695, %v2422_v14  ;;  %v2943_v3 = vmul.f32 -1.442695, %v2424_v59 }
 0x7a5   : > { %3696 = vpow2.f32 %v2941_v27 }
 0x7a6   : > { %3698 = vpow2.f32 %v2942_v41 }
 0x7a7   : > { %3700 = vtanh.f32 %v2423_v29 }
 0x7a8   : > { %3702 = vpow2.f32 %v2943_v3 }
 0x7af   : > { %v3697_v48 = vpop.eup %3696 }
 0x7b0   : > { %v3699_v39 = vpop.eup %3698  ;;  %v2428_v22 = vadd.f32 1.0, %v3697_v48 }
 0x7b1   : > { %v2434_v30 = vadd.f32 1.0, %v3699_v39  ;;  %v3701_v35 = vpop.eup %3700 }
 0x7b2   : > { %3704 = vrcp.f32 %v2428_v22  ;;  %v3703_v45 = vpop.eup %3702 }
 0x7b3   : > { %3706 = vrcp.f32 %v2434_v30  ;;  %v2441_v40 = vadd.f32 1.0, %v3703_v45 }
 0x7b5   : > { %3708 = vrcp.f32 %v2441_v40 }
 0x7bc   : > { %v3705_v62 = vpop.eup %3704 }
 0x7bd   : > { %v3707_v50 = vpop.eup %3706  ;;  %v2446_v63 = vmul.f32 %v3705_v62, %v3701_v35 }
 0x7be   : > { %v2445_v19 = vmul.f32 %v3707_v50, %v4848_v47 }
 0x7bf   : > { %v3709_v9 = vpop.eup %3708 }
 0x7c0   : > { %v2447_v4 = vadd.f32 %v2446_v63, %v2445_v19 }
 0x7c2   : > { %v2453_v8 = vmul.f32 %v2451_v17, %v2447_v4 }
 0x7c4   : > { %3710 = vtanh.f32 %v2453_v8 }
 0x7ce   : > { %v3711_v10 = vpop.eup %3710 }
 0x7cf   : > { %v2455_v11 = vmul.f32 %v3711_v10, %v3709_v9 }
 0x7d1   : > { %v2456_v18 = vmul.f32 %v2455_v11, %v2451_v17 }
 0x7d3   : > { %2460 = vst [vmem:[%s2459_s12] sm:$0xff] %v2456_v18  ;;  %2602 = vmatmul.mubr.f32.vlgmr.msra.gmra.mrb[30].mxu0 %v2456_v18  ;;  %2673 = vmatmul.mubr.f32.vlgmr.msra.gmra.mrb[30].mxu1 %v2456_v18 }
 0x8a6   : > { %v2603_v42 = vpop.f32.mrb[30].mxu0  ;;  %v2674_v47 = vpop.f32.mrb[30].mxu1 }
 0x8a7   : > { %v2679_v31 = vadd.f32 %v2603_v42, %v2468_v20  ;;  %v2605_v36 = vpop.f32.mrb[31].mxu0  ;;  %v2676_v38 = vpop.f32.mrb[31].mxu1  ;;  %v2681_v61 = vadd.f32 %v2674_v47, %v2470_v55 }
 0x8a8   : > { %v2680_v44 = vadd.f32 %v2605_v36, %v2469_v34  ;;  %v2682_v23 = vadd.f32 %v2676_v38, %v2471_v54 }
 0x8a9   : > { %v2947_v49 = vmul.f32 -1.442695, %v2679_v31 }
 0x8aa   : > { %v2948_v0 = vmul.f32 -1.442695, %v2680_v44  ;;  %v2949_v52 = vmul.f32 -1.442695, %v2682_v23 }
 0x8ab   : > { %3712 = vpow2.f32 %v2947_v49 }
 0x8ac   : > { %3714 = vpow2.f32 %v2948_v0 }
 0x8ad   : > { %3716 = vtanh.f32 %v2681_v61 }
 0x8ae   : > { %3718 = vpow2.f32 %v2949_v52 }
 0x8b5   : > { %v3713_v56 = vpop.eup %3712 }
 0x8b6   : > { %v3715_v6 = vpop.eup %3714  ;;  %v2686_v13 = vadd.f32 1.0, %v3713_v56 }
 0x8b7   : > { %v2692_v15 = vadd.f32 1.0, %v3715_v6  ;;  %v3717_v26 = vpop.eup %3716 }
 0x8b8   : > { %3720 = vrcp.f32 %v2686_v13  ;;  %v3719_v28 = vpop.eup %3718 }
 0x8b9   : > { %3722 = vrcp.f32 %v2692_v15  ;;  %v2699_v7 = vadd.f32 1.0, %v3719_v28 }
 0x8bb   : > { %3724 = vrcp.f32 %v2699_v7 }
 0x8c2   : > { %v3721_v32 = vpop.eup %3720 }
 0x8c3   : > { %v3723_v60 = vpop.eup %3722  ;;  %v2704_v12 = vmul.f32 %v3721_v32, %v3717_v26 }
 0x8c4   : > { %v2703_v21 = vmul.f32 %v3723_v60, %v2453_v8 }
 0x8c5   : > { %v3725_v24 = vpop.eup %3724 }
 0x8c6   : > { %v2705_v25 = vadd.f32 %v2704_v12, %v2703_v21 }
 0x8c8   : > { %v2711_v58 = vmul.f32 %v2709_v5, %v2705_v25 }
 0x8ca   : > { %3726 = vtanh.f32 %v2711_v58 }
 0x8d4   : > { %v3727_v33 = vpop.eup %3726 }
 0x8d5   : > { %v2713_v37 = vmul.f32 %v3727_v33, %v3725_v24 }
 0x8d7   : > { %v2714_v46 = vmul.f32 %v2713_v37, %v2709_v5 }
 0x8d9   : > { %2718 = vst [vmem:[%s2717_s16] sm:$0xff] %v2714_v46 }
 0x8da   : > { %3801 = shalt.err (!%p3798_p11)
}
 0x8db   : > { %s3802_s4 = scalar_lea.hbm %s4934_s25, 1024  ;;  %s3806_s28 = scalar_lea.hbm %s4985_s5, 2048 }
 0x8dc   : > { %p3803_p10 = scmp.ne.s32.totalorder %s4934_s25, %s3802_s4  ;;  %p3807_p4 = scmp.lt.u32.totalorder %s4934_s25, %s4985_s5 }
 0x8dd   : > { %p3808_p9 = scmp.lt.u32.totalorder %s3806_s28, %s3802_s4  ;;  %p3810_p3 = scmp.lt.u32.totalorder %s3802_s4, %s4934_s25 }
 0x8de   : > { %p3804_p7 = pnand %p3803_p10, %p5023_p0 }
 0x8df   : > { %p3809_p12 = por %p3808_p9, %p3807_p4 }
 0x8e0   : > { %p3805_p8 = pneg %p3804_p7 }
 0x8e1   : > { %p3811_p2 = por %p3810_p3, %p3809_p12 }
 0x8e3   : > { %p3812_p5 = pnand %p3811_p2, %p3805_p8 }
 0x8e5   : > { %3815 = shalt.err (!%p3812_p5)
}
 0x8e6   : > { %s3867_s26 = smov 128   ;;  %s3868_s12 = smov 256  }
 0x8e7   : > { %s3869_s9 = smov 8  }
 0x8e8   : > { %3544 = dma.vmem_to_hbm [thread:$0]  (%p5023_p0), %s4936_s7, 1024, %s4934_s25, %s2720_s0, %s3867_s26, %s3868_s12, %s3869_s9  }
 0x8e9 PF: > { %s2747_s13 = sand.u32 1, %s3846_s18   ;;  %p5024_p6 = scmp.ne.s32.totalorder %s5002_s6, 0 }
 0x8ea   : > { %p5025_p13 = scmp.ge.s32.totalorder %s3858_s21, 2  ;;  %s2748_s29 = scalar_lea.sflag [#allocation7], %s2747_s13 }
 0x8ec   : > { %p3554_p1 = pnand %p5025_p13, %p5024_p6 }
 0x8ee   : > { %3841 = dma.done.wait (!%p3554_p1), %s2748_s29, 1024  }
 0x8ef   : > { %3843 = vsyncadd (!%p3554_p1), %s2748_s29, 4294966272  ;;  %s5026_s16 = sld [smem:[#allocation14_spill]]  ;;  %p21_p11 = scmp.ge.s32.totalorder %s3925_s24, 4  }
 0x8f0   : > { %s5027_s18 = smov %s3850_s19  ;;  %s5028_s19 = smov %s3854_s20 }
 0x8f1   : > { %s5030_s21 = smov %s3925_s24  ;;  %23 = sbr.rel (!%p21_p11) target bundleno = 12 (0xc), region = 125 }
 0x8f5   : > { %s5029_s20 = smov %s5026_s16 }
 0x8f8   :  { %2753 = vsyncpa [#allocation6], 1 }
 0x8f9   :  { %2755 = vsyncpa [#allocation6 + $0x1], 1 }
 0x8fa   :  { %2756 = vsyncpa [#allocation9], 1 }
 0x8fb   :  { %2758 = vsyncpa [#allocation9 + $0x1], 1 }
 0x8fc   :  { %2759 = vsyncpa [#allocation7], 1 }
 0x8fd   :  { %2761 = vsyncpa [#allocation7 + $0x1], 1 }

</bundles_post_ra>
